<compile_context>
chip_gen: v7x
topology: tpu7x:2x2x1
jax: 0.10.0
libtpu: 0.0.40
codegen_flags: <defaults>
</compile_context>

<pallas_src>
import jax
import jax.numpy as jnp
from jax import lax
from jax.experimental import pallas as pl
from jax.experimental.pallas import tpu as pltpu

_LANE = 128
_SUBLANE = 8


def _build_kernel(num_layers, T, B, D, H):
    """Build the fused kernel body (closure over static shapes).

    Ref layout (inputs, outputs, scratch):
      x            : (T*B, D)      time-major, batch padded & flattened
      per layer    : w_ih (D_in,4H), w_hh (H,4H), b (1,4H)
      w_fc, b_fc   : (H,128), (1,128)   zero-padded FC head
      out          : (B, 128)           lane-dense; column 0 = prediction
      scratch      : xproj (T*B,4H), seq (T*B,H)   both VMEM
    """

    def kernel(*refs):
        x_ref = refs[0]
        layer_refs = refs[1:1 + 3 * num_layers]
        wfc_ref = refs[1 + 3 * num_layers]
        bfc_ref = refs[2 + 3 * num_layers]
        out_ref = refs[3 + 3 * num_layers]
        xproj_scr = refs[4 + 3 * num_layers]
        seq_scr = refs[5 + 3 * num_layers]

        h_last = jnp.zeros((B, H), jnp.float32)
        for layer in range(num_layers):
            w_ih = layer_refs[3 * layer][...]        # (D_in, 4H)
            w_hh = layer_refs[3 * layer + 1][...]    # (H, 4H)
            b = layer_refs[3 * layer + 2][...]       # (1, 4H)

            # Hoisted, non-recurrent input projection for ALL time steps at
            # once (bias folded in here, outside the recurrence).
            inp = x_ref[...] if layer == 0 else seq_scr[...]
            xproj_scr[...] = (
                jnp.dot(inp, w_ih, preferred_element_type=jnp.float32) + b)

            write_seq = layer != num_layers - 1      # last layer: only h_last

            def step(t, carry, w_hh=w_hh, write_seq=write_seq):
                h_prev, c_prev = carry
                row = t * B                          # B is a multiple of 8
                gates = xproj_scr[pl.ds(row, B), :] + jnp.dot(
                    h_prev, w_hh, preferred_element_type=jnp.float32)
                i_g = jax.nn.sigmoid(gates[:, 0 * H:1 * H])
                f_g = jax.nn.sigmoid(gates[:, 1 * H:2 * H])
                g_g = jnp.tanh(gates[:, 2 * H:3 * H])
                o_g = jax.nn.sigmoid(gates[:, 3 * H:4 * H])
                c_new = f_g * c_prev + i_g * g_g
                h_new = o_g * jnp.tanh(c_new)
                if write_seq:
                    seq_scr[pl.ds(row, B), :] = h_new
                return h_new, c_new

            h0 = jnp.zeros((B, H), jnp.float32)
            c0 = jnp.zeros((B, H), jnp.float32)
            h_last, _ = lax.fori_loop(0, T, step, (h0, c0), unroll=True)

        # Fused FC head; lane-dense (B, 128) store, prediction in column 0.
        out_ref[...] = (
            jnp.dot(h_last, wfc_ref[...], preferred_element_type=jnp.float32)
            + bfc_ref[...])

    return kernel


def _round_up(n, m):
    return ((n + m - 1) // m) * m


@jax.jit
def stock_lstm_forward(params, x_btd):
    """x_btd: (B, T, D) float32 -> (B,) float32, matching StockLSTM.forward."""
    B, T, D = x_btd.shape
    H = params["w_fc"].shape[0]
    num_layers = len(params["layers"])
    B_pad = _round_up(max(B, _SUBLANE), _SUBLANE)

    # Time-major, batch padded to a sublane multiple, flattened to (T*B_pad, D).
    x = jnp.transpose(x_btd, (1, 0, 2)).astype(jnp.float32)
    x = jnp.pad(x, ((0, 0), (0, B_pad - B), (0, 0)))
    x = x.reshape(T * B_pad, D)

    # Zero-pad the FC head to a full 128-lane output block.
    w_fc_pad = jnp.zeros((H, _LANE), jnp.float32).at[:, :1].set(params["w_fc"])
    b_fc_pad = jnp.zeros((1, _LANE), jnp.float32).at[:, :1].set(params["b_fc"])

    inputs = [x]
    for layer in params["layers"]:
        inputs += [layer["w_ih"], layer["w_hh"], layer["b"]]
    inputs += [w_fc_pad, b_fc_pad]

    kernel = _build_kernel(num_layers, T, B_pad, D, H)
    vmem = pltpu.MemorySpace.VMEM
    out = pl.pallas_call(
        kernel,
        out_shape=jax.ShapeDtypeStruct((B_pad, _LANE), jnp.float32),
        in_specs=[pl.BlockSpec(memory_space=vmem)] * len(inputs),
        out_specs=pl.BlockSpec(memory_space=vmem),
        scratch_shapes=[
            pltpu.VMEM((T * B_pad, 4 * H), jnp.float32),  # hoisted x-projection
            pltpu.VMEM((T * B_pad, H), jnp.float32),      # inter-layer hidden seq
        ],
    )(*inputs)
    return out[:B, 0]


def init_params(key, input_dim, hidden_dim, num_layers):
    """Deterministic synthetic params mirroring nn.LSTM / nn.Linear.

    PyTorch stores weight_ih_l{k}: (4H, D_in_k), weight_hh_l{k}: (4H, H),
    biases b_ih, b_hh: (4H,), gate order [i, f, g, o].  We keep transposed
    matmul-friendly layouts and fold the two biases into one.
    """
    params = {"layers": []}
    H = hidden_dim
    scale = 1.0 / jnp.sqrt(jnp.float32(H))
    for layer in range(num_layers):
        d_in = input_dim if layer == 0 else H
        key, k1, k2, k3, k4 = jax.random.split(key, 5)
        w_ih = jax.random.uniform(k1, (d_in, 4 * H), jnp.float32, -scale, scale)
        w_hh = jax.random.uniform(k2, (H, 4 * H), jnp.float32, -scale, scale)
        b_ih = jax.random.uniform(k3, (4 * H,), jnp.float32, -scale, scale)
        b_hh = jax.random.uniform(k4, (4 * H,), jnp.float32, -scale, scale)
        params["layers"].append(
            {"w_ih": w_ih, "w_hh": w_hh, "b": (b_ih + b_hh).reshape(1, 4 * H)}
        )
    key, k5, k6 = jax.random.split(key, 3)
    params["w_fc"] = jax.random.uniform(k5, (H, 1), jnp.float32, -scale, scale)
    params["b_fc"] = jax.random.uniform(k6, (1, 1), jnp.float32, -scale, scale)
    return params


if __name__ == "__main__":
    B, T, D = 4, 8, 8          # batch, seq len, input_dim
    HIDDEN, NUM_LAYERS = 32, 4

    key = jax.random.PRNGKey(0)
    key, kp, kx = jax.random.split(key, 3)
    params = init_params(kp, D, HIDDEN, NUM_LAYERS)
    x = jax.random.normal(kx, (B, T, D), jnp.float32)

    out = stock_lstm_forward(params, x)
    jax.block_until_ready(out)
    assert out.shape == (B,), out.shape
    print("KERNEL_OK")
</pallas_src>

<mosaic_0001>
module attributes {stable_mosaic.version = 11 : i64} {
  func.func @kernel(%arg0: memref<64x8xf32, #tpu.memory_space<vmem>>, %arg1: memref<8x128xf32, #tpu.memory_space<vmem>>, %arg2: memref<32x128xf32, #tpu.memory_space<vmem>>, %arg3: memref<1x128xf32, #tpu.memory_space<vmem>>, %arg4: memref<32x128xf32, #tpu.memory_space<vmem>>, %arg5: memref<32x128xf32, #tpu.memory_space<vmem>>, %arg6: memref<1x128xf32, #tpu.memory_space<vmem>>, %arg7: memref<32x128xf32, #tpu.memory_space<vmem>>, %arg8: memref<32x128xf32, #tpu.memory_space<vmem>>, %arg9: memref<1x128xf32, #tpu.memory_space<vmem>>, %arg10: memref<32x128xf32, #tpu.memory_space<vmem>>, %arg11: memref<32x128xf32, #tpu.memory_space<vmem>>, %arg12: memref<1x128xf32, #tpu.memory_space<vmem>>, %arg13: memref<32x128xf32, #tpu.memory_space<vmem>>, %arg14: memref<1x128xf32, #tpu.memory_space<vmem>>, %arg15: memref<8x128xf32, #tpu.memory_space<vmem>>, %arg16: memref<64x128xf32, #tpu.memory_space<vmem>>, %arg17: memref<64x32xf32, #tpu.memory_space<vmem>>) attributes {dimension_semantics = [], scalar_prefetch = 0 : i64, scratch_operands = 2 : i64, tpu.core_type = #tpu.core_type<tc>} {
    %c0 = arith.constant 0 : index
    %c0_0 = arith.constant 0 : index
    %0 = vector.load %arg1[%c0, %c0_0] : memref<8x128xf32, #tpu.memory_space<vmem>>, vector<8x128xf32>
    %c0_1 = arith.constant 0 : index
    %c0_2 = arith.constant 0 : index
    %1 = vector.load %arg2[%c0_1, %c0_2] : memref<32x128xf32, #tpu.memory_space<vmem>>, vector<32x128xf32>
    %c0_3 = arith.constant 0 : index
    %c0_4 = arith.constant 0 : index
    %2 = vector.load %arg3[%c0_3, %c0_4] : memref<1x128xf32, #tpu.memory_space<vmem>>, vector<1x128xf32>
    %c0_5 = arith.constant 0 : index
    %c0_6 = arith.constant 0 : index
    %3 = vector.load %arg0[%c0_5, %c0_6] : memref<64x8xf32, #tpu.memory_space<vmem>>, vector<64x8xf32>
    %cst = arith.constant dense<0.000000e+00> : vector<64x128xf32>
    %4 = tpu.matmul %3, %0, %cst {dimension_numbers = #tpu.dot_dimension_numbers<[1], [0], [0], [1], [0, 0, 1, 1], [], []>} : vector<64x8xf32>, vector<8x128xf32>, vector<64x128xf32> -> vector<64x128xf32>
    %5 = vector.broadcast %2 : vector<1x128xf32> to vector<64x128xf32>
    %6 = arith.addf %4, %5 : vector<64x128xf32>
    %c0_7 = arith.constant 0 : index
    %c0_8 = arith.constant 0 : index
    %7 = vector.load %arg16[%c0_7, %c0_8] : memref<64x128xf32, #tpu.memory_space<vmem>>, vector<64x128xf32>
    tpu.vector_store %arg16[%c0_7, %c0_8], %6 {strides = array<i32>} : memref<64x128xf32, #tpu.memory_space<vmem>>, vector<64x128xf32>,
    %cst_9 = arith.constant 0.000000e+00 : f32
    %8 = vector.broadcast %cst_9 : f32 to vector<8x32xf32>
    %cst_10 = arith.constant 0.000000e+00 : f32
    %9 = vector.broadcast %cst_10 : f32 to vector<8x32xf32>
    %c0_i32 = arith.constant 0 : i32
    %c8_i32 = arith.constant 8 : i32
    %10 = arith.muli %c0_i32, %c8_i32 : i32
    %11 = arith.index_cast %10 : i32 to index
    %c0_11 = arith.constant 0 : index
    %12 = vector.load %arg16[%11, %c0_11] : memref<64x128xf32, #tpu.memory_space<vmem>>, vector<8x128xf32>
    %cst_12 = arith.constant dense<0.000000e+00> : vector<8x128xf32>
    %13 = tpu.matmul %8, %1, %cst_12 {dimension_numbers = #tpu.dot_dimension_numbers<[1], [0], [0], [1], [0, 0, 1, 1], [], []>} : vector<8x32xf32>, vector<32x128xf32>, vector<8x128xf32> -> vector<8x128xf32>
    %14 = arith.addf %12, %13 : vector<8x128xf32>
    %15 = vector.extract_strided_slice %14 {offsets = [0, 0], sizes = [8, 32], strides = [1, 1]} : vector<8x128xf32> to vector<8x32xf32>
    %16 = arith.negf %15 : vector<8x32xf32>
    %17 = math.exp %16 : vector<8x32xf32>
    %cst_13 = arith.constant 1.000000e+00 : f32
    %18 = vector.broadcast %cst_13 : f32 to vector<8x32xf32>
    %19 = arith.addf %18, %17 : vector<8x32xf32>
    %20 = arith.divf %18, %19 : vector<8x32xf32>
    %21 = vector.extract_strided_slice %14 {offsets = [0, 32], sizes = [8, 32], strides = [1, 1]} : vector<8x128xf32> to vector<8x32xf32>
    %22 = arith.negf %21 : vector<8x32xf32>
    %23 = math.exp %22 : vector<8x32xf32>
    %cst_14 = arith.constant 1.000000e+00 : f32
    %24 = vector.broadcast %cst_14 : f32 to vector<8x32xf32>
    %25 = arith.addf %24, %23 : vector<8x32xf32>
    %26 = arith.divf %24, %25 : vector<8x32xf32>
    %27 = vector.extract_strided_slice %14 {offsets = [0, 64], sizes = [8, 32], strides = [1, 1]} : vector<8x128xf32> to vector<8x32xf32>
    %28 = math.tanh %27 : vector<8x32xf32>
    %29 = vector.extract_strided_slice %14 {offsets = [0, 96], sizes = [8, 32], strides = [1, 1]} : vector<8x128xf32> to vector<8x32xf32>
    %30 = arith.negf %29 : vector<8x32xf32>
    %31 = math.exp %30 : vector<8x32xf32>
    %cst_15 = arith.constant 1.000000e+00 : f32
    %32 = vector.broadcast %cst_15 : f32 to vector<8x32xf32>
    %33 = arith.addf %32, %31 : vector<8x32xf32>
    %34 = arith.divf %32, %33 : vector<8x32xf32>
    %35 = arith.mulf %26, %9 : vector<8x32xf32>
    %36 = arith.mulf %20, %28 : vector<8x32xf32>
    %37 = arith.addf %35, %36 : vector<8x32xf32>
    %38 = math.tanh %37 : vector<8x32xf32>
    %39 = arith.mulf %34, %38 : vector<8x32xf32>
    %40 = arith.index_cast %10 : i32 to index
    %c0_16 = arith.constant 0 : index
    %41 = vector.load %arg17[%40, %c0_16] : memref<64x32xf32, #tpu.memory_space<vmem>>, vector<8x32xf32>
    tpu.vector_store %arg17[%40, %c0_16], %39 {strides = array<i32>} : memref<64x32xf32, #tpu.memory_space<vmem>>, vector<8x32xf32>,
    %c1_i32 = arith.constant 1 : i32
    %c8_i32_17 = arith.constant 8 : i32
    %42 = arith.muli %c1_i32, %c8_i32_17 : i32
    %43 = arith.index_cast %42 : i32 to index
    %c0_18 = arith.constant 0 : index
    %44 = vector.load %arg16[%43, %c0_18] : memref<64x128xf32, #tpu.memory_space<vmem>>, vector<8x128xf32>
    %cst_19 = arith.constant dense<0.000000e+00> : vector<8x128xf32>
    %45 = tpu.matmul %39, %1, %cst_19 {dimension_numbers = #tpu.dot_dimension_numbers<[1], [0], [0], [1], [0, 0, 1, 1], [], []>} : vector<8x32xf32>, vector<32x128xf32>, vector<8x128xf32> -> vector<8x128xf32>
    %46 = arith.addf %44, %45 : vector<8x128xf32>
    %47 = vector.extract_strided_slice %46 {offsets = [0, 0], sizes = [8, 32], strides = [1, 1]} : vector<8x128xf32> to vector<8x32xf32>
    %48 = arith.negf %47 : vector<8x32xf32>
    %49 = math.exp %48 : vector<8x32xf32>
    %cst_20 = arith.constant 1.000000e+00 : f32
    %50 = vector.broadcast %cst_20 : f32 to vector<8x32xf32>
    %51 = arith.addf %50, %49 : vector<8x32xf32>
    %52 = arith.divf %50, %51 : vector<8x32xf32>
    %53 = vector.extract_strided_slice %46 {offsets = [0, 32], sizes = [8, 32], strides = [1, 1]} : vector<8x128xf32> to vector<8x32xf32>
    %54 = arith.negf %53 : vector<8x32xf32>
    %55 = math.exp %54 : vector<8x32xf32>
    %cst_21 = arith.constant 1.000000e+00 : f32
    %56 = vector.broadcast %cst_21 : f32 to vector<8x32xf32>
    %57 = arith.addf %56, %55 : vector<8x32xf32>
    %58 = arith.divf %56, %57 : vector<8x32xf32>
    %59 = vector.extract_strided_slice %46 {offsets = [0, 64], sizes = [8, 32], strides = [1, 1]} : vector<8x128xf32> to vector<8x32xf32>
    %60 = math.tanh %59 : vector<8x32xf32>
    %61 = vector.extract_strided_slice %46 {offsets = [0, 96], sizes = [8, 32], strides = [1, 1]} : vector<8x128xf32> to vector<8x32xf32>
    %62 = arith.negf %61 : vector<8x32xf32>
    %63 = math.exp %62 : vector<8x32xf32>
    %cst_22 = arith.constant 1.000000e+00 : f32
    %64 = vector.broadcast %cst_22 : f32 to vector<8x32xf32>
    %65 = arith.addf %64, %63 : vector<8x32xf32>
    %66 = arith.divf %64, %65 : vector<8x32xf32>
    %67 = arith.mulf %58, %37 : vector<8x32xf32>
    %68 = arith.mulf %52, %60 : vector<8x32xf32>
    %69 = arith.addf %67, %68 : vector<8x32xf32>
    %70 = math.tanh %69 : vector<8x32xf32>
    %71 = arith.mulf %66, %70 : vector<8x32xf32>
    %72 = arith.index_cast %42 : i32 to index
    %c0_23 = arith.constant 0 : index
    %73 = vector.load %arg17[%72, %c0_23] : memref<64x32xf32, #tpu.memory_space<vmem>>, vector<8x32xf32>
    tpu.vector_store %arg17[%72, %c0_23], %71 {strides = array<i32>} : memref<64x32xf32, #tpu.memory_space<vmem>>, vector<8x32xf32>,
    %c2_i32 = arith.constant 2 : i32
    %c8_i32_24 = arith.constant 8 : i32
    %74 = arith.muli %c2_i32, %c8_i32_24 : i32
    %75 = arith.index_cast %74 : i32 to index
    %c0_25 = arith.constant 0 : index
    %76 = vector.load %arg16[%75, %c0_25] : memref<64x128xf32, #tpu.memory_space<vmem>>, vector<8x128xf32>
    %cst_26 = arith.constant dense<0.000000e+00> : vector<8x128xf32>
    %77 = tpu.matmul %71, %1, %cst_26 {dimension_numbers = #tpu.dot_dimension_numbers<[1], [0], [0], [1], [0, 0, 1, 1], [], []>} : vector<8x32xf32>, vector<32x128xf32>, vector<8x128xf32> -> vector<8x128xf32>
    %78 = arith.addf %76, %77 : vector<8x128xf32>
    %79 = vector.extract_strided_slice %78 {offsets = [0, 0], sizes = [8, 32], strides = [1, 1]} : vector<8x128xf32> to vector<8x32xf32>
    %80 = arith.negf %79 : vector<8x32xf32>
    %81 = math.exp %80 : vector<8x32xf32>
    %cst_27 = arith.constant 1.000000e+00 : f32
    %82 = vector.broadcast %cst_27 : f32 to vector<8x32xf32>
    %83 = arith.addf %82, %81 : vector<8x32xf32>
    %84 = arith.divf %82, %83 : vector<8x32xf32>
    %85 = vector.extract_strided_slice %78 {offsets = [0, 32], sizes = [8, 32], strides = [1, 1]} : vector<8x128xf32> to vector<8x32xf32>
    %86 = arith.negf %85 : vector<8x32xf32>
    %87 = math.exp %86 : vector<8x32xf32>
    %cst_28 = arith.constant 1.000000e+00 : f32
    %88 = vector.broadcast %cst_28 : f32 to vector<8x32xf32>
    %89 = arith.addf %88, %87 : vector<8x32xf32>
    %90 = arith.divf %88, %89 : vector<8x32xf32>
    %91 = vector.extract_strided_slice %78 {offsets = [0, 64], sizes = [8, 32], strides = [1, 1]} : vector<8x128xf32> to vector<8x32xf32>
    %92 = math.tanh %91 : vector<8x32xf32>
    %93 = vector.extract_strided_slice %78 {offsets = [0, 96], sizes = [8, 32], strides = [1, 1]} : vector<8x128xf32> to vector<8x32xf32>
    %94 = arith.negf %93 : vector<8x32xf32>
    %95 = math.exp %94 : vector<8x32xf32>
    %cst_29 = arith.constant 1.000000e+00 : f32
    %96 = vector.broadcast %cst_29 : f32 to vector<8x32xf32>
    %97 = arith.addf %96, %95 : vector<8x32xf32>
    %98 = arith.divf %96, %97 : vector<8x32xf32>
    %99 = arith.mulf %90, %69 : vector<8x32xf32>
    %100 = arith.mulf %84, %92 : vector<8x32xf32>
    %101 = arith.addf %99, %100 : vector<8x32xf32>
    %102 = math.tanh %101 : vector<8x32xf32>
    %103 = arith.mulf %98, %102 : vector<8x32xf32>
    %104 = arith.index_cast %74 : i32 to index
    %c0_30 = arith.constant 0 : index
    %105 = vector.load %arg17[%104, %c0_30] : memref<64x32xf32, #tpu.memory_space<vmem>>, vector<8x32xf32>
    tpu.vector_store %arg17[%104, %c0_30], %103 {strides = array<i32>} : memref<64x32xf32, #tpu.memory_space<vmem>>, vector<8x32xf32>,
    %c3_i32 = arith.constant 3 : i32
    %c8_i32_31 = arith.constant 8 : i32
    %106 = arith.muli %c3_i32, %c8_i32_31 : i32
    %107 = arith.index_cast %106 : i32 to index
    %c0_32 = arith.constant 0 : index
    %108 = vector.load %arg16[%107, %c0_32] : memref<64x128xf32, #tpu.memory_space<vmem>>, vector<8x128xf32>
    %cst_33 = arith.constant dense<0.000000e+00> : vector<8x128xf32>
    %109 = tpu.matmul %103, %1, %cst_33 {dimension_numbers = #tpu.dot_dimension_numbers<[1], [0], [0], [1], [0, 0, 1, 1], [], []>} : vector<8x32xf32>, vector<32x128xf32>, vector<8x128xf32> -> vector<8x128xf32>
    %110 = arith.addf %108, %109 : vector<8x128xf32>
    %111 = vector.extract_strided_slice %110 {offsets = [0, 0], sizes = [8, 32], strides = [1, 1]} : vector<8x128xf32> to vector<8x32xf32>
    %112 = arith.negf %111 : vector<8x32xf32>
    %113 = math.exp %112 : vector<8x32xf32>
    %cst_34 = arith.constant 1.000000e+00 : f32
    %114 = vector.broadcast %cst_34 : f32 to vector<8x32xf32>
    %115 = arith.addf %114, %113 : vector<8x32xf32>
    %116 = arith.divf %114, %115 : vector<8x32xf32>
    %117 = vector.extract_strided_slice %110 {offsets = [0, 32], sizes = [8, 32], strides = [1, 1]} : vector<8x128xf32> to vector<8x32xf32>
    %118 = arith.negf %117 : vector<8x32xf32>
    %119 = math.exp %118 : vector<8x32xf32>
    %cst_35 = arith.constant 1.000000e+00 : f32
    %120 = vector.broadcast %cst_35 : f32 to vector<8x32xf32>
    %121 = arith.addf %120, %119 : vector<8x32xf32>
    %122 = arith.divf %120, %121 : vector<8x32xf32>
    %123 = vector.extract_strided_slice %110 {offsets = [0, 64], sizes = [8, 32], strides = [1, 1]} : vector<8x128xf32> to vector<8x32xf32>
    %124 = math.tanh %123 : vector<8x32xf32>
    %125 = vector.extract_strided_slice %110 {offsets = [0, 96], sizes = [8, 32], strides = [1, 1]} : vector<8x128xf32> to vector<8x32xf32>
    %126 = arith.negf %125 : vector<8x32xf32>
    %127 = math.exp %126 : vector<8x32xf32>
    %cst_36 = arith.constant 1.000000e+00 : f32
    %128 = vector.broadcast %cst_36 : f32 to vector<8x32xf32>
    %129 = arith.addf %128, %127 : vector<8x32xf32>
    %130 = arith.divf %128, %129 : vector<8x32xf32>
    %131 = arith.mulf %122, %101 : vector<8x32xf32>
    %132 = arith.mulf %116, %124 : vector<8x32xf32>
    %133 = arith.addf %131, %132 : vector<8x32xf32>
    %134 = math.tanh %133 : vector<8x32xf32>
    %135 = arith.mulf %130, %134 : vector<8x32xf32>
    %136 = arith.index_cast %106 : i32 to index
    %c0_37 = arith.constant 0 : index
    %137 = vector.load %arg17[%136, %c0_37] : memref<64x32xf32, #tpu.memory_space<vmem>>, vector<8x32xf32>
    tpu.vector_store %arg17[%136, %c0_37], %135 {strides = array<i32>} : memref<64x32xf32, #tpu.memory_space<vmem>>, vector<8x32xf32>,
    %c4_i32 = arith.constant 4 : i32
    %c8_i32_38 = arith.constant 8 : i32
    %138 = arith.muli %c4_i32, %c8_i32_38 : i32
    %139 = arith.index_cast %138 : i32 to index
    %c0_39 = arith.constant 0 : index
    %140 = vector.load %arg16[%139, %c0_39] : memref<64x128xf32, #tpu.memory_space<vmem>>, vector<8x128xf32>
    %cst_40 = arith.constant dense<0.000000e+00> : vector<8x128xf32>
    %141 = tpu.matmul %135, %1, %cst_40 {dimension_numbers = #tpu.dot_dimension_numbers<[1], [0], [0], [1], [0, 0, 1, 1], [], []>} : vector<8x32xf32>, vector<32x128xf32>, vector<8x128xf32> -> vector<8x128xf32>
    %142 = arith.addf %140, %141 : vector<8x128xf32>
    %143 = vector.extract_strided_slice %142 {offsets = [0, 0], sizes = [8, 32], strides = [1, 1]} : vector<8x128xf32> to vector<8x32xf32>
    %144 = arith.negf %143 : vector<8x32xf32>
    %145 = math.exp %144 : vector<8x32xf32>
    %cst_41 = arith.constant 1.000000e+00 : f32
    %146 = vector.broadcast %cst_41 : f32 to vector<8x32xf32>
    %147 = arith.addf %146, %145 : vector<8x32xf32>
    %148 = arith.divf %146, %147 : vector<8x32xf32>
    %149 = vector.extract_strided_slice %142 {offsets = [0, 32], sizes = [8, 32], strides = [1, 1]} : vector<8x128xf32> to vector<8x32xf32>
    %150 = arith.negf %149 : vector<8x32xf32>
    %151 = math.exp %150 : vector<8x32xf32>
    %cst_42 = arith.constant 1.000000e+00 : f32
    %152 = vector.broadcast %cst_42 : f32 to vector<8x32xf32>
    %153 = arith.addf %152, %151 : vector<8x32xf32>
    %154 = arith.divf %152, %153 : vector<8x32xf32>
    %155 = vector.extract_strided_slice %142 {offsets = [0, 64], sizes = [8, 32], strides = [1, 1]} : vector<8x128xf32> to vector<8x32xf32>
    %156 = math.tanh %155 : vector<8x32xf32>
    %157 = vector.extract_strided_slice %142 {offsets = [0, 96], sizes = [8, 32], strides = [1, 1]} : vector<8x128xf32> to vector<8x32xf32>
    %158 = arith.negf %157 : vector<8x32xf32>
    %159 = math.exp %158 : vector<8x32xf32>
    %cst_43 = arith.constant 1.000000e+00 : f32
    %160 = vector.broadcast %cst_43 : f32 to vector<8x32xf32>
    %161 = arith.addf %160, %159 : vector<8x32xf32>
    %162 = arith.divf %160, %161 : vector<8x32xf32>
    %163 = arith.mulf %154, %133 : vector<8x32xf32>
    %164 = arith.mulf %148, %156 : vector<8x32xf32>
    %165 = arith.addf %163, %164 : vector<8x32xf32>
    %166 = math.tanh %165 : vector<8x32xf32>
    %167 = arith.mulf %162, %166 : vector<8x32xf32>
    %168 = arith.index_cast %138 : i32 to index
    %c0_44 = arith.constant 0 : index
    %169 = vector.load %arg17[%168, %c0_44] : memref<64x32xf32, #tpu.memory_space<vmem>>, vector<8x32xf32>
    tpu.vector_store %arg17[%168, %c0_44], %167 {strides = array<i32>} : memref<64x32xf32, #tpu.memory_space<vmem>>, vector<8x32xf32>,
    %c5_i32 = arith.constant 5 : i32
    %c8_i32_45 = arith.constant 8 : i32
    %170 = arith.muli %c5_i32, %c8_i32_45 : i32
    %171 = arith.index_cast %170 : i32 to index
    %c0_46 = arith.constant 0 : index
    %172 = vector.load %arg16[%171, %c0_46] : memref<64x128xf32, #tpu.memory_space<vmem>>, vector<8x128xf32>
    %cst_47 = arith.constant dense<0.000000e+00> : vector<8x128xf32>
    %173 = tpu.matmul %167, %1, %cst_47 {dimension_numbers = #tpu.dot_dimension_numbers<[1], [0], [0], [1], [0, 0, 1, 1], [], []>} : vector<8x32xf32>, vector<32x128xf32>, vector<8x128xf32> -> vector<8x128xf32>
    %174 = arith.addf %172, %173 : vector<8x128xf32>
    %175 = vector.extract_strided_slice %174 {offsets = [0, 0], sizes = [8, 32], strides = [1, 1]} : vector<8x128xf32> to vector<8x32xf32>
    %176 = arith.negf %175 : vector<8x32xf32>
    %177 = math.exp %176 : vector<8x32xf32>
    %cst_48 = arith.constant 1.000000e+00 : f32
    %178 = vector.broadcast %cst_48 : f32 to vector<8x32xf32>
    %179 = arith.addf %178, %177 : vector<8x32xf32>
    %180 = arith.divf %178, %179 : vector<8x32xf32>
    %181 = vector.extract_strided_slice %174 {offsets = [0, 32], sizes = [8, 32], strides = [1, 1]} : vector<8x128xf32> to vector<8x32xf32>
    %182 = arith.negf %181 : vector<8x32xf32>
    %183 = math.exp %182 : vector<8x32xf32>
    %cst_49 = arith.constant 1.000000e+00 : f32
    %184 = vector.broadcast %cst_49 : f32 to vector<8x32xf32>
    %185 = arith.addf %184, %183 : vector<8x32xf32>
    %186 = arith.divf %184, %185 : vector<8x32xf32>
    %187 = vector.extract_strided_slice %174 {offsets = [0, 64], sizes = [8, 32], strides = [1, 1]} : vector<8x128xf32> to vector<8x32xf32>
    %188 = math.tanh %187 : vector<8x32xf32>
    %189 = vector.extract_strided_slice %174 {offsets = [0, 96], sizes = [8, 32], strides = [1, 1]} : vector<8x128xf32> to vector<8x32xf32>
    %190 = arith.negf %189 : vector<8x32xf32>
    %191 = math.exp %190 : vector<8x32xf32>
    %cst_50 = arith.constant 1.000000e+00 : f32
    %192 = vector.broadcast %cst_50 : f32 to vector<8x32xf32>
    %193 = arith.addf %192, %191 : vector<8x32xf32>
    %194 = arith.divf %192, %193 : vector<8x32xf32>
    %195 = arith.mulf %186, %165 : vector<8x32xf32>
    %196 = arith.mulf %180, %188 : vector<8x32xf32>
    %197 = arith.addf %195, %196 : vector<8x32xf32>
    %198 = math.tanh %197 : vector<8x32xf32>
    %199 = arith.mulf %194, %198 : vector<8x32xf32>
    %200 = arith.index_cast %170 : i32 to index
    %c0_51 = arith.constant 0 : index
    %201 = vector.load %arg17[%200, %c0_51] : memref<64x32xf32, #tpu.memory_space<vmem>>, vector<8x32xf32>
    tpu.vector_store %arg17[%200, %c0_51], %199 {strides = array<i32>} : memref<64x32xf32, #tpu.memory_space<vmem>>, vector<8x32xf32>,
    %c6_i32 = arith.constant 6 : i32
    %c8_i32_52 = arith.constant 8 : i32
    %202 = arith.muli %c6_i32, %c8_i32_52 : i32
    %203 = arith.index_cast %202 : i32 to index
    %c0_53 = arith.constant 0 : index
    %204 = vector.load %arg16[%203, %c0_53] : memref<64x128xf32, #tpu.memory_space<vmem>>, vector<8x128xf32>
    %cst_54 = arith.constant dense<0.000000e+00> : vector<8x128xf32>
    %205 = tpu.matmul %199, %1, %cst_54 {dimension_numbers = #tpu.dot_dimension_numbers<[1], [0], [0], [1], [0, 0, 1, 1], [], []>} : vector<8x32xf32>, vector<32x128xf32>, vector<8x128xf32> -> vector<8x128xf32>
    %206 = arith.addf %204, %205 : vector<8x128xf32>
    %207 = vector.extract_strided_slice %206 {offsets = [0, 0], sizes = [8, 32], strides = [1, 1]} : vector<8x128xf32> to vector<8x32xf32>
    %208 = arith.negf %207 : vector<8x32xf32>
    %209 = math.exp %208 : vector<8x32xf32>
    %cst_55 = arith.constant 1.000000e+00 : f32
    %210 = vector.broadcast %cst_55 : f32 to vector<8x32xf32>
    %211 = arith.addf %210, %209 : vector<8x32xf32>
    %212 = arith.divf %210, %211 : vector<8x32xf32>
    %213 = vector.extract_strided_slice %206 {offsets = [0, 32], sizes = [8, 32], strides = [1, 1]} : vector<8x128xf32> to vector<8x32xf32>
    %214 = arith.negf %213 : vector<8x32xf32>
    %215 = math.exp %214 : vector<8x32xf32>
    %cst_56 = arith.constant 1.000000e+00 : f32
    %216 = vector.broadcast %cst_56 : f32 to vector<8x32xf32>
    %217 = arith.addf %216, %215 : vector<8x32xf32>
    %218 = arith.divf %216, %217 : vector<8x32xf32>
    %219 = vector.extract_strided_slice %206 {offsets = [0, 64], sizes = [8, 32], strides = [1, 1]} : vector<8x128xf32> to vector<8x32xf32>
    %220 = math.tanh %219 : vector<8x32xf32>
    %221 = vector.extract_strided_slice %206 {offsets = [0, 96], sizes = [8, 32], strides = [1, 1]} : vector<8x128xf32> to vector<8x32xf32>
    %222 = arith.negf %221 : vector<8x32xf32>
    %223 = math.exp %222 : vector<8x32xf32>
    %cst_57 = arith.constant 1.000000e+00 : f32
    %224 = vector.broadcast %cst_57 : f32 to vector<8x32xf32>
    %225 = arith.addf %224, %223 : vector<8x32xf32>
    %226 = arith.divf %224, %225 : vector<8x32xf32>
    %227 = arith.mulf %218, %197 : vector<8x32xf32>
    %228 = arith.mulf %212, %220 : vector<8x32xf32>
    %229 = arith.addf %227, %228 : vector<8x32xf32>
    %230 = math.tanh %229 : vector<8x32xf32>
    %231 = arith.mulf %226, %230 : vector<8x32xf32>
    %232 = arith.index_cast %202 : i32 to index
    %c0_58 = arith.constant 0 : index
    %233 = vector.load %arg17[%232, %c0_58] : memref<64x32xf32, #tpu.memory_space<vmem>>, vector<8x32xf32>
    tpu.vector_store %arg17[%232, %c0_58], %231 {strides = array<i32>} : memref<64x32xf32, #tpu.memory_space<vmem>>, vector<8x32xf32>,
    %c7_i32 = arith.constant 7 : i32
    %c8_i32_59 = arith.constant 8 : i32
    %234 = arith.muli %c7_i32, %c8_i32_59 : i32
    %235 = arith.index_cast %234 : i32 to index
    %c0_60 = arith.constant 0 : index
    %236 = vector.load %arg16[%235, %c0_60] : memref<64x128xf32, #tpu.memory_space<vmem>>, vector<8x128xf32>
    %cst_61 = arith.constant dense<0.000000e+00> : vector<8x128xf32>
    %237 = tpu.matmul %231, %1, %cst_61 {dimension_numbers = #tpu.dot_dimension_numbers<[1], [0], [0], [1], [0, 0, 1, 1], [], []>} : vector<8x32xf32>, vector<32x128xf32>, vector<8x128xf32> -> vector<8x128xf32>
    %238 = arith.addf %236, %237 : vector<8x128xf32>
    %239 = vector.extract_strided_slice %238 {offsets = [0, 0], sizes = [8, 32], strides = [1, 1]} : vector<8x128xf32> to vector<8x32xf32>
    %240 = arith.negf %239 : vector<8x32xf32>
    %241 = math.exp %240 : vector<8x32xf32>
    %cst_62 = arith.constant 1.000000e+00 : f32
    %242 = vector.broadcast %cst_62 : f32 to vector<8x32xf32>
    %243 = arith.addf %242, %241 : vector<8x32xf32>
    %244 = arith.divf %242, %243 : vector<8x32xf32>
    %245 = vector.extract_strided_slice %238 {offsets = [0, 32], sizes = [8, 32], strides = [1, 1]} : vector<8x128xf32> to vector<8x32xf32>
    %246 = arith.negf %245 : vector<8x32xf32>
    %247 = math.exp %246 : vector<8x32xf32>
    %cst_63 = arith.constant 1.000000e+00 : f32
    %248 = vector.broadcast %cst_63 : f32 to vector<8x32xf32>
    %249 = arith.addf %248, %247 : vector<8x32xf32>
    %250 = arith.divf %248, %249 : vector<8x32xf32>
    %251 = vector.extract_strided_slice %238 {offsets = [0, 64], sizes = [8, 32], strides = [1, 1]} : vector<8x128xf32> to vector<8x32xf32>
    %252 = math.tanh %251 : vector<8x32xf32>
    %253 = vector.extract_strided_slice %238 {offsets = [0, 96], sizes = [8, 32], strides = [1, 1]} : vector<8x128xf32> to vector<8x32xf32>
    %254 = arith.negf %253 : vector<8x32xf32>
    %255 = math.exp %254 : vector<8x32xf32>
    %cst_64 = arith.constant 1.000000e+00 : f32
    %256 = vector.broadcast %cst_64 : f32 to vector<8x32xf32>
    %257 = arith.addf %256, %255 : vector<8x32xf32>
    %258 = arith.divf %256, %257 : vector<8x32xf32>
    %259 = arith.mulf %250, %229 : vector<8x32xf32>
    %260 = arith.mulf %244, %252 : vector<8x32xf32>
    %261 = arith.addf %259, %260 : vector<8x32xf32>
    %262 = math.tanh %261 : vector<8x32xf32>
    %263 = arith.mulf %258, %262 : vector<8x32xf32>
    %264 = arith.index_cast %234 : i32 to index
    %c0_65 = arith.constant 0 : index
    %265 = vector.load %arg17[%264, %c0_65] : memref<64x32xf32, #tpu.memory_space<vmem>>, vector<8x32xf32>
    tpu.vector_store %arg17[%264, %c0_65], %263 {strides = array<i32>} : memref<64x32xf32, #tpu.memory_space<vmem>>, vector<8x32xf32>,
    %c8_i32_66 = arith.constant 8 : i32
    %c0_67 = arith.constant 0 : index
    %c0_68 = arith.constant 0 : index
    %266 = vector.load %arg4[%c0_67, %c0_68] : memref<32x128xf32, #tpu.memory_space<vmem>>, vector<32x128xf32>
    %c0_69 = arith.constant 0 : index
    %c0_70 = arith.constant 0 : index
    %267 = vector.load %arg5[%c0_69, %c0_70] : memref<32x128xf32, #tpu.memory_space<vmem>>, vector<32x128xf32>
    %c0_71 = arith.constant 0 : index
    %c0_72 = arith.constant 0 : index
    %268 = vector.load %arg6[%c0_71, %c0_72] : memref<1x128xf32, #tpu.memory_space<vmem>>, vector<1x128xf32>
    %c0_73 = arith.constant 0 : index
    %c0_74 = arith.constant 0 : index
    %269 = vector.load %arg17[%c0_73, %c0_74] : memref<64x32xf32, #tpu.memory_space<vmem>>, vector<64x32xf32>
    %cst_75 = arith.constant dense<0.000000e+00> : vector<64x128xf32>
    %270 = tpu.matmul %269, %266, %cst_75 {dimension_numbers = #tpu.dot_dimension_numbers<[1], [0], [0], [1], [0, 0, 1, 1], [], []>} : vector<64x32xf32>, vector<32x128xf32>, vector<64x128xf32> -> vector<64x128xf32>
    %271 = vector.broadcast %268 : vector<1x128xf32> to vector<64x128xf32>
    %272 = arith.addf %270, %271 : vector<64x128xf32>
    %c0_76 = arith.constant 0 : index
    %c0_77 = arith.constant 0 : index
    %273 = vector.load %arg16[%c0_76, %c0_77] : memref<64x128xf32, #tpu.memory_space<vmem>>, vector<64x128xf32>
    tpu.vector_store %arg16[%c0_76, %c0_77], %272 {strides = array<i32>} : memref<64x128xf32, #tpu.memory_space<vmem>>, vector<64x128xf32>,
    %cst_78 = arith.constant 0.000000e+00 : f32
    %274 = vector.broadcast %cst_78 : f32 to vector<8x32xf32>
    %cst_79 = arith.constant 0.000000e+00 : f32
    %275 = vector.broadcast %cst_79 : f32 to vector<8x32xf32>
    %c0_i32_80 = arith.constant 0 : i32
    %c8_i32_81 = arith.constant 8 : i32
    %276 = arith.muli %c0_i32_80, %c8_i32_81 : i32
    %277 = arith.index_cast %276 : i32 to index
    %c0_82 = arith.constant 0 : index
    %278 = vector.load %arg16[%277, %c0_82] : memref<64x128xf32, #tpu.memory_space<vmem>>, vector<8x128xf32>
    %cst_83 = arith.constant dense<0.000000e+00> : vector<8x128xf32>
    %279 = tpu.matmul %274, %267, %cst_83 {dimension_numbers = #tpu.dot_dimension_numbers<[1], [0], [0], [1], [0, 0, 1, 1], [], []>} : vector<8x32xf32>, vector<32x128xf32>, vector<8x128xf32> -> vector<8x128xf32>
    %280 = arith.addf %278, %279 : vector<8x128xf32>
    %281 = vector.extract_strided_slice %280 {offsets = [0, 0], sizes = [8, 32], strides = [1, 1]} : vector<8x128xf32> to vector<8x32xf32>
    %282 = arith.negf %281 : vector<8x32xf32>
    %283 = math.exp %282 : vector<8x32xf32>
    %cst_84 = arith.constant 1.000000e+00 : f32
    %284 = vector.broadcast %cst_84 : f32 to vector<8x32xf32>
    %285 = arith.addf %284, %283 : vector<8x32xf32>
    %286 = arith.divf %284, %285 : vector<8x32xf32>
    %287 = vector.extract_strided_slice %280 {offsets = [0, 32], sizes = [8, 32], strides = [1, 1]} : vector<8x128xf32> to vector<8x32xf32>
    %288 = arith.negf %287 : vector<8x32xf32>
    %289 = math.exp %288 : vector<8x32xf32>
    %cst_85 = arith.constant 1.000000e+00 : f32
    %290 = vector.broadcast %cst_85 : f32 to vector<8x32xf32>
    %291 = arith.addf %290, %289 : vector<8x32xf32>
    %292 = arith.divf %290, %291 : vector<8x32xf32>
    %293 = vector.extract_strided_slice %280 {offsets = [0, 64], sizes = [8, 32], strides = [1, 1]} : vector<8x128xf32> to vector<8x32xf32>
    %294 = math.tanh %293 : vector<8x32xf32>
    %295 = vector.extract_strided_slice %280 {offsets = [0, 96], sizes = [8, 32], strides = [1, 1]} : vector<8x128xf32> to vector<8x32xf32>
    %296 = arith.negf %295 : vector<8x32xf32>
    %297 = math.exp %296 : vector<8x32xf32>
    %cst_86 = arith.constant 1.000000e+00 : f32
    %298 = vector.broadcast %cst_86 : f32 to vector<8x32xf32>
    %299 = arith.addf %298, %297 : vector<8x32xf32>
    %300 = arith.divf %298, %299 : vector<8x32xf32>
    %301 = arith.mulf %292, %275 : vector<8x32xf32>
    %302 = arith.mulf %286, %294 : vector<8x32xf32>
    %303 = arith.addf %301, %302 : vector<8x32xf32>
    %304 = math.tanh %303 : vector<8x32xf32>
    %305 = arith.mulf %300, %304 : vector<8x32xf32>
    %306 = arith.index_cast %276 : i32 to index
    %c0_87 = arith.constant 0 : index
    %307 = vector.load %arg17[%306, %c0_87] : memref<64x32xf32, #tpu.memory_space<vmem>>, vector<8x32xf32>
    tpu.vector_store %arg17[%306, %c0_87], %305 {strides = array<i32>} : memref<64x32xf32, #tpu.memory_space<vmem>>, vector<8x32xf32>,
    %c1_i32_88 = arith.constant 1 : i32
    %c8_i32_89 = arith.constant 8 : i32
    %308 = arith.muli %c1_i32_88, %c8_i32_89 : i32
    %309 = arith.index_cast %308 : i32 to index
    %c0_90 = arith.constant 0 : index
    %310 = vector.load %arg16[%309, %c0_90] : memref<64x128xf32, #tpu.memory_space<vmem>>, vector<8x128xf32>
    %cst_91 = arith.constant dense<0.000000e+00> : vector<8x128xf32>
    %311 = tpu.matmul %305, %267, %cst_91 {dimension_numbers = #tpu.dot_dimension_numbers<[1], [0], [0], [1], [0, 0, 1, 1], [], []>} : vector<8x32xf32>, vector<32x128xf32>, vector<8x128xf32> -> vector<8x128xf32>
    %312 = arith.addf %310, %311 : vector<8x128xf32>
    %313 = vector.extract_strided_slice %312 {offsets = [0, 0], sizes = [8, 32], strides = [1, 1]} : vector<8x128xf32> to vector<8x32xf32>
    %314 = arith.negf %313 : vector<8x32xf32>
    %315 = math.exp %314 : vector<8x32xf32>
    %cst_92 = arith.constant 1.000000e+00 : f32
    %316 = vector.broadcast %cst_92 : f32 to vector<8x32xf32>
    %317 = arith.addf %316, %315 : vector<8x32xf32>
    %318 = arith.divf %316, %317 : vector<8x32xf32>
    %319 = vector.extract_strided_slice %312 {offsets = [0, 32], sizes = [8, 32], strides = [1, 1]} : vector<8x128xf32> to vector<8x32xf32>
    %320 = arith.negf %319 : vector<8x32xf32>
    %321 = math.exp %320 : vector<8x32xf32>
    %cst_93 = arith.constant 1.000000e+00 : f32
    %322 = vector.broadcast %cst_93 : f32 to vector<8x32xf32>
    %323 = arith.addf %322, %321 : vector<8x32xf32>
    %324 = arith.divf %322, %323 : vector<8x32xf32>
    %325 = vector.extract_strided_slice %312 {offsets = [0, 64], sizes = [8, 32], strides = [1, 1]} : vector<8x128xf32> to vector<8x32xf32>
    %326 = math.tanh %325 : vector<8x32xf32>
    %327 = vector.extract_strided_slice %312 {offsets = [0, 96], sizes = [8, 32], strides = [1, 1]} : vector<8x128xf32> to vector<8x32xf32>
    %328 = arith.negf %327 : vector<8x32xf32>
    %329 = math.exp %328 : vector<8x32xf32>
    %cst_94 = arith.constant 1.000000e+00 : f32
    %330 = vector.broadcast %cst_94 : f32 to vector<8x32xf32>
    %331 = arith.addf %330, %329 : vector<8x32xf32>
    %332 = arith.divf %330, %331 : vector<8x32xf32>
    %333 = arith.mulf %324, %303 : vector<8x32xf32>
    %334 = arith.mulf %318, %326 : vector<8x32xf32>
    %335 = arith.addf %333, %334 : vector<8x32xf32>
    %336 = math.tanh %335 : vector<8x32xf32>
    %337 = arith.mulf %332, %336 : vector<8x32xf32>
    %338 = arith.index_cast %308 : i32 to index
    %c0_95 = arith.constant 0 : index
    %339 = vector.load %arg17[%338, %c0_95] : memref<64x32xf32, #tpu.memory_space<vmem>>, vector<8x32xf32>
    tpu.vector_store %arg17[%338, %c0_95], %337 {strides = array<i32>} : memref<64x32xf32, #tpu.memory_space<vmem>>, vector<8x32xf32>,
    %c2_i32_96 = arith.constant 2 : i32
    %c8_i32_97 = arith.constant 8 : i32
    %340 = arith.muli %c2_i32_96, %c8_i32_97 : i32
    %341 = arith.index_cast %340 : i32 to index
    %c0_98 = arith.constant 0 : index
    %342 = vector.load %arg16[%341, %c0_98] : memref<64x128xf32, #tpu.memory_space<vmem>>, vector<8x128xf32>
    %cst_99 = arith.constant dense<0.000000e+00> : vector<8x128xf32>
    %343 = tpu.matmul %337, %267, %cst_99 {dimension_numbers = #tpu.dot_dimension_numbers<[1], [0], [0], [1], [0, 0, 1, 1], [], []>} : vector<8x32xf32>, vector<32x128xf32>, vector<8x128xf32> -> vector<8x128xf32>
    %344 = arith.addf %342, %343 : vector<8x128xf32>
    %345 = vector.extract_strided_slice %344 {offsets = [0, 0], sizes = [8, 32], strides = [1, 1]} : vector<8x128xf32> to vector<8x32xf32>
    %346 = arith.negf %345 : vector<8x32xf32>
    %347 = math.exp %346 : vector<8x32xf32>
    %cst_100 = arith.constant 1.000000e+00 : f32
    %348 = vector.broadcast %cst_100 : f32 to vector<8x32xf32>
    %349 = arith.addf %348, %347 : vector<8x32xf32>
    %350 = arith.divf %348, %349 : vector<8x32xf32>
    %351 = vector.extract_strided_slice %344 {offsets = [0, 32], sizes = [8, 32], strides = [1, 1]} : vector<8x128xf32> to vector<8x32xf32>
    %352 = arith.negf %351 : vector<8x32xf32>
    %353 = math.exp %352 : vector<8x32xf32>
    %cst_101 = arith.constant 1.000000e+00 : f32
    %354 = vector.broadcast %cst_101 : f32 to vector<8x32xf32>
    %355 = arith.addf %354, %353 : vector<8x32xf32>
    %356 = arith.divf %354, %355 : vector<8x32xf32>
    %357 = vector.extract_strided_slice %344 {offsets = [0, 64], sizes = [8, 32], strides = [1, 1]} : vector<8x128xf32> to vector<8x32xf32>
    %358 = math.tanh %357 : vector<8x32xf32>
    %359 = vector.extract_strided_slice %344 {offsets = [0, 96], sizes = [8, 32], strides = [1, 1]} : vector<8x128xf32> to vector<8x32xf32>
    %360 = arith.negf %359 : vector<8x32xf32>
    %361 = math.exp %360 : vector<8x32xf32>
    %cst_102 = arith.constant 1.000000e+00 : f32
    %362 = vector.broadcast %cst_102 : f32 to vector<8x32xf32>
    %363 = arith.addf %362, %361 : vector<8x32xf32>
    %364 = arith.divf %362, %363 : vector<8x32xf32>
    %365 = arith.mulf %356, %335 : vector<8x32xf32>
    %366 = arith.mulf %350, %358 : vector<8x32xf32>
    %367 = arith.addf %365, %366 : vector<8x32xf32>
    %368 = math.tanh %367 : vector<8x32xf32>
    %369 = arith.mulf %364, %368 : vector<8x32xf32>
    %370 = arith.index_cast %340 : i32 to index
    %c0_103 = arith.constant 0 : index
    %371 = vector.load %arg17[%370, %c0_103] : memref<64x32xf32, #tpu.memory_space<vmem>>, vector<8x32xf32>
    tpu.vector_store %arg17[%370, %c0_103], %369 {strides = array<i32>} : memref<64x32xf32, #tpu.memory_space<vmem>>, vector<8x32xf32>,
    %c3_i32_104 = arith.constant 3 : i32
    %c8_i32_105 = arith.constant 8 : i32
    %372 = arith.muli %c3_i32_104, %c8_i32_105 : i32
    %373 = arith.index_cast %372 : i32 to index
    %c0_106 = arith.constant 0 : index
    %374 = vector.load %arg16[%373, %c0_106] : memref<64x128xf32, #tpu.memory_space<vmem>>, vector<8x128xf32>
    %cst_107 = arith.constant dense<0.000000e+00> : vector<8x128xf32>
    %375 = tpu.matmul %369, %267, %cst_107 {dimension_numbers = #tpu.dot_dimension_numbers<[1], [0], [0], [1], [0, 0, 1, 1], [], []>} : vector<8x32xf32>, vector<32x128xf32>, vector<8x128xf32> -> vector<8x128xf32>
    %376 = arith.addf %374, %375 : vector<8x128xf32>
    %377 = vector.extract_strided_slice %376 {offsets = [0, 0], sizes = [8, 32], strides = [1, 1]} : vector<8x128xf32> to vector<8x32xf32>
    %378 = arith.negf %377 : vector<8x32xf32>
    %379 = math.exp %378 : vector<8x32xf32>
    %cst_108 = arith.constant 1.000000e+00 : f32
    %380 = vector.broadcast %cst_108 : f32 to vector<8x32xf32>
    %381 = arith.addf %380, %379 : vector<8x32xf32>
    %382 = arith.divf %380, %381 : vector<8x32xf32>
    %383 = vector.extract_strided_slice %376 {offsets = [0, 32], sizes = [8, 32], strides = [1, 1]} : vector<8x128xf32> to vector<8x32xf32>
    %384 = arith.negf %383 : vector<8x32xf32>
    %385 = math.exp %384 : vector<8x32xf32>
    %cst_109 = arith.constant 1.000000e+00 : f32
    %386 = vector.broadcast %cst_109 : f32 to vector<8x32xf32>
    %387 = arith.addf %386, %385 : vector<8x32xf32>
    %388 = arith.divf %386, %387 : vector<8x32xf32>
    %389 = vector.extract_strided_slice %376 {offsets = [0, 64], sizes = [8, 32], strides = [1, 1]} : vector<8x128xf32> to vector<8x32xf32>
    %390 = math.tanh %389 : vector<8x32xf32>
    %391 = vector.extract_strided_slice %376 {offsets = [0, 96], sizes = [8, 32], strides = [1, 1]} : vector<8x128xf32> to vector<8x32xf32>
    %392 = arith.negf %391 : vector<8x32xf32>
    %393 = math.exp %392 : vector<8x32xf32>
    %cst_110 = arith.constant 1.000000e+00 : f32
    %394 = vector.broadcast %cst_110 : f32 to vector<8x32xf32>
    %395 = arith.addf %394, %393 : vector<8x32xf32>
    %396 = arith.divf %394, %395 : vector<8x32xf32>
    %397 = arith.mulf %388, %367 : vector<8x32xf32>
    %398 = arith.mulf %382, %390 : vector<8x32xf32>
    %399 = arith.addf %397, %398 : vector<8x32xf32>
    %400 = math.tanh %399 : vector<8x32xf32>
    %401 = arith.mulf %396, %400 : vector<8x32xf32>
    %402 = arith.index_cast %372 : i32 to index
    %c0_111 = arith.constant 0 : index
    %403 = vector.load %arg17[%402, %c0_111] : memref<64x32xf32, #tpu.memory_space<vmem>>, vector<8x32xf32>
    tpu.vector_store %arg17[%402, %c0_111], %401 {strides = array<i32>} : memref<64x32xf32, #tpu.memory_space<vmem>>, vector<8x32xf32>,
    %c4_i32_112 = arith.constant 4 : i32
    %c8_i32_113 = arith.constant 8 : i32
    %404 = arith.muli %c4_i32_112, %c8_i32_113 : i32
    %405 = arith.index_cast %404 : i32 to index
    %c0_114 = arith.constant 0 : index
    %406 = vector.load %arg16[%405, %c0_114] : memref<64x128xf32, #tpu.memory_space<vmem>>, vector<8x128xf32>
    %cst_115 = arith.constant dense<0.000000e+00> : vector<8x128xf32>
    %407 = tpu.matmul %401, %267, %cst_115 {dimension_numbers = #tpu.dot_dimension_numbers<[1], [0], [0], [1], [0, 0, 1, 1], [], []>} : vector<8x32xf32>, vector<32x128xf32>, vector<8x128xf32> -> vector<8x128xf32>
    %408 = arith.addf %406, %407 : vector<8x128xf32>
    %409 = vector.extract_strided_slice %408 {offsets = [0, 0], sizes = [8, 32], strides = [1, 1]} : vector<8x128xf32> to vector<8x32xf32>
    %410 = arith.negf %409 : vector<8x32xf32>
    %411 = math.exp %410 : vector<8x32xf32>
    %cst_116 = arith.constant 1.000000e+00 : f32
    %412 = vector.broadcast %cst_116 : f32 to vector<8x32xf32>
    %413 = arith.addf %412, %411 : vector<8x32xf32>
    %414 = arith.divf %412, %413 : vector<8x32xf32>
    %415 = vector.extract_strided_slice %408 {offsets = [0, 32], sizes = [8, 32], strides = [1, 1]} : vector<8x128xf32> to vector<8x32xf32>
    %416 = arith.negf %415 : vector<8x32xf32>
    %417 = math.exp %416 : vector<8x32xf32>
    %cst_117 = arith.constant 1.000000e+00 : f32
    %418 = vector.broadcast %cst_117 : f32 to vector<8x32xf32>
    %419 = arith.addf %418, %417 : vector<8x32xf32>
    %420 = arith.divf %418, %419 : vector<8x32xf32>
    %421 = vector.extract_strided_slice %408 {offsets = [0, 64], sizes = [8, 32], strides = [1, 1]} : vector<8x128xf32> to vector<8x32xf32>
    %422 = math.tanh %421 : vector<8x32xf32>
    %423 = vector.extract_strided_slice %408 {offsets = [0, 96], sizes = [8, 32], strides = [1, 1]} : vector<8x128xf32> to vector<8x32xf32>
    %424 = arith.negf %423 : vector<8x32xf32>
    %425 = math.exp %424 : vector<8x32xf32>
    %cst_118 = arith.constant 1.000000e+00 : f32
    %426 = vector.broadcast %cst_118 : f32 to vector<8x32xf32>
    %427 = arith.addf %426, %425 : vector<8x32xf32>
    %428 = arith.divf %426, %427 : vector<8x32xf32>
    %429 = arith.mulf %420, %399 : vector<8x32xf32>
    %430 = arith.mulf %414, %422 : vector<8x32xf32>
    %431 = arith.addf %429, %430 : vector<8x32xf32>
    %432 = math.tanh %431 : vector<8x32xf32>
    %433 = arith.mulf %428, %432 : vector<8x32xf32>
    %434 = arith.index_cast %404 : i32 to index
    %c0_119 = arith.constant 0 : index
    %435 = vector.load %arg17[%434, %c0_119] : memref<64x32xf32, #tpu.memory_space<vmem>>, vector<8x32xf32>
    tpu.vector_store %arg17[%434, %c0_119], %433 {strides = array<i32>} : memref<64x32xf32, #tpu.memory_space<vmem>>, vector<8x32xf32>,
    %c5_i32_120 = arith.constant 5 : i32
    %c8_i32_121 = arith.constant 8 : i32
    %436 = arith.muli %c5_i32_120, %c8_i32_121 : i32
    %437 = arith.index_cast %436 : i32 to index
    %c0_122 = arith.constant 0 : index
    %438 = vector.load %arg16[%437, %c0_122] : memref<64x128xf32, #tpu.memory_space<vmem>>, vector<8x128xf32>
    %cst_123 = arith.constant dense<0.000000e+00> : vector<8x128xf32>
    %439 = tpu.matmul %433, %267, %cst_123 {dimension_numbers = #tpu.dot_dimension_numbers<[1], [0], [0], [1], [0, 0, 1, 1], [], []>} : vector<8x32xf32>, vector<32x128xf32>, vector<8x128xf32> -> vector<8x128xf32>
    %440 = arith.addf %438, %439 : vector<8x128xf32>
    %441 = vector.extract_strided_slice %440 {offsets = [0, 0], sizes = [8, 32], strides = [1, 1]} : vector<8x128xf32> to vector<8x32xf32>
    %442 = arith.negf %441 : vector<8x32xf32>
    %443 = math.exp %442 : vector<8x32xf32>
    %cst_124 = arith.constant 1.000000e+00 : f32
    %444 = vector.broadcast %cst_124 : f32 to vector<8x32xf32>
    %445 = arith.addf %444, %443 : vector<8x32xf32>
    %446 = arith.divf %444, %445 : vector<8x32xf32>
    %447 = vector.extract_strided_slice %440 {offsets = [0, 32], sizes = [8, 32], strides = [1, 1]} : vector<8x128xf32> to vector<8x32xf32>
    %448 = arith.negf %447 : vector<8x32xf32>
    %449 = math.exp %448 : vector<8x32xf32>
    %cst_125 = arith.constant 1.000000e+00 : f32
    %450 = vector.broadcast %cst_125 : f32 to vector<8x32xf32>
    %451 = arith.addf %450, %449 : vector<8x32xf32>
    %452 = arith.divf %450, %451 : vector<8x32xf32>
    %453 = vector.extract_strided_slice %440 {offsets = [0, 64], sizes = [8, 32], strides = [1, 1]} : vector<8x128xf32> to vector<8x32xf32>
    %454 = math.tanh %453 : vector<8x32xf32>
    %455 = vector.extract_strided_slice %440 {offsets = [0, 96], sizes = [8, 32], strides = [1, 1]} : vector<8x128xf32> to vector<8x32xf32>
    %456 = arith.negf %455 : vector<8x32xf32>
    %457 = math.exp %456 : vector<8x32xf32>
    %cst_126 = arith.constant 1.000000e+00 : f32
    %458 = vector.broadcast %cst_126 : f32 to vector<8x32xf32>
    %459 = arith.addf %458, %457 : vector<8x32xf32>
    %460 = arith.divf %458, %459 : vector<8x32xf32>
    %461 = arith.mulf %452, %431 : vector<8x32xf32>
    %462 = arith.mulf %446, %454 : vector<8x32xf32>
    %463 = arith.addf %461, %462 : vector<8x32xf32>
    %464 = math.tanh %463 : vector<8x32xf32>
    %465 = arith.mulf %460, %464 : vector<8x32xf32>
    %466 = arith.index_cast %436 : i32 to index
    %c0_127 = arith.constant 0 : index
    %467 = vector.load %arg17[%466, %c0_127] : memref<64x32xf32, #tpu.memory_space<vmem>>, vector<8x32xf32>
    tpu.vector_store %arg17[%466, %c0_127], %465 {strides = array<i32>} : memref<64x32xf32, #tpu.memory_space<vmem>>, vector<8x32xf32>,
    %c6_i32_128 = arith.constant 6 : i32
    %c8_i32_129 = arith.constant 8 : i32
    %468 = arith.muli %c6_i32_128, %c8_i32_129 : i32
    %469 = arith.index_cast %468 : i32 to index
    %c0_130 = arith.constant 0 : index
    %470 = vector.load %arg16[%469, %c0_130] : memref<64x128xf32, #tpu.memory_space<vmem>>, vector<8x128xf32>
    %cst_131 = arith.constant dense<0.000000e+00> : vector<8x128xf32>
    %471 = tpu.matmul %465, %267, %cst_131 {dimension_numbers = #tpu.dot_dimension_numbers<[1], [0], [0], [1], [0, 0, 1, 1], [], []>} : vector<8x32xf32>, vector<32x128xf32>, vector<8x128xf32> -> vector<8x128xf32>
    %472 = arith.addf %470, %471 : vector<8x128xf32>
    %473 = vector.extract_strided_slice %472 {offsets = [0, 0], sizes = [8, 32], strides = [1, 1]} : vector<8x128xf32> to vector<8x32xf32>
    %474 = arith.negf %473 : vector<8x32xf32>
    %475 = math.exp %474 : vector<8x32xf32>
    %cst_132 = arith.constant 1.000000e+00 : f32
    %476 = vector.broadcast %cst_132 : f32 to vector<8x32xf32>
    %477 = arith.addf %476, %475 : vector<8x32xf32>
    %478 = arith.divf %476, %477 : vector<8x32xf32>
    %479 = vector.extract_strided_slice %472 {offsets = [0, 32], sizes = [8, 32], strides = [1, 1]} : vector<8x128xf32> to vector<8x32xf32>
    %480 = arith.negf %479 : vector<8x32xf32>
    %481 = math.exp %480 : vector<8x32xf32>
    %cst_133 = arith.constant 1.000000e+00 : f32
    %482 = vector.broadcast %cst_133 : f32 to vector<8x32xf32>
    %483 = arith.addf %482, %481 : vector<8x32xf32>
    %484 = arith.divf %482, %483 : vector<8x32xf32>
    %485 = vector.extract_strided_slice %472 {offsets = [0, 64], sizes = [8, 32], strides = [1, 1]} : vector<8x128xf32> to vector<8x32xf32>
    %486 = math.tanh %485 : vector<8x32xf32>
    %487 = vector.extract_strided_slice %472 {offsets = [0, 96], sizes = [8, 32], strides = [1, 1]} : vector<8x128xf32> to vector<8x32xf32>
    %488 = arith.negf %487 : vector<8x32xf32>
    %489 = math.exp %488 : vector<8x32xf32>
    %cst_134 = arith.constant 1.000000e+00 : f32
    %490 = vector.broadcast %cst_134 : f32 to vector<8x32xf32>
    %491 = arith.addf %490, %489 : vector<8x32xf32>
    %492 = arith.divf %490, %491 : vector<8x32xf32>
    %493 = arith.mulf %484, %463 : vector<8x32xf32>
    %494 = arith.mulf %478, %486 : vector<8x32xf32>
    %495 = arith.addf %493, %494 : vector<8x32xf32>
    %496 = math.tanh %495 : vector<8x32xf32>
    %497 = arith.mulf %492, %496 : vector<8x32xf32>
    %498 = arith.index_cast %468 : i32 to index
    %c0_135 = arith.constant 0 : index
    %499 = vector.load %arg17[%498, %c0_135] : memref<64x32xf32, #tpu.memory_space<vmem>>, vector<8x32xf32>
    tpu.vector_store %arg17[%498, %c0_135], %497 {strides = array<i32>} : memref<64x32xf32, #tpu.memory_space<vmem>>, vector<8x32xf32>,
    %c7_i32_136 = arith.constant 7 : i32
    %c8_i32_137 = arith.constant 8 : i32
    %500 = arith.muli %c7_i32_136, %c8_i32_137 : i32
    %501 = arith.index_cast %500 : i32 to index
    %c0_138 = arith.constant 0 : index
    %502 = vector.load %arg16[%501, %c0_138] : memref<64x128xf32, #tpu.memory_space<vmem>>, vector<8x128xf32>
    %cst_139 = arith.constant dense<0.000000e+00> : vector<8x128xf32>
    %503 = tpu.matmul %497, %267, %cst_139 {dimension_numbers = #tpu.dot_dimension_numbers<[1], [0], [0], [1], [0, 0, 1, 1], [], []>} : vector<8x32xf32>, vector<32x128xf32>, vector<8x128xf32> -> vector<8x128xf32>
    %504 = arith.addf %502, %503 : vector<8x128xf32>
    %505 = vector.extract_strided_slice %504 {offsets = [0, 0], sizes = [8, 32], strides = [1, 1]} : vector<8x128xf32> to vector<8x32xf32>
    %506 = arith.negf %505 : vector<8x32xf32>
    %507 = math.exp %506 : vector<8x32xf32>
    %cst_140 = arith.constant 1.000000e+00 : f32
    %508 = vector.broadcast %cst_140 : f32 to vector<8x32xf32>
    %509 = arith.addf %508, %507 : vector<8x32xf32>
    %510 = arith.divf %508, %509 : vector<8x32xf32>
    %511 = vector.extract_strided_slice %504 {offsets = [0, 32], sizes = [8, 32], strides = [1, 1]} : vector<8x128xf32> to vector<8x32xf32>
    %512 = arith.negf %511 : vector<8x32xf32>
    %513 = math.exp %512 : vector<8x32xf32>
    %cst_141 = arith.constant 1.000000e+00 : f32
    %514 = vector.broadcast %cst_141 : f32 to vector<8x32xf32>
    %515 = arith.addf %514, %513 : vector<8x32xf32>
    %516 = arith.divf %514, %515 : vector<8x32xf32>
    %517 = vector.extract_strided_slice %504 {offsets = [0, 64], sizes = [8, 32], strides = [1, 1]} : vector<8x128xf32> to vector<8x32xf32>
    %518 = math.tanh %517 : vector<8x32xf32>
    %519 = vector.extract_strided_slice %504 {offsets = [0, 96], sizes = [8, 32], strides = [1, 1]} : vector<8x128xf32> to vector<8x32xf32>
    %520 = arith.negf %519 : vector<8x32xf32>
    %521 = math.exp %520 : vector<8x32xf32>
    %cst_142 = arith.constant 1.000000e+00 : f32
    %522 = vector.broadcast %cst_142 : f32 to vector<8x32xf32>
    %523 = arith.addf %522, %521 : vector<8x32xf32>
    %524 = arith.divf %522, %523 : vector<8x32xf32>
    %525 = arith.mulf %516, %495 : vector<8x32xf32>
    %526 = arith.mulf %510, %518 : vector<8x32xf32>
    %527 = arith.addf %525, %526 : vector<8x32xf32>
    %528 = math.tanh %527 : vector<8x32xf32>
    %529 = arith.mulf %524, %528 : vector<8x32xf32>
    %530 = arith.index_cast %500 : i32 to index
    %c0_143 = arith.constant 0 : index
    %531 = vector.load %arg17[%530, %c0_143] : memref<64x32xf32, #tpu.memory_space<vmem>>, vector<8x32xf32>
    tpu.vector_store %arg17[%530, %c0_143], %529 {strides = array<i32>} : memref<64x32xf32, #tpu.memory_space<vmem>>, vector<8x32xf32>,
    %c8_i32_144 = arith.constant 8 : i32
    %c0_145 = arith.constant 0 : index
    %c0_146 = arith.constant 0 : index
    %532 = vector.load %arg7[%c0_145, %c0_146] : memref<32x128xf32, #tpu.memory_space<vmem>>, vector<32x128xf32>
    %c0_147 = arith.constant 0 : index
    %c0_148 = arith.constant 0 : index
    %533 = vector.load %arg8[%c0_147, %c0_148] : memref<32x128xf32, #tpu.memory_space<vmem>>, vector<32x128xf32>
    %c0_149 = arith.constant 0 : index
    %c0_150 = arith.constant 0 : index
    %534 = vector.load %arg9[%c0_149, %c0_150] : memref<1x128xf32, #tpu.memory_space<vmem>>, vector<1x128xf32>
    %c0_151 = arith.constant 0 : index
    %c0_152 = arith.constant 0 : index
    %535 = vector.load %arg17[%c0_151, %c0_152] : memref<64x32xf32, #tpu.memory_space<vmem>>, vector<64x32xf32>
    %cst_153 = arith.constant dense<0.000000e+00> : vector<64x128xf32>
    %536 = tpu.matmul %535, %532, %cst_153 {dimension_numbers = #tpu.dot_dimension_numbers<[1], [0], [0], [1], [0, 0, 1, 1], [], []>} : vector<64x32xf32>, vector<32x128xf32>, vector<64x128xf32> -> vector<64x128xf32>
    %537 = vector.broadcast %534 : vector<1x128xf32> to vector<64x128xf32>
    %538 = arith.addf %536, %537 : vector<64x128xf32>
    %c0_154 = arith.constant 0 : index
    %c0_155 = arith.constant 0 : index
    %539 = vector.load %arg16[%c0_154, %c0_155] : memref<64x128xf32, #tpu.memory_space<vmem>>, vector<64x128xf32>
    tpu.vector_store %arg16[%c0_154, %c0_155], %538 {strides = array<i32>} : memref<64x128xf32, #tpu.memory_space<vmem>>, vector<64x128xf32>,
    %cst_156 = arith.constant 0.000000e+00 : f32
    %540 = vector.broadcast %cst_156 : f32 to vector<8x32xf32>
    %cst_157 = arith.constant 0.000000e+00 : f32
    %541 = vector.broadcast %cst_157 : f32 to vector<8x32xf32>
    %c0_i32_158 = arith.constant 0 : i32
    %c8_i32_159 = arith.constant 8 : i32
    %542 = arith.muli %c0_i32_158, %c8_i32_159 : i32
    %543 = arith.index_cast %542 : i32 to index
    %c0_160 = arith.constant 0 : index
    %544 = vector.load %arg16[%543, %c0_160] : memref<64x128xf32, #tpu.memory_space<vmem>>, vector<8x128xf32>
    %cst_161 = arith.constant dense<0.000000e+00> : vector<8x128xf32>
    %545 = tpu.matmul %540, %533, %cst_161 {dimension_numbers = #tpu.dot_dimension_numbers<[1], [0], [0], [1], [0, 0, 1, 1], [], []>} : vector<8x32xf32>, vector<32x128xf32>, vector<8x128xf32> -> vector<8x128xf32>
    %546 = arith.addf %544, %545 : vector<8x128xf32>
    %547 = vector.extract_strided_slice %546 {offsets = [0, 0], sizes = [8, 32], strides = [1, 1]} : vector<8x128xf32> to vector<8x32xf32>
    %548 = arith.negf %547 : vector<8x32xf32>
    %549 = math.exp %548 : vector<8x32xf32>
    %cst_162 = arith.constant 1.000000e+00 : f32
    %550 = vector.broadcast %cst_162 : f32 to vector<8x32xf32>
    %551 = arith.addf %550, %549 : vector<8x32xf32>
    %552 = arith.divf %550, %551 : vector<8x32xf32>
    %553 = vector.extract_strided_slice %546 {offsets = [0, 32], sizes = [8, 32], strides = [1, 1]} : vector<8x128xf32> to vector<8x32xf32>
    %554 = arith.negf %553 : vector<8x32xf32>
    %555 = math.exp %554 : vector<8x32xf32>
    %cst_163 = arith.constant 1.000000e+00 : f32
    %556 = vector.broadcast %cst_163 : f32 to vector<8x32xf32>
    %557 = arith.addf %556, %555 : vector<8x32xf32>
    %558 = arith.divf %556, %557 : vector<8x32xf32>
    %559 = vector.extract_strided_slice %546 {offsets = [0, 64], sizes = [8, 32], strides = [1, 1]} : vector<8x128xf32> to vector<8x32xf32>
    %560 = math.tanh %559 : vector<8x32xf32>
    %561 = vector.extract_strided_slice %546 {offsets = [0, 96], sizes = [8, 32], strides = [1, 1]} : vector<8x128xf32> to vector<8x32xf32>
    %562 = arith.negf %561 : vector<8x32xf32>
    %563 = math.exp %562 : vector<8x32xf32>
    %cst_164 = arith.constant 1.000000e+00 : f32
    %564 = vector.broadcast %cst_164 : f32 to vector<8x32xf32>
    %565 = arith.addf %564, %563 : vector<8x32xf32>
    %566 = arith.divf %564, %565 : vector<8x32xf32>
    %567 = arith.mulf %558, %541 : vector<8x32xf32>
    %568 = arith.mulf %552, %560 : vector<8x32xf32>
    %569 = arith.addf %567, %568 : vector<8x32xf32>
    %570 = math.tanh %569 : vector<8x32xf32>
    %571 = arith.mulf %566, %570 : vector<8x32xf32>
    %572 = arith.index_cast %542 : i32 to index
    %c0_165 = arith.constant 0 : index
    %573 = vector.load %arg17[%572, %c0_165] : memref<64x32xf32, #tpu.memory_space<vmem>>, vector<8x32xf32>
    tpu.vector_store %arg17[%572, %c0_165], %571 {strides = array<i32>} : memref<64x32xf32, #tpu.memory_space<vmem>>, vector<8x32xf32>,
    %c1_i32_166 = arith.constant 1 : i32
    %c8_i32_167 = arith.constant 8 : i32
    %574 = arith.muli %c1_i32_166, %c8_i32_167 : i32
    %575 = arith.index_cast %574 : i32 to index
    %c0_168 = arith.constant 0 : index
    %576 = vector.load %arg16[%575, %c0_168] : memref<64x128xf32, #tpu.memory_space<vmem>>, vector<8x128xf32>
    %cst_169 = arith.constant dense<0.000000e+00> : vector<8x128xf32>
    %577 = tpu.matmul %571, %533, %cst_169 {dimension_numbers = #tpu.dot_dimension_numbers<[1], [0], [0], [1], [0, 0, 1, 1], [], []>} : vector<8x32xf32>, vector<32x128xf32>, vector<8x128xf32> -> vector<8x128xf32>
    %578 = arith.addf %576, %577 : vector<8x128xf32>
    %579 = vector.extract_strided_slice %578 {offsets = [0, 0], sizes = [8, 32], strides = [1, 1]} : vector<8x128xf32> to vector<8x32xf32>
    %580 = arith.negf %579 : vector<8x32xf32>
    %581 = math.exp %580 : vector<8x32xf32>
    %cst_170 = arith.constant 1.000000e+00 : f32
    %582 = vector.broadcast %cst_170 : f32 to vector<8x32xf32>
    %583 = arith.addf %582, %581 : vector<8x32xf32>
    %584 = arith.divf %582, %583 : vector<8x32xf32>
    %585 = vector.extract_strided_slice %578 {offsets = [0, 32], sizes = [8, 32], strides = [1, 1]} : vector<8x128xf32> to vector<8x32xf32>
    %586 = arith.negf %585 : vector<8x32xf32>
    %587 = math.exp %586 : vector<8x32xf32>
    %cst_171 = arith.constant 1.000000e+00 : f32
    %588 = vector.broadcast %cst_171 : f32 to vector<8x32xf32>
    %589 = arith.addf %588, %587 : vector<8x32xf32>
    %590 = arith.divf %588, %589 : vector<8x32xf32>
    %591 = vector.extract_strided_slice %578 {offsets = [0, 64], sizes = [8, 32], strides = [1, 1]} : vector<8x128xf32> to vector<8x32xf32>
    %592 = math.tanh %591 : vector<8x32xf32>
    %593 = vector.extract_strided_slice %578 {offsets = [0, 96], sizes = [8, 32], strides = [1, 1]} : vector<8x128xf32> to vector<8x32xf32>
    %594 = arith.negf %593 : vector<8x32xf32>
    %595 = math.exp %594 : vector<8x32xf32>
    %cst_172 = arith.constant 1.000000e+00 : f32
    %596 = vector.broadcast %cst_172 : f32 to vector<8x32xf32>
    %597 = arith.addf %596, %595 : vector<8x32xf32>
    %598 = arith.divf %596, %597 : vector<8x32xf32>
    %599 = arith.mulf %590, %569 : vector<8x32xf32>
    %600 = arith.mulf %584, %592 : vector<8x32xf32>
    %601 = arith.addf %599, %600 : vector<8x32xf32>
    %602 = math.tanh %601 : vector<8x32xf32>
    %603 = arith.mulf %598, %602 : vector<8x32xf32>
    %604 = arith.index_cast %574 : i32 to index
    %c0_173 = arith.constant 0 : index
    %605 = vector.load %arg17[%604, %c0_173] : memref<64x32xf32, #tpu.memory_space<vmem>>, vector<8x32xf32>
    tpu.vector_store %arg17[%604, %c0_173], %603 {strides = array<i32>} : memref<64x32xf32, #tpu.memory_space<vmem>>, vector<8x32xf32>,
    %c2_i32_174 = arith.constant 2 : i32
    %c8_i32_175 = arith.constant 8 : i32
    %606 = arith.muli %c2_i32_174, %c8_i32_175 : i32
    %607 = arith.index_cast %606 : i32 to index
    %c0_176 = arith.constant 0 : index
    %608 = vector.load %arg16[%607, %c0_176] : memref<64x128xf32, #tpu.memory_space<vmem>>, vector<8x128xf32>
    %cst_177 = arith.constant dense<0.000000e+00> : vector<8x128xf32>
    %609 = tpu.matmul %603, %533, %cst_177 {dimension_numbers = #tpu.dot_dimension_numbers<[1], [0], [0], [1], [0, 0, 1, 1], [], []>} : vector<8x32xf32>, vector<32x128xf32>, vector<8x128xf32> -> vector<8x128xf32>
    %610 = arith.addf %608, %609 : vector<8x128xf32>
    %611 = vector.extract_strided_slice %610 {offsets = [0, 0], sizes = [8, 32], strides = [1, 1]} : vector<8x128xf32> to vector<8x32xf32>
    %612 = arith.negf %611 : vector<8x32xf32>
    %613 = math.exp %612 : vector<8x32xf32>
    %cst_178 = arith.constant 1.000000e+00 : f32
    %614 = vector.broadcast %cst_178 : f32 to vector<8x32xf32>
    %615 = arith.addf %614, %613 : vector<8x32xf32>
    %616 = arith.divf %614, %615 : vector<8x32xf32>
    %617 = vector.extract_strided_slice %610 {offsets = [0, 32], sizes = [8, 32], strides = [1, 1]} : vector<8x128xf32> to vector<8x32xf32>
    %618 = arith.negf %617 : vector<8x32xf32>
    %619 = math.exp %618 : vector<8x32xf32>
    %cst_179 = arith.constant 1.000000e+00 : f32
    %620 = vector.broadcast %cst_179 : f32 to vector<8x32xf32>
    %621 = arith.addf %620, %619 : vector<8x32xf32>
    %622 = arith.divf %620, %621 : vector<8x32xf32>
    %623 = vector.extract_strided_slice %610 {offsets = [0, 64], sizes = [8, 32], strides = [1, 1]} : vector<8x128xf32> to vector<8x32xf32>
    %624 = math.tanh %623 : vector<8x32xf32>
    %625 = vector.extract_strided_slice %610 {offsets = [0, 96], sizes = [8, 32], strides = [1, 1]} : vector<8x128xf32> to vector<8x32xf32>
    %626 = arith.negf %625 : vector<8x32xf32>
    %627 = math.exp %626 : vector<8x32xf32>
    %cst_180 = arith.constant 1.000000e+00 : f32
    %628 = vector.broadcast %cst_180 : f32 to vector<8x32xf32>
    %629 = arith.addf %628, %627 : vector<8x32xf32>
    %630 = arith.divf %628, %629 : vector<8x32xf32>
    %631 = arith.mulf %622, %601 : vector<8x32xf32>
    %632 = arith.mulf %616, %624 : vector<8x32xf32>
    %633 = arith.addf %631, %632 : vector<8x32xf32>
    %634 = math.tanh %633 : vector<8x32xf32>
    %635 = arith.mulf %630, %634 : vector<8x32xf32>
    %636 = arith.index_cast %606 : i32 to index
    %c0_181 = arith.constant 0 : index
    %637 = vector.load %arg17[%636, %c0_181] : memref<64x32xf32, #tpu.memory_space<vmem>>, vector<8x32xf32>
    tpu.vector_store %arg17[%636, %c0_181], %635 {strides = array<i32>} : memref<64x32xf32, #tpu.memory_space<vmem>>, vector<8x32xf32>,
    %c3_i32_182 = arith.constant 3 : i32
    %c8_i32_183 = arith.constant 8 : i32
    %638 = arith.muli %c3_i32_182, %c8_i32_183 : i32
    %639 = arith.index_cast %638 : i32 to index
    %c0_184 = arith.constant 0 : index
    %640 = vector.load %arg16[%639, %c0_184] : memref<64x128xf32, #tpu.memory_space<vmem>>, vector<8x128xf32>
    %cst_185 = arith.constant dense<0.000000e+00> : vector<8x128xf32>
    %641 = tpu.matmul %635, %533, %cst_185 {dimension_numbers = #tpu.dot_dimension_numbers<[1], [0], [0], [1], [0, 0, 1, 1], [], []>} : vector<8x32xf32>, vector<32x128xf32>, vector<8x128xf32> -> vector<8x128xf32>
    %642 = arith.addf %640, %641 : vector<8x128xf32>
    %643 = vector.extract_strided_slice %642 {offsets = [0, 0], sizes = [8, 32], strides = [1, 1]} : vector<8x128xf32> to vector<8x32xf32>
    %644 = arith.negf %643 : vector<8x32xf32>
    %645 = math.exp %644 : vector<8x32xf32>
    %cst_186 = arith.constant 1.000000e+00 : f32
    %646 = vector.broadcast %cst_186 : f32 to vector<8x32xf32>
    %647 = arith.addf %646, %645 : vector<8x32xf32>
    %648 = arith.divf %646, %647 : vector<8x32xf32>
    %649 = vector.extract_strided_slice %642 {offsets = [0, 32], sizes = [8, 32], strides = [1, 1]} : vector<8x128xf32> to vector<8x32xf32>
    %650 = arith.negf %649 : vector<8x32xf32>
    %651 = math.exp %650 : vector<8x32xf32>
    %cst_187 = arith.constant 1.000000e+00 : f32
    %652 = vector.broadcast %cst_187 : f32 to vector<8x32xf32>
    %653 = arith.addf %652, %651 : vector<8x32xf32>
    %654 = arith.divf %652, %653 : vector<8x32xf32>
    %655 = vector.extract_strided_slice %642 {offsets = [0, 64], sizes = [8, 32], strides = [1, 1]} : vector<8x128xf32> to vector<8x32xf32>
    %656 = math.tanh %655 : vector<8x32xf32>
    %657 = vector.extract_strided_slice %642 {offsets = [0, 96], sizes = [8, 32], strides = [1, 1]} : vector<8x128xf32> to vector<8x32xf32>
    %658 = arith.negf %657 : vector<8x32xf32>
    %659 = math.exp %658 : vector<8x32xf32>
    %cst_188 = arith.constant 1.000000e+00 : f32
    %660 = vector.broadcast %cst_188 : f32 to vector<8x32xf32>
    %661 = arith.addf %660, %659 : vector<8x32xf32>
    %662 = arith.divf %660, %661 : vector<8x32xf32>
    %663 = arith.mulf %654, %633 : vector<8x32xf32>
    %664 = arith.mulf %648, %656 : vector<8x32xf32>
    %665 = arith.addf %663, %664 : vector<8x32xf32>
    %666 = math.tanh %665 : vector<8x32xf32>
    %667 = arith.mulf %662, %666 : vector<8x32xf32>
    %668 = arith.index_cast %638 : i32 to index
    %c0_189 = arith.constant 0 : index
    %669 = vector.load %arg17[%668, %c0_189] : memref<64x32xf32, #tpu.memory_space<vmem>>, vector<8x32xf32>
    tpu.vector_store %arg17[%668, %c0_189], %667 {strides = array<i32>} : memref<64x32xf32, #tpu.memory_space<vmem>>, vector<8x32xf32>,
    %c4_i32_190 = arith.constant 4 : i32
    %c8_i32_191 = arith.constant 8 : i32
    %670 = arith.muli %c4_i32_190, %c8_i32_191 : i32
    %671 = arith.index_cast %670 : i32 to index
    %c0_192 = arith.constant 0 : index
    %672 = vector.load %arg16[%671, %c0_192] : memref<64x128xf32, #tpu.memory_space<vmem>>, vector<8x128xf32>
    %cst_193 = arith.constant dense<0.000000e+00> : vector<8x128xf32>
    %673 = tpu.matmul %667, %533, %cst_193 {dimension_numbers = #tpu.dot_dimension_numbers<[1], [0], [0], [1], [0, 0, 1, 1], [], []>} : vector<8x32xf32>, vector<32x128xf32>, vector<8x128xf32> -> vector<8x128xf32>
    %674 = arith.addf %672, %673 : vector<8x128xf32>
    %675 = vector.extract_strided_slice %674 {offsets = [0, 0], sizes = [8, 32], strides = [1, 1]} : vector<8x128xf32> to vector<8x32xf32>
    %676 = arith.negf %675 : vector<8x32xf32>
    %677 = math.exp %676 : vector<8x32xf32>
    %cst_194 = arith.constant 1.000000e+00 : f32
    %678 = vector.broadcast %cst_194 : f32 to vector<8x32xf32>
    %679 = arith.addf %678, %677 : vector<8x32xf32>
    %680 = arith.divf %678, %679 : vector<8x32xf32>
    %681 = vector.extract_strided_slice %674 {offsets = [0, 32], sizes = [8, 32], strides = [1, 1]} : vector<8x128xf32> to vector<8x32xf32>
    %682 = arith.negf %681 : vector<8x32xf32>
    %683 = math.exp %682 : vector<8x32xf32>
    %cst_195 = arith.constant 1.000000e+00 : f32
    %684 = vector.broadcast %cst_195 : f32 to vector<8x32xf32>
    %685 = arith.addf %684, %683 : vector<8x32xf32>
    %686 = arith.divf %684, %685 : vector<8x32xf32>
    %687 = vector.extract_strided_slice %674 {offsets = [0, 64], sizes = [8, 32], strides = [1, 1]} : vector<8x128xf32> to vector<8x32xf32>
    %688 = math.tanh %687 : vector<8x32xf32>
    %689 = vector.extract_strided_slice %674 {offsets = [0, 96], sizes = [8, 32], strides = [1, 1]} : vector<8x128xf32> to vector<8x32xf32>
    %690 = arith.negf %689 : vector<8x32xf32>
    %691 = math.exp %690 : vector<8x32xf32>
    %cst_196 = arith.constant 1.000000e+00 : f32
    %692 = vector.broadcast %cst_196 : f32 to vector<8x32xf32>
    %693 = arith.addf %692, %691 : vector<8x32xf32>
    %694 = arith.divf %692, %693 : vector<8x32xf32>
    %695 = arith.mulf %686, %665 : vector<8x32xf32>
    %696 = arith.mulf %680, %688 : vector<8x32xf32>
    %697 = arith.addf %695, %696 : vector<8x32xf32>
    %698 = math.tanh %697 : vector<8x32xf32>
    %699 = arith.mulf %694, %698 : vector<8x32xf32>
    %700 = arith.index_cast %670 : i32 to index
    %c0_197 = arith.constant 0 : index
    %701 = vector.load %arg17[%700, %c0_197] : memref<64x32xf32, #tpu.memory_space<vmem>>, vector<8x32xf32>
    tpu.vector_store %arg17[%700, %c0_197], %699 {strides = array<i32>} : memref<64x32xf32, #tpu.memory_space<vmem>>, vector<8x32xf32>,
    %c5_i32_198 = arith.constant 5 : i32
    %c8_i32_199 = arith.constant 8 : i32
    %702 = arith.muli %c5_i32_198, %c8_i32_199 : i32
    %703 = arith.index_cast %702 : i32 to index
    %c0_200 = arith.constant 0 : index
    %704 = vector.load %arg16[%703, %c0_200] : memref<64x128xf32, #tpu.memory_space<vmem>>, vector<8x128xf32>
    %cst_201 = arith.constant dense<0.000000e+00> : vector<8x128xf32>
    %705 = tpu.matmul %699, %533, %cst_201 {dimension_numbers = #tpu.dot_dimension_numbers<[1], [0], [0], [1], [0, 0, 1, 1], [], []>} : vector<8x32xf32>, vector<32x128xf32>, vector<8x128xf32> -> vector<8x128xf32>
    %706 = arith.addf %704, %705 : vector<8x128xf32>
    %707 = vector.extract_strided_slice %706 {offsets = [0, 0], sizes = [8, 32], strides = [1, 1]} : vector<8x128xf32> to vector<8x32xf32>
    %708 = arith.negf %707 : vector<8x32xf32>
    %709 = math.exp %708 : vector<8x32xf32>
    %cst_202 = arith.constant 1.000000e+00 : f32
    %710 = vector.broadcast %cst_202 : f32 to vector<8x32xf32>
    %711 = arith.addf %710, %709 : vector<8x32xf32>
    %712 = arith.divf %710, %711 : vector<8x32xf32>
    %713 = vector.extract_strided_slice %706 {offsets = [0, 32], sizes = [8, 32], strides = [1, 1]} : vector<8x128xf32> to vector<8x32xf32>
    %714 = arith.negf %713 : vector<8x32xf32>
    %715 = math.exp %714 : vector<8x32xf32>
    %cst_203 = arith.constant 1.000000e+00 : f32
    %716 = vector.broadcast %cst_203 : f32 to vector<8x32xf32>
    %717 = arith.addf %716, %715 : vector<8x32xf32>
    %718 = arith.divf %716, %717 : vector<8x32xf32>
    %719 = vector.extract_strided_slice %706 {offsets = [0, 64], sizes = [8, 32], strides = [1, 1]} : vector<8x128xf32> to vector<8x32xf32>
    %720 = math.tanh %719 : vector<8x32xf32>
    %721 = vector.extract_strided_slice %706 {offsets = [0, 96], sizes = [8, 32], strides = [1, 1]} : vector<8x128xf32> to vector<8x32xf32>
    %722 = arith.negf %721 : vector<8x32xf32>
    %723 = math.exp %722 : vector<8x32xf32>
    %cst_204 = arith.constant 1.000000e+00 : f32
    %724 = vector.broadcast %cst_204 : f32 to vector<8x32xf32>
    %725 = arith.addf %724, %723 : vector<8x32xf32>
    %726 = arith.divf %724, %725 : vector<8x32xf32>
    %727 = arith.mulf %718, %697 : vector<8x32xf32>
    %728 = arith.mulf %712, %720 : vector<8x32xf32>
    %729 = arith.addf %727, %728 : vector<8x32xf32>
    %730 = math.tanh %729 : vector<8x32xf32>
    %731 = arith.mulf %726, %730 : vector<8x32xf32>
    %732 = arith.index_cast %702 : i32 to index
    %c0_205 = arith.constant 0 : index
    %733 = vector.load %arg17[%732, %c0_205] : memref<64x32xf32, #tpu.memory_space<vmem>>, vector<8x32xf32>
    tpu.vector_store %arg17[%732, %c0_205], %731 {strides = array<i32>} : memref<64x32xf32, #tpu.memory_space<vmem>>, vector<8x32xf32>,
    %c6_i32_206 = arith.constant 6 : i32
    %c8_i32_207 = arith.constant 8 : i32
    %734 = arith.muli %c6_i32_206, %c8_i32_207 : i32
    %735 = arith.index_cast %734 : i32 to index
    %c0_208 = arith.constant 0 : index
    %736 = vector.load %arg16[%735, %c0_208] : memref<64x128xf32, #tpu.memory_space<vmem>>, vector<8x128xf32>
    %cst_209 = arith.constant dense<0.000000e+00> : vector<8x128xf32>
    %737 = tpu.matmul %731, %533, %cst_209 {dimension_numbers = #tpu.dot_dimension_numbers<[1], [0], [0], [1], [0, 0, 1, 1], [], []>} : vector<8x32xf32>, vector<32x128xf32>, vector<8x128xf32> -> vector<8x128xf32>
    %738 = arith.addf %736, %737 : vector<8x128xf32>
    %739 = vector.extract_strided_slice %738 {offsets = [0, 0], sizes = [8, 32], strides = [1, 1]} : vector<8x128xf32> to vector<8x32xf32>
    %740 = arith.negf %739 : vector<8x32xf32>
    %741 = math.exp %740 : vector<8x32xf32>
    %cst_210 = arith.constant 1.000000e+00 : f32
    %742 = vector.broadcast %cst_210 : f32 to vector<8x32xf32>
    %743 = arith.addf %742, %741 : vector<8x32xf32>
    %744 = arith.divf %742, %743 : vector<8x32xf32>
    %745 = vector.extract_strided_slice %738 {offsets = [0, 32], sizes = [8, 32], strides = [1, 1]} : vector<8x128xf32> to vector<8x32xf32>
    %746 = arith.negf %745 : vector<8x32xf32>
    %747 = math.exp %746 : vector<8x32xf32>
    %cst_211 = arith.constant 1.000000e+00 : f32
    %748 = vector.broadcast %cst_211 : f32 to vector<8x32xf32>
    %749 = arith.addf %748, %747 : vector<8x32xf32>
    %750 = arith.divf %748, %749 : vector<8x32xf32>
    %751 = vector.extract_strided_slice %738 {offsets = [0, 64], sizes = [8, 32], strides = [1, 1]} : vector<8x128xf32> to vector<8x32xf32>
    %752 = math.tanh %751 : vector<8x32xf32>
    %753 = vector.extract_strided_slice %738 {offsets = [0, 96], sizes = [8, 32], strides = [1, 1]} : vector<8x128xf32> to vector<8x32xf32>
    %754 = arith.negf %753 : vector<8x32xf32>
    %755 = math.exp %754 : vector<8x32xf32>
    %cst_212 = arith.constant 1.000000e+00 : f32
    %756 = vector.broadcast %cst_212 : f32 to vector<8x32xf32>
    %757 = arith.addf %756, %755 : vector<8x32xf32>
    %758 = arith.divf %756, %757 : vector<8x32xf32>
    %759 = arith.mulf %750, %729 : vector<8x32xf32>
    %760 = arith.mulf %744, %752 : vector<8x32xf32>
    %761 = arith.addf %759, %760 : vector<8x32xf32>
    %762 = math.tanh %761 : vector<8x32xf32>
    %763 = arith.mulf %758, %762 : vector<8x32xf32>
    %764 = arith.index_cast %734 : i32 to index
    %c0_213 = arith.constant 0 : index
    %765 = vector.load %arg17[%764, %c0_213] : memref<64x32xf32, #tpu.memory_space<vmem>>, vector<8x32xf32>
    tpu.vector_store %arg17[%764, %c0_213], %763 {strides = array<i32>} : memref<64x32xf32, #tpu.memory_space<vmem>>, vector<8x32xf32>,
    %c7_i32_214 = arith.constant 7 : i32
    %c8_i32_215 = arith.constant 8 : i32
    %766 = arith.muli %c7_i32_214, %c8_i32_215 : i32
    %767 = arith.index_cast %766 : i32 to index
    %c0_216 = arith.constant 0 : index
    %768 = vector.load %arg16[%767, %c0_216] : memref<64x128xf32, #tpu.memory_space<vmem>>, vector<8x128xf32>
    %cst_217 = arith.constant dense<0.000000e+00> : vector<8x128xf32>
    %769 = tpu.matmul %763, %533, %cst_217 {dimension_numbers = #tpu.dot_dimension_numbers<[1], [0], [0], [1], [0, 0, 1, 1], [], []>} : vector<8x32xf32>, vector<32x128xf32>, vector<8x128xf32> -> vector<8x128xf32>
    %770 = arith.addf %768, %769 : vector<8x128xf32>
    %771 = vector.extract_strided_slice %770 {offsets = [0, 0], sizes = [8, 32], strides = [1, 1]} : vector<8x128xf32> to vector<8x32xf32>
    %772 = arith.negf %771 : vector<8x32xf32>
    %773 = math.exp %772 : vector<8x32xf32>
    %cst_218 = arith.constant 1.000000e+00 : f32
    %774 = vector.broadcast %cst_218 : f32 to vector<8x32xf32>
    %775 = arith.addf %774, %773 : vector<8x32xf32>
    %776 = arith.divf %774, %775 : vector<8x32xf32>
    %777 = vector.extract_strided_slice %770 {offsets = [0, 32], sizes = [8, 32], strides = [1, 1]} : vector<8x128xf32> to vector<8x32xf32>
    %778 = arith.negf %777 : vector<8x32xf32>
    %779 = math.exp %778 : vector<8x32xf32>
    %cst_219 = arith.constant 1.000000e+00 : f32
    %780 = vector.broadcast %cst_219 : f32 to vector<8x32xf32>
    %781 = arith.addf %780, %779 : vector<8x32xf32>
    %782 = arith.divf %780, %781 : vector<8x32xf32>
    %783 = vector.extract_strided_slice %770 {offsets = [0, 64], sizes = [8, 32], strides = [1, 1]} : vector<8x128xf32> to vector<8x32xf32>
    %784 = math.tanh %783 : vector<8x32xf32>
    %785 = vector.extract_strided_slice %770 {offsets = [0, 96], sizes = [8, 32], strides = [1, 1]} : vector<8x128xf32> to vector<8x32xf32>
    %786 = arith.negf %785 : vector<8x32xf32>
    %787 = math.exp %786 : vector<8x32xf32>
    %cst_220 = arith.constant 1.000000e+00 : f32
    %788 = vector.broadcast %cst_220 : f32 to vector<8x32xf32>
    %789 = arith.addf %788, %787 : vector<8x32xf32>
    %790 = arith.divf %788, %789 : vector<8x32xf32>
    %791 = arith.mulf %782, %761 : vector<8x32xf32>
    %792 = arith.mulf %776, %784 : vector<8x32xf32>
    %793 = arith.addf %791, %792 : vector<8x32xf32>
    %794 = math.tanh %793 : vector<8x32xf32>
    %795 = arith.mulf %790, %794 : vector<8x32xf32>
    %796 = arith.index_cast %766 : i32 to index
    %c0_221 = arith.constant 0 : index
    %797 = vector.load %arg17[%796, %c0_221] : memref<64x32xf32, #tpu.memory_space<vmem>>, vector<8x32xf32>
    tpu.vector_store %arg17[%796, %c0_221], %795 {strides = array<i32>} : memref<64x32xf32, #tpu.memory_space<vmem>>, vector<8x32xf32>,
    %c8_i32_222 = arith.constant 8 : i32
    %c0_223 = arith.constant 0 : index
    %c0_224 = arith.constant 0 : index
    %798 = vector.load %arg10[%c0_223, %c0_224] : memref<32x128xf32, #tpu.memory_space<vmem>>, vector<32x128xf32>
    %c0_225 = arith.constant 0 : index
    %c0_226 = arith.constant 0 : index
    %799 = vector.load %arg11[%c0_225, %c0_226] : memref<32x128xf32, #tpu.memory_space<vmem>>, vector<32x128xf32>
    %c0_227 = arith.constant 0 : index
    %c0_228 = arith.constant 0 : index
    %800 = vector.load %arg12[%c0_227, %c0_228] : memref<1x128xf32, #tpu.memory_space<vmem>>, vector<1x128xf32>
    %c0_229 = arith.constant 0 : index
    %c0_230 = arith.constant 0 : index
    %801 = vector.load %arg17[%c0_229, %c0_230] : memref<64x32xf32, #tpu.memory_space<vmem>>, vector<64x32xf32>
    %cst_231 = arith.constant dense<0.000000e+00> : vector<64x128xf32>
    %802 = tpu.matmul %801, %798, %cst_231 {dimension_numbers = #tpu.dot_dimension_numbers<[1], [0], [0], [1], [0, 0, 1, 1], [], []>} : vector<64x32xf32>, vector<32x128xf32>, vector<64x128xf32> -> vector<64x128xf32>
    %803 = vector.broadcast %800 : vector<1x128xf32> to vector<64x128xf32>
    %804 = arith.addf %802, %803 : vector<64x128xf32>
    %c0_232 = arith.constant 0 : index
    %c0_233 = arith.constant 0 : index
    %805 = vector.load %arg16[%c0_232, %c0_233] : memref<64x128xf32, #tpu.memory_space<vmem>>, vector<64x128xf32>
    tpu.vector_store %arg16[%c0_232, %c0_233], %804 {strides = array<i32>} : memref<64x128xf32, #tpu.memory_space<vmem>>, vector<64x128xf32>,
    %cst_234 = arith.constant 0.000000e+00 : f32
    %806 = vector.broadcast %cst_234 : f32 to vector<8x32xf32>
    %cst_235 = arith.constant 0.000000e+00 : f32
    %807 = vector.broadcast %cst_235 : f32 to vector<8x32xf32>
    %c0_i32_236 = arith.constant 0 : i32
    %c8_i32_237 = arith.constant 8 : i32
    %808 = arith.muli %c0_i32_236, %c8_i32_237 : i32
    %809 = arith.index_cast %808 : i32 to index
    %c0_238 = arith.constant 0 : index
    %810 = vector.load %arg16[%809, %c0_238] : memref<64x128xf32, #tpu.memory_space<vmem>>, vector<8x128xf32>
    %cst_239 = arith.constant dense<0.000000e+00> : vector<8x128xf32>
    %811 = tpu.matmul %806, %799, %cst_239 {dimension_numbers = #tpu.dot_dimension_numbers<[1], [0], [0], [1], [0, 0, 1, 1], [], []>} : vector<8x32xf32>, vector<32x128xf32>, vector<8x128xf32> -> vector<8x128xf32>
    %812 = arith.addf %810, %811 : vector<8x128xf32>
    %813 = vector.extract_strided_slice %812 {offsets = [0, 0], sizes = [8, 32], strides = [1, 1]} : vector<8x128xf32> to vector<8x32xf32>
    %814 = arith.negf %813 : vector<8x32xf32>
    %815 = math.exp %814 : vector<8x32xf32>
    %cst_240 = arith.constant 1.000000e+00 : f32
    %816 = vector.broadcast %cst_240 : f32 to vector<8x32xf32>
    %817 = arith.addf %816, %815 : vector<8x32xf32>
    %818 = arith.divf %816, %817 : vector<8x32xf32>
    %819 = vector.extract_strided_slice %812 {offsets = [0, 32], sizes = [8, 32], strides = [1, 1]} : vector<8x128xf32> to vector<8x32xf32>
    %820 = arith.negf %819 : vector<8x32xf32>
    %821 = math.exp %820 : vector<8x32xf32>
    %cst_241 = arith.constant 1.000000e+00 : f32
    %822 = vector.broadcast %cst_241 : f32 to vector<8x32xf32>
    %823 = arith.addf %822, %821 : vector<8x32xf32>
    %824 = arith.divf %822, %823 : vector<8x32xf32>
    %825 = vector.extract_strided_slice %812 {offsets = [0, 64], sizes = [8, 32], strides = [1, 1]} : vector<8x128xf32> to vector<8x32xf32>
    %826 = math.tanh %825 : vector<8x32xf32>
    %827 = vector.extract_strided_slice %812 {offsets = [0, 96], sizes = [8, 32], strides = [1, 1]} : vector<8x128xf32> to vector<8x32xf32>
    %828 = arith.negf %827 : vector<8x32xf32>
    %829 = math.exp %828 : vector<8x32xf32>
    %cst_242 = arith.constant 1.000000e+00 : f32
    %830 = vector.broadcast %cst_242 : f32 to vector<8x32xf32>
    %831 = arith.addf %830, %829 : vector<8x32xf32>
    %832 = arith.divf %830, %831 : vector<8x32xf32>
    %833 = arith.mulf %824, %807 : vector<8x32xf32>
    %834 = arith.mulf %818, %826 : vector<8x32xf32>
    %835 = arith.addf %833, %834 : vector<8x32xf32>
    %836 = math.tanh %835 : vector<8x32xf32>
    %837 = arith.mulf %832, %836 : vector<8x32xf32>
    %c1_i32_243 = arith.constant 1 : i32
    %c8_i32_244 = arith.constant 8 : i32
    %838 = arith.muli %c1_i32_243, %c8_i32_244 : i32
    %839 = arith.index_cast %838 : i32 to index
    %c0_245 = arith.constant 0 : index
    %840 = vector.load %arg16[%839, %c0_245] : memref<64x128xf32, #tpu.memory_space<vmem>>, vector<8x128xf32>
    %cst_246 = arith.constant dense<0.000000e+00> : vector<8x128xf32>
    %841 = tpu.matmul %837, %799, %cst_246 {dimension_numbers = #tpu.dot_dimension_numbers<[1], [0], [0], [1], [0, 0, 1, 1], [], []>} : vector<8x32xf32>, vector<32x128xf32>, vector<8x128xf32> -> vector<8x128xf32>
    %842 = arith.addf %840, %841 : vector<8x128xf32>
    %843 = vector.extract_strided_slice %842 {offsets = [0, 0], sizes = [8, 32], strides = [1, 1]} : vector<8x128xf32> to vector<8x32xf32>
    %844 = arith.negf %843 : vector<8x32xf32>
    %845 = math.exp %844 : vector<8x32xf32>
    %cst_247 = arith.constant 1.000000e+00 : f32
    %846 = vector.broadcast %cst_247 : f32 to vector<8x32xf32>
    %847 = arith.addf %846, %845 : vector<8x32xf32>
    %848 = arith.divf %846, %847 : vector<8x32xf32>
    %849 = vector.extract_strided_slice %842 {offsets = [0, 32], sizes = [8, 32], strides = [1, 1]} : vector<8x128xf32> to vector<8x32xf32>
    %850 = arith.negf %849 : vector<8x32xf32>
    %851 = math.exp %850 : vector<8x32xf32>
    %cst_248 = arith.constant 1.000000e+00 : f32
    %852 = vector.broadcast %cst_248 : f32 to vector<8x32xf32>
    %853 = arith.addf %852, %851 : vector<8x32xf32>
    %854 = arith.divf %852, %853 : vector<8x32xf32>
    %855 = vector.extract_strided_slice %842 {offsets = [0, 64], sizes = [8, 32], strides = [1, 1]} : vector<8x128xf32> to vector<8x32xf32>
    %856 = math.tanh %855 : vector<8x32xf32>
    %857 = vector.extract_strided_slice %842 {offsets = [0, 96], sizes = [8, 32], strides = [1, 1]} : vector<8x128xf32> to vector<8x32xf32>
    %858 = arith.negf %857 : vector<8x32xf32>
    %859 = math.exp %858 : vector<8x32xf32>
    %cst_249 = arith.constant 1.000000e+00 : f32
    %860 = vector.broadcast %cst_249 : f32 to vector<8x32xf32>
    %861 = arith.addf %860, %859 : vector<8x32xf32>
    %862 = arith.divf %860, %861 : vector<8x32xf32>
    %863 = arith.mulf %854, %835 : vector<8x32xf32>
    %864 = arith.mulf %848, %856 : vector<8x32xf32>
    %865 = arith.addf %863, %864 : vector<8x32xf32>
    %866 = math.tanh %865 : vector<8x32xf32>
    %867 = arith.mulf %862, %866 : vector<8x32xf32>
    %c2_i32_250 = arith.constant 2 : i32
    %c8_i32_251 = arith.constant 8 : i32
    %868 = arith.muli %c2_i32_250, %c8_i32_251 : i32
    %869 = arith.index_cast %868 : i32 to index
    %c0_252 = arith.constant 0 : index
    %870 = vector.load %arg16[%869, %c0_252] : memref<64x128xf32, #tpu.memory_space<vmem>>, vector<8x128xf32>
    %cst_253 = arith.constant dense<0.000000e+00> : vector<8x128xf32>
    %871 = tpu.matmul %867, %799, %cst_253 {dimension_numbers = #tpu.dot_dimension_numbers<[1], [0], [0], [1], [0, 0, 1, 1], [], []>} : vector<8x32xf32>, vector<32x128xf32>, vector<8x128xf32> -> vector<8x128xf32>
    %872 = arith.addf %870, %871 : vector<8x128xf32>
    %873 = vector.extract_strided_slice %872 {offsets = [0, 0], sizes = [8, 32], strides = [1, 1]} : vector<8x128xf32> to vector<8x32xf32>
    %874 = arith.negf %873 : vector<8x32xf32>
    %875 = math.exp %874 : vector<8x32xf32>
    %cst_254 = arith.constant 1.000000e+00 : f32
    %876 = vector.broadcast %cst_254 : f32 to vector<8x32xf32>
    %877 = arith.addf %876, %875 : vector<8x32xf32>
    %878 = arith.divf %876, %877 : vector<8x32xf32>
    %879 = vector.extract_strided_slice %872 {offsets = [0, 32], sizes = [8, 32], strides = [1, 1]} : vector<8x128xf32> to vector<8x32xf32>
    %880 = arith.negf %879 : vector<8x32xf32>
    %881 = math.exp %880 : vector<8x32xf32>
    %cst_255 = arith.constant 1.000000e+00 : f32
    %882 = vector.broadcast %cst_255 : f32 to vector<8x32xf32>
    %883 = arith.addf %882, %881 : vector<8x32xf32>
    %884 = arith.divf %882, %883 : vector<8x32xf32>
    %885 = vector.extract_strided_slice %872 {offsets = [0, 64], sizes = [8, 32], strides = [1, 1]} : vector<8x128xf32> to vector<8x32xf32>
    %886 = math.tanh %885 : vector<8x32xf32>
    %887 = vector.extract_strided_slice %872 {offsets = [0, 96], sizes = [8, 32], strides = [1, 1]} : vector<8x128xf32> to vector<8x32xf32>
    %888 = arith.negf %887 : vector<8x32xf32>
    %889 = math.exp %888 : vector<8x32xf32>
    %cst_256 = arith.constant 1.000000e+00 : f32
    %890 = vector.broadcast %cst_256 : f32 to vector<8x32xf32>
    %891 = arith.addf %890, %889 : vector<8x32xf32>
    %892 = arith.divf %890, %891 : vector<8x32xf32>
    %893 = arith.mulf %884, %865 : vector<8x32xf32>
    %894 = arith.mulf %878, %886 : vector<8x32xf32>
    %895 = arith.addf %893, %894 : vector<8x32xf32>
    %896 = math.tanh %895 : vector<8x32xf32>
    %897 = arith.mulf %892, %896 : vector<8x32xf32>
    %c3_i32_257 = arith.constant 3 : i32
    %c8_i32_258 = arith.constant 8 : i32
    %898 = arith.muli %c3_i32_257, %c8_i32_258 : i32
    %899 = arith.index_cast %898 : i32 to index
    %c0_259 = arith.constant 0 : index
    %900 = vector.load %arg16[%899, %c0_259] : memref<64x128xf32, #tpu.memory_space<vmem>>, vector<8x128xf32>
    %cst_260 = arith.constant dense<0.000000e+00> : vector<8x128xf32>
    %901 = tpu.matmul %897, %799, %cst_260 {dimension_numbers = #tpu.dot_dimension_numbers<[1], [0], [0], [1], [0, 0, 1, 1], [], []>} : vector<8x32xf32>, vector<32x128xf32>, vector<8x128xf32> -> vector<8x128xf32>
    %902 = arith.addf %900, %901 : vector<8x128xf32>
    %903 = vector.extract_strided_slice %902 {offsets = [0, 0], sizes = [8, 32], strides = [1, 1]} : vector<8x128xf32> to vector<8x32xf32>
    %904 = arith.negf %903 : vector<8x32xf32>
    %905 = math.exp %904 : vector<8x32xf32>
    %cst_261 = arith.constant 1.000000e+00 : f32
    %906 = vector.broadcast %cst_261 : f32 to vector<8x32xf32>
    %907 = arith.addf %906, %905 : vector<8x32xf32>
    %908 = arith.divf %906, %907 : vector<8x32xf32>
    %909 = vector.extract_strided_slice %902 {offsets = [0, 32], sizes = [8, 32], strides = [1, 1]} : vector<8x128xf32> to vector<8x32xf32>
    %910 = arith.negf %909 : vector<8x32xf32>
    %911 = math.exp %910 : vector<8x32xf32>
    %cst_262 = arith.constant 1.000000e+00 : f32
    %912 = vector.broadcast %cst_262 : f32 to vector<8x32xf32>
    %913 = arith.addf %912, %911 : vector<8x32xf32>
    %914 = arith.divf %912, %913 : vector<8x32xf32>
    %915 = vector.extract_strided_slice %902 {offsets = [0, 64], sizes = [8, 32], strides = [1, 1]} : vector<8x128xf32> to vector<8x32xf32>
    %916 = math.tanh %915 : vector<8x32xf32>
    %917 = vector.extract_strided_slice %902 {offsets = [0, 96], sizes = [8, 32], strides = [1, 1]} : vector<8x128xf32> to vector<8x32xf32>
    %918 = arith.negf %917 : vector<8x32xf32>
    %919 = math.exp %918 : vector<8x32xf32>
    %cst_263 = arith.constant 1.000000e+00 : f32
    %920 = vector.broadcast %cst_263 : f32 to vector<8x32xf32>
    %921 = arith.addf %920, %919 : vector<8x32xf32>
    %922 = arith.divf %920, %921 : vector<8x32xf32>
    %923 = arith.mulf %914, %895 : vector<8x32xf32>
    %924 = arith.mulf %908, %916 : vector<8x32xf32>
    %925 = arith.addf %923, %924 : vector<8x32xf32>
    %926 = math.tanh %925 : vector<8x32xf32>
    %927 = arith.mulf %922, %926 : vector<8x32xf32>
    %c4_i32_264 = arith.constant 4 : i32
    %c8_i32_265 = arith.constant 8 : i32
    %928 = arith.muli %c4_i32_264, %c8_i32_265 : i32
    %929 = arith.index_cast %928 : i32 to index
    %c0_266 = arith.constant 0 : index
    %930 = vector.load %arg16[%929, %c0_266] : memref<64x128xf32, #tpu.memory_space<vmem>>, vector<8x128xf32>
    %cst_267 = arith.constant dense<0.000000e+00> : vector<8x128xf32>
    %931 = tpu.matmul %927, %799, %cst_267 {dimension_numbers = #tpu.dot_dimension_numbers<[1], [0], [0], [1], [0, 0, 1, 1], [], []>} : vector<8x32xf32>, vector<32x128xf32>, vector<8x128xf32> -> vector<8x128xf32>
    %932 = arith.addf %930, %931 : vector<8x128xf32>
    %933 = vector.extract_strided_slice %932 {offsets = [0, 0], sizes = [8, 32], strides = [1, 1]} : vector<8x128xf32> to vector<8x32xf32>
    %934 = arith.negf %933 : vector<8x32xf32>
    %935 = math.exp %934 : vector<8x32xf32>
    %cst_268 = arith.constant 1.000000e+00 : f32
    %936 = vector.broadcast %cst_268 : f32 to vector<8x32xf32>
    %937 = arith.addf %936, %935 : vector<8x32xf32>
    %938 = arith.divf %936, %937 : vector<8x32xf32>
    %939 = vector.extract_strided_slice %932 {offsets = [0, 32], sizes = [8, 32], strides = [1, 1]} : vector<8x128xf32> to vector<8x32xf32>
    %940 = arith.negf %939 : vector<8x32xf32>
    %941 = math.exp %940 : vector<8x32xf32>
    %cst_269 = arith.constant 1.000000e+00 : f32
    %942 = vector.broadcast %cst_269 : f32 to vector<8x32xf32>
    %943 = arith.addf %942, %941 : vector<8x32xf32>
    %944 = arith.divf %942, %943 : vector<8x32xf32>
    %945 = vector.extract_strided_slice %932 {offsets = [0, 64], sizes = [8, 32], strides = [1, 1]} : vector<8x128xf32> to vector<8x32xf32>
    %946 = math.tanh %945 : vector<8x32xf32>
    %947 = vector.extract_strided_slice %932 {offsets = [0, 96], sizes = [8, 32], strides = [1, 1]} : vector<8x128xf32> to vector<8x32xf32>
    %948 = arith.negf %947 : vector<8x32xf32>
    %949 = math.exp %948 : vector<8x32xf32>
    %cst_270 = arith.constant 1.000000e+00 : f32
    %950 = vector.broadcast %cst_270 : f32 to vector<8x32xf32>
    %951 = arith.addf %950, %949 : vector<8x32xf32>
    %952 = arith.divf %950, %951 : vector<8x32xf32>
    %953 = arith.mulf %944, %925 : vector<8x32xf32>
    %954 = arith.mulf %938, %946 : vector<8x32xf32>
    %955 = arith.addf %953, %954 : vector<8x32xf32>
    %956 = math.tanh %955 : vector<8x32xf32>
    %957 = arith.mulf %952, %956 : vector<8x32xf32>
    %c5_i32_271 = arith.constant 5 : i32
    %c8_i32_272 = arith.constant 8 : i32
    %958 = arith.muli %c5_i32_271, %c8_i32_272 : i32
    %959 = arith.index_cast %958 : i32 to index
    %c0_273 = arith.constant 0 : index
    %960 = vector.load %arg16[%959, %c0_273] : memref<64x128xf32, #tpu.memory_space<vmem>>, vector<8x128xf32>
    %cst_274 = arith.constant dense<0.000000e+00> : vector<8x128xf32>
    %961 = tpu.matmul %957, %799, %cst_274 {dimension_numbers = #tpu.dot_dimension_numbers<[1], [0], [0], [1], [0, 0, 1, 1], [], []>} : vector<8x32xf32>, vector<32x128xf32>, vector<8x128xf32> -> vector<8x128xf32>
    %962 = arith.addf %960, %961 : vector<8x128xf32>
    %963 = vector.extract_strided_slice %962 {offsets = [0, 0], sizes = [8, 32], strides = [1, 1]} : vector<8x128xf32> to vector<8x32xf32>
    %964 = arith.negf %963 : vector<8x32xf32>
    %965 = math.exp %964 : vector<8x32xf32>
    %cst_275 = arith.constant 1.000000e+00 : f32
    %966 = vector.broadcast %cst_275 : f32 to vector<8x32xf32>
    %967 = arith.addf %966, %965 : vector<8x32xf32>
    %968 = arith.divf %966, %967 : vector<8x32xf32>
    %969 = vector.extract_strided_slice %962 {offsets = [0, 32], sizes = [8, 32], strides = [1, 1]} : vector<8x128xf32> to vector<8x32xf32>
    %970 = arith.negf %969 : vector<8x32xf32>
    %971 = math.exp %970 : vector<8x32xf32>
    %cst_276 = arith.constant 1.000000e+00 : f32
    %972 = vector.broadcast %cst_276 : f32 to vector<8x32xf32>
    %973 = arith.addf %972, %971 : vector<8x32xf32>
    %974 = arith.divf %972, %973 : vector<8x32xf32>
    %975 = vector.extract_strided_slice %962 {offsets = [0, 64], sizes = [8, 32], strides = [1, 1]} : vector<8x128xf32> to vector<8x32xf32>
    %976 = math.tanh %975 : vector<8x32xf32>
    %977 = vector.extract_strided_slice %962 {offsets = [0, 96], sizes = [8, 32], strides = [1, 1]} : vector<8x128xf32> to vector<8x32xf32>
    %978 = arith.negf %977 : vector<8x32xf32>
    %979 = math.exp %978 : vector<8x32xf32>
    %cst_277 = arith.constant 1.000000e+00 : f32
    %980 = vector.broadcast %cst_277 : f32 to vector<8x32xf32>
    %981 = arith.addf %980, %979 : vector<8x32xf32>
    %982 = arith.divf %980, %981 : vector<8x32xf32>
    %983 = arith.mulf %974, %955 : vector<8x32xf32>
    %984 = arith.mulf %968, %976 : vector<8x32xf32>
    %985 = arith.addf %983, %984 : vector<8x32xf32>
    %986 = math.tanh %985 : vector<8x32xf32>
    %987 = arith.mulf %982, %986 : vector<8x32xf32>
    %c6_i32_278 = arith.constant 6 : i32
    %c8_i32_279 = arith.constant 8 : i32
    %988 = arith.muli %c6_i32_278, %c8_i32_279 : i32
    %989 = arith.index_cast %988 : i32 to index
    %c0_280 = arith.constant 0 : index
    %990 = vector.load %arg16[%989, %c0_280] : memref<64x128xf32, #tpu.memory_space<vmem>>, vector<8x128xf32>
    %cst_281 = arith.constant dense<0.000000e+00> : vector<8x128xf32>
    %991 = tpu.matmul %987, %799, %cst_281 {dimension_numbers = #tpu.dot_dimension_numbers<[1], [0], [0], [1], [0, 0, 1, 1], [], []>} : vector<8x32xf32>, vector<32x128xf32>, vector<8x128xf32> -> vector<8x128xf32>
    %992 = arith.addf %990, %991 : vector<8x128xf32>
    %993 = vector.extract_strided_slice %992 {offsets = [0, 0], sizes = [8, 32], strides = [1, 1]} : vector<8x128xf32> to vector<8x32xf32>
    %994 = arith.negf %993 : vector<8x32xf32>
    %995 = math.exp %994 : vector<8x32xf32>
    %cst_282 = arith.constant 1.000000e+00 : f32
    %996 = vector.broadcast %cst_282 : f32 to vector<8x32xf32>
    %997 = arith.addf %996, %995 : vector<8x32xf32>
    %998 = arith.divf %996, %997 : vector<8x32xf32>
    %999 = vector.extract_strided_slice %992 {offsets = [0, 32], sizes = [8, 32], strides = [1, 1]} : vector<8x128xf32> to vector<8x32xf32>
    %1000 = arith.negf %999 : vector<8x32xf32>
    %1001 = math.exp %1000 : vector<8x32xf32>
    %cst_283 = arith.constant 1.000000e+00 : f32
    %1002 = vector.broadcast %cst_283 : f32 to vector<8x32xf32>
    %1003 = arith.addf %1002, %1001 : vector<8x32xf32>
    %1004 = arith.divf %1002, %1003 : vector<8x32xf32>
    %1005 = vector.extract_strided_slice %992 {offsets = [0, 64], sizes = [8, 32], strides = [1, 1]} : vector<8x128xf32> to vector<8x32xf32>
    %1006 = math.tanh %1005 : vector<8x32xf32>
    %1007 = vector.extract_strided_slice %992 {offsets = [0, 96], sizes = [8, 32], strides = [1, 1]} : vector<8x128xf32> to vector<8x32xf32>
    %1008 = arith.negf %1007 : vector<8x32xf32>
    %1009 = math.exp %1008 : vector<8x32xf32>
    %cst_284 = arith.constant 1.000000e+00 : f32
    %1010 = vector.broadcast %cst_284 : f32 to vector<8x32xf32>
    %1011 = arith.addf %1010, %1009 : vector<8x32xf32>
    %1012 = arith.divf %1010, %1011 : vector<8x32xf32>
    %1013 = arith.mulf %1004, %985 : vector<8x32xf32>
    %1014 = arith.mulf %998, %1006 : vector<8x32xf32>
    %1015 = arith.addf %1013, %1014 : vector<8x32xf32>
    %1016 = math.tanh %1015 : vector<8x32xf32>
    %1017 = arith.mulf %1012, %1016 : vector<8x32xf32>
    %c7_i32_285 = arith.constant 7 : i32
    %c8_i32_286 = arith.constant 8 : i32
    %1018 = arith.muli %c7_i32_285, %c8_i32_286 : i32
    %1019 = arith.index_cast %1018 : i32 to index
    %c0_287 = arith.constant 0 : index
    %1020 = vector.load %arg16[%1019, %c0_287] : memref<64x128xf32, #tpu.memory_space<vmem>>, vector<8x128xf32>
    %cst_288 = arith.constant dense<0.000000e+00> : vector<8x128xf32>
    %1021 = tpu.matmul %1017, %799, %cst_288 {dimension_numbers = #tpu.dot_dimension_numbers<[1], [0], [0], [1], [0, 0, 1, 1], [], []>} : vector<8x32xf32>, vector<32x128xf32>, vector<8x128xf32> -> vector<8x128xf32>
    %1022 = arith.addf %1020, %1021 : vector<8x128xf32>
    %1023 = vector.extract_strided_slice %1022 {offsets = [0, 0], sizes = [8, 32], strides = [1, 1]} : vector<8x128xf32> to vector<8x32xf32>
    %1024 = arith.negf %1023 : vector<8x32xf32>
    %1025 = math.exp %1024 : vector<8x32xf32>
    %cst_289 = arith.constant 1.000000e+00 : f32
    %1026 = vector.broadcast %cst_289 : f32 to vector<8x32xf32>
    %1027 = arith.addf %1026, %1025 : vector<8x32xf32>
    %1028 = arith.divf %1026, %1027 : vector<8x32xf32>
    %1029 = vector.extract_strided_slice %1022 {offsets = [0, 32], sizes = [8, 32], strides = [1, 1]} : vector<8x128xf32> to vector<8x32xf32>
    %1030 = arith.negf %1029 : vector<8x32xf32>
    %1031 = math.exp %1030 : vector<8x32xf32>
    %cst_290 = arith.constant 1.000000e+00 : f32
    %1032 = vector.broadcast %cst_290 : f32 to vector<8x32xf32>
    %1033 = arith.addf %1032, %1031 : vector<8x32xf32>
    %1034 = arith.divf %1032, %1033 : vector<8x32xf32>
    %1035 = vector.extract_strided_slice %1022 {offsets = [0, 64], sizes = [8, 32], strides = [1, 1]} : vector<8x128xf32> to vector<8x32xf32>
    %1036 = math.tanh %1035 : vector<8x32xf32>
    %1037 = vector.extract_strided_slice %1022 {offsets = [0, 96], sizes = [8, 32], strides = [1, 1]} : vector<8x128xf32> to vector<8x32xf32>
    %1038 = arith.negf %1037 : vector<8x32xf32>
    %1039 = math.exp %1038 : vector<8x32xf32>
    %cst_291 = arith.constant 1.000000e+00 : f32
    %1040 = vector.broadcast %cst_291 : f32 to vector<8x32xf32>
    %1041 = arith.addf %1040, %1039 : vector<8x32xf32>
    %1042 = arith.divf %1040, %1041 : vector<8x32xf32>
    %1043 = arith.mulf %1034, %1015 : vector<8x32xf32>
    %1044 = arith.mulf %1028, %1036 : vector<8x32xf32>
    %1045 = arith.addf %1043, %1044 : vector<8x32xf32>
    %1046 = math.tanh %1045 : vector<8x32xf32>
    %1047 = arith.mulf %1042, %1046 : vector<8x32xf32>
    %c8_i32_292 = arith.constant 8 : i32
    %c0_293 = arith.constant 0 : index
    %c0_294 = arith.constant 0 : index
    %1048 = vector.load %arg13[%c0_293, %c0_294] : memref<32x128xf32, #tpu.memory_space<vmem>>, vector<32x128xf32>
    %cst_295 = arith.constant dense<0.000000e+00> : vector<8x128xf32>
    %1049 = tpu.matmul %1047, %1048, %cst_295 {dimension_numbers = #tpu.dot_dimension_numbers<[1], [0], [0], [1], [0, 0, 1, 1], [], []>} : vector<8x32xf32>, vector<32x128xf32>, vector<8x128xf32> -> vector<8x128xf32>
    %c0_296 = arith.constant 0 : index
    %c0_297 = arith.constant 0 : index
    %1050 = vector.load %arg14[%c0_296, %c0_297] : memref<1x128xf32, #tpu.memory_space<vmem>>, vector<1x128xf32>
    %1051 = vector.broadcast %1050 : vector<1x128xf32> to vector<8x128xf32>
    %1052 = arith.addf %1049, %1051 : vector<8x128xf32>
    %c0_298 = arith.constant 0 : index
    %c0_299 = arith.constant 0 : index
    %1053 = vector.load %arg15[%c0_298, %c0_299] : memref<8x128xf32, #tpu.memory_space<vmem>>, vector<8x128xf32>
    tpu.vector_store %arg15[%c0_298, %c0_299], %1052 {strides = array<i32>} : memref<8x128xf32, #tpu.memory_space<vmem>>, vector<8x128xf32>,
    return
  }
}

</mosaic_0001>

<bundles_post_ra>
// kernel: stock_lstm_forward.1
= control target key start
LH: loop header
LB: loop body
LE: loop exit
PB: predicated region body
PF: predicated region fallthrough
CT: control target
= control target key end

     0   :  { %vm70_vm0 = vcmask 64512   ;;  %v5280_v0 = vmov 0.0|0.0   ;;  %vm5281_vm1 = vmmov 0   ;;  %v5282_v4 = vmov 0.0   ;;  %s5283_s17 = smov 64   ;;  %s6062_s2 = inlined_call_operand.vmem [shape: f32[32,128], index: 2, kind: input, shape index: {}]   ;;  %s6063_s1 = inlined_call_operand.vmem [shape: f32[8,128], index: 1, kind: input, shape index: {}]   ;;  %s6064_s0 = inlined_call_operand.vmem [shape: f32[64,8], index: 0, kind: input, shape index: {}]   ;;  %s6065_s3 = inlined_call_operand.vmem [shape: f32[1,128], index: 3, kind: input, shape index: {}]   ;;  %s6066_s4 = inlined_call_operand.vmem [shape: f32[32,128], index: 4, kind: input, shape index: {}]   ;;  %s6067_s5 = inlined_call_operand.vmem [shape: f32[32,128], index: 5, kind: input, shape index: {}]   ;;  %s6068_s6 = inlined_call_operand.vmem [shape: f32[1,128], index: 6, kind: input, shape index: {}]   ;;  %s6069_s7 = inlined_call_operand.vmem [shape: f32[32,128], index: 7, kind: input, shape index: {}]   ;;  %s6070_s8 = inlined_call_operand.vmem [shape: f32[32,128], index: 8, kind: input, shape index: {}]   ;;  %s6071_s9 = inlined_call_operand.vmem [shape: f32[1,128], index: 9, kind: input, shape index: {}]   ;;  %s6072_s10 = inlined_call_operand.vmem [shape: f32[32,128], index: 10, kind: input, shape index: {}]   ;;  %s6073_s11 = inlined_call_operand.vmem [shape: f32[32,128], index: 11, kind: input, shape index: {}]   ;;  %s6074_s12 = inlined_call_operand.vmem [shape: f32[1,128], index: 12, kind: input, shape index: {}]   ;;  %s6075_s13 = inlined_call_operand.vmem [shape: f32[32,128], index: 13, kind: input, shape index: {}]   ;;  %s6076_s14 = inlined_call_operand.vmem [shape: f32[1,128], index: 14, kind: input, shape index: {}]   ;;  %s6077_s15 = inlined_call_operand.vmem [shape: f32[8,128], index: 15, kind: output, shape index: {}]  }
   0x1   :  { %4797 = vmatprep.subr.bf16.mxu1 %v5280_v0  ;;  %v51_v1 = vld [vmem:[%s6062_s2] sm:$0xff]  ;;  %v52_v2 = vld [vmem:[%s6062_s2 + $0x8] sm:$0xff]  ;;  %4382 = vmatprep.mubr.msk.f32.mxu1 %vm5281_vm1, %v5282_v4  ;;  %v53_v8 = vld [vmem:[%s6062_s2 + $0x10] sm:$0xff]  ;;  %vm209_vm2 = vcmask 261120  }
   0x2   :  { %v50_v3 = vld [vmem:[%s6063_s1] sm:$0xff]  ;;  %v5377_v5 = vpack.c.bf16 %v52_v2, %v51_v1  ;;  %v57_v7 = vld [vmem:[%s6064_s0 + $0x8] sm:$0xff]  ;;  %v54_v9 = vld [vmem:[%s6062_s2 + $0x18] sm:$0xff] }
   0x3   :  { %4360 = vmatprep.subr.mxu0 %v50_v3  ;;  %v56_v6 = vld [vmem:[%s6064_s0] sm:$0xff]  ;;  %v5394_v10 = vpack.c.bf16 %v54_v9, %v53_v8  ;;  %v58_v46 = vld [vmem:[%s6064_s0 + $0x10] sm:$0xff]  ;;  %v59_v47 = vld [vmem:[%s6064_s0 + $0x18] sm:$0xff] }
   0x4   :  { %4361 = vmatpush3.msra.mxu0 %v50_v3  ;;  %4362 = vmatprep.mubr.msk.f32.mxu0 %vm70_vm0, %v56_v6  ;;  %v5414_v12 = vld [vmem:[%s6065_s3] ss:$0 sm:$0xff]  ;;  %s5284_s3 = smov 32   ;;  %v61_v49 = vld [vmem:[%s6064_s0 + $0x28] sm:$0xff]  ;;  %v62_v50 = vld [vmem:[%s6064_s0 + $0x30] sm:$0xff] }
   0x5   :  { %4799 = vmatpush3.bf16.msra.mxu1 %v5377_v5  ;;  %4363 = vmatmul.mubr.msk.f32.vlgmr.msra.gmra.mrb[0].mxu0 %vm70_vm0, %v57_v7  ;;  %v60_v48 = vld [vmem:[%s6064_s0 + $0x20] sm:$0xff]  ;;  %v63_v51 = vld [vmem:[%s6064_s0 + $0x38] sm:$0xff] }
   0x6   :  { %4800 = vmatprep.subr.bf16.mxu1 %v5280_v0  ;;  %4809 = vmatprep.subr.bf16.mxu0 %v5280_v0 }
   0x7   :  { %4811 = vmatpush3.bf16.msra.mxu0 %v5377_v5  ;;  %4365 = vmatprep.mubr.msk.f32.mxu0 %vm70_vm0, %v58_v46 }
   0x8   :  { %4812 = vmatprep.subr.bf16.mxu0 %v5280_v0 }
   0x9   :  { %4802 = vmatpush3.bf16.msra.mxu1 %v5394_v10  ;;  %4366 = vmatmul.mubr.msk.f32.gmra.mrb[2].mxu0 %vm70_vm0, %v59_v47 }
   0xa   :  { %4803 = vmatprep.subr.bf16.mxu1 %v5280_v0  ;;  %4368 = vmatprep.mubr.msk.f32.mxu0 %vm70_vm0, %v60_v48 }
   0xb   :  { %4814 = vmatpush3.bf16.msra.mxu0 %v5394_v10 }
   0xc   :  { %4383 = vmatmul.mubr.f32.vlgmr.msra.gmra.mrb[0].mxu1 %v5282_v4  ;;  %4821 = vmatprep.subr.bf16.mxu0 %v5280_v0 }
   0xd   :  { %4805 = vmatpush3.bf16.msra.mxu1 %v5377_v5  ;;  %4393 = vmatprep.mubr.msk.f32.mxu1 %vm5281_vm1, %v5282_v4 }
   0xe   :  { %4806 = vmatprep.subr.bf16.mxu1 %v5280_v0  ;;  %4369 = vmatmul.mubr.msk.f32.gmra.mrb[4].mxu0 %vm70_vm0, %v61_v49 }
   0xf   :  { %4371 = vmatprep.mubr.msk.f32.mxu0 %vm70_vm0, %v62_v50 }
  0x11   :  { %4808 = vmatpush3.bf16.msra.mxu1 %v5394_v10 }
  0x12   :  { %4815 = vmatprep.subr.bf16.mxu1 %v5280_v0  ;;  %4372 = vmatmul.mubr.msk.f32.gmra.mrb[6].mxu0 %vm70_vm0, %v63_v51 }
  0x13   :  { %4404 = vmatprep.mubr.msk.f32.mxu0 %vm5281_vm1, %v5282_v4 }
  0xd8   :  { %v4364_v11 = vpop.f32.mrb[0].mxu0 }
  0xd9   :  { %v161_v13 = vpop.f32.mrb[1].mxu0  ;;  %v167_v32 = vadd.f32 %v4364_v11, %v5414_v12 }
  0xda   :  { %v162_v14 = vadd.f32 %v5414_v12, %v161_v13 }
  0xdc   :  { %v4367_v55 = vpop.f32.mrb[2].mxu0 }
  0xdd   :  { %v171_v56 = vpop.f32.mrb[3].mxu0 }
  0xde   :  { %v172_v62 = vadd.f32 %v5414_v12, %v171_v56 }
  0xdf   :  { %v279_v15 = vpop.f32.mrb[0].mxu1 }
  0xe0   :  { %v283_v16 = vadd.f32 %v279_v15, %v162_v14  ;;  %v4384_v17 = vpop.f32.mrb[1].mxu1 }
  0xe1   :  { %v5460_v57 = vpop.f32.mrb[4].mxu0 }
  0xe2   :  { %5024 = vtanh.f32 %v283_v16  ;;  %v4061_v19 = vmul.f32 -1.442695, %v283_v16  ;;  %v5462_v58 = vpop.f32.mrb[5].mxu0 }
  0xe4   :  { %5026 = vpow2.f32 %v4061_v19 }
  0xe5   :  { %v5464_v59 = vpop.f32.mrb[6].mxu0 }
  0xe6   :  { %v5466_v60 = vpop.f32.mrb[7].mxu0 }
  0xec   :  { %v5025_v18 = vpop.eup %5024 }
  0xed   :  { %293 = vrot.lane.b32.xlu0 %v5025_v18, %s5283_s17 }
  0xee   :  { %v5027_v20 = vpop.eup %5026 }
  0xef   :  { %v287_v21 = vadd.f32 1.0, %v5027_v20 }
  0xf1   :  { %5028 = vrcp.f32 %v287_v21  ;;  %v177_v21 = vadd.f32 %v4367_v55, %v5414_v12 }
  0xfb   :  { %v5029_v22 = vpop.eup %5028 }
  0xfc   :  { %v291_v25 = vmul.f32 0.0, %v5029_v22 }
 0x15f   :  { %v294_v23 = vpop.permute.xlu0 %293 }
 0x160   :  { %v296_v24 = vmul.f32 %v5029_v22, %v294_v23 }
 0x162   :  { %298 = vrot.lane.b32.xlu0 %v296_v24, %s5284_s3 }
 0x1d4   :  { %v299_v26 = vpop.permute.xlu0 %298 }
 0x1d5   :  { %v301_v27 = vadd.f32 %v299_v26, %v291_v25 }
 0x1d7   :  { %5030 = vtanh.f32 %v301_v27 }
 0x1e1   :  { %v5031_v28 = vpop.eup %5030 }
 0x1e2   :  { %304 = vrot.lane.b32.xlu1 %v5031_v28, %s5283_s17 }
 0x254   :  { %v305_v29 = vpop.permute.xlu1 %304 }
 0x255   :  { %v307_v30 = vmul.f32 %v5029_v22, %v305_v29 }
 0x257   :  { %309 = vrot.lane.b32.xlu1 %v307_v30, %s5284_s3 }
 0x2c9   :  { %v310_v31 = vpop.permute.xlu1 %309 }
 0x2ca   :  { %312 = vst.msk [vmem:[#allocation3] sm:$0xff] %vm209_vm2, %v310_v31  ;;  %4394 = vmatmul.mubr.msk.f32.vlgmr.msra.gmra.mrb[2].mxu1 %vm209_vm2, %v310_v31 }
 0x2cb   :  { %4817 = vmatpush3.bf16.msra.mxu1 %v5377_v5  ;;  %4415 = vmatprep.mubr.msk.f32.mxu1 %vm5281_vm1, %v5282_v4 }
 0x2cc   :  { %4818 = vmatprep.subr.bf16.mxu1 %v5280_v0 }
 0x2cf   :  { %4820 = vmatpush3.bf16.msra.mxu1 %v5394_v10 }
 0x2d0   :  { %4827 = vmatprep.subr.bf16.mxu1 %v5280_v0 }
 0x39d   :  { %v382_v33 = vpop.f32.mrb[2].mxu1 }
 0x39e   :  { %v386_v34 = vadd.f32 %v382_v33, %v167_v32  ;;  %v4395_v35 = vpop.f32.mrb[3].mxu1 }
 0x3a0   :  { %5032 = vtanh.f32 %v386_v34  ;;  %v4063_v37 = vmul.f32 -1.442695, %v386_v34 }
 0x3a2   :  { %5034 = vpow2.f32 %v4063_v37 }
 0x3aa   :  { %v5033_v36 = vpop.eup %5032 }
 0x3ab   :  { %396 = vrot.lane.b32.xlu0 %v5033_v36, %s5283_s17 }
 0x3ac   :  { %v5035_v38 = vpop.eup %5034 }
 0x3ad   :  { %v390_v39 = vadd.f32 1.0, %v5035_v38 }
 0x3af   :  { %5036 = vrcp.f32 %v390_v39  ;;  %v182_v39 = vadd.f32 %v5414_v12, %v5462_v58  ;;  %v187_v58 = vadd.f32 %v5460_v57, %v5414_v12 }
 0x3b9   :  { %v5037_v40 = vpop.eup %5036 }
 0x3ba   :  { %v394_v43 = vmul.f32 %v5037_v40, %v301_v27 }
 0x41d   :  { %v397_v41 = vpop.permute.xlu0 %396 }
 0x41e   :  { %v399_v42 = vmul.f32 %v5037_v40, %v397_v41 }
 0x420   :  { %401 = vrot.lane.b32.xlu1 %v399_v42, %s5284_s3 }
 0x492   :  { %v402_v44 = vpop.permute.xlu1 %401 }
 0x493   :  { %v404_v45 = vadd.f32 %v402_v44, %v394_v43 }
 0x495   :  { %5038 = vtanh.f32 %v404_v45 }
 0x49f   :  { %v5039_v52 = vpop.eup %5038 }
 0x4a0   :  { %407 = vrot.lane.b32.xlu0 %v5039_v52, %s5283_s17 }
 0x512   :  { %v408_v53 = vpop.permute.xlu0 %407 }
 0x513   :  { %v410_v54 = vmul.f32 %v5037_v40, %v408_v53 }
 0x515   :  { %412 = vrot.lane.b32.xlu1 %v410_v54, %s5284_s3 }
 0x587   :  { %v413_v61 = vpop.permute.xlu1 %412 }
 0x588   :  { %415 = vst.msk [vmem:[#allocation3 + $0x8] sm:$0xff] %vm209_vm2, %v413_v61  ;;  %4405 = vmatmul.mubr.msk.f32.vlgmr.msra.gmra.mrb[8].mxu0 %vm209_vm2, %v413_v61 }
 0x589   :  { %4823 = vmatpush3.bf16.msra.mxu0 %v5377_v5  ;;  %4426 = vmatprep.mubr.msk.f32.mxu0 %vm5281_vm1, %v5282_v4 }
 0x58a   :  { %4824 = vmatprep.subr.bf16.mxu0 %v5280_v0 }
 0x58d   :  { %4826 = vmatpush3.bf16.msra.mxu0 %v5394_v10 }
 0x58e   :  { %4833 = vmatprep.subr.bf16.mxu0 %v5280_v0 }
 0x65b   :  { %v485_v63 = vpop.f32.mrb[8].mxu0 }
 0x65c   :  { %v489_v1 = vadd.f32 %v485_v63, %v172_v62  ;;  %v4406_v2 = vpop.f32.mrb[9].mxu0 }
 0x65e   :  { %5040 = vtanh.f32 %v489_v1  ;;  %v4065_v6 = vmul.f32 -1.442695, %v489_v1 }
 0x660   :  { %5042 = vpow2.f32 %v4065_v6 }
 0x668   :  { %v5041_v3 = vpop.eup %5040 }
 0x669   :  { %499 = vrot.lane.b32.xlu0 %v5041_v3, %s5283_s17 }
 0x66a   :  { %v5043_v7 = vpop.eup %5042 }
 0x66b   :  { %v493_v8 = vadd.f32 1.0, %v5043_v7 }
 0x66d   :  { %5044 = vrcp.f32 %v493_v8 }
 0x677   :  { %v5045_v9 = vpop.eup %5044 }
 0x678   :  { %v497_v14 = vmul.f32 %v5045_v9, %v404_v45 }
 0x6db   :  { %v500_v11 = vpop.permute.xlu0 %499 }
 0x6dc   :  { %v502_v13 = vmul.f32 %v5045_v9, %v500_v11  ;;  %v1034_v11 = vld [vmem:[%s6066_s4] sm:$0xff] }
 0x6de   :  { %504 = vrot.lane.b32.xlu1 %v502_v13, %s5284_s3  ;;  %v1035_v13 = vld [vmem:[%s6066_s4 + $0x8] sm:$0xff] }
 0x750   :  { %v505_v15 = vpop.permute.xlu1 %504 }
 0x751   :  { %v507_v16 = vadd.f32 %v505_v15, %v497_v14  ;;  %v4845_v14 = vpack.c.bf16 %v1035_v13, %v1034_v11 }
 0x753   :  { %5046 = vtanh.f32 %v507_v16 }
 0x75d   :  { %v5047_v17 = vpop.eup %5046 }
 0x75e   :  { %510 = vrot.lane.b32.xlu0 %v5047_v17, %s5283_s17 }
 0x7d0   :  { %v511_v18 = vpop.permute.xlu0 %510 }
 0x7d1   :  { %v513_v19 = vmul.f32 %v5045_v9, %v511_v18  ;;  %v1036_v18 = vld [vmem:[%s6066_s4 + $0x10] sm:$0xff] }
 0x7d3   :  { %515 = vrot.lane.b32.xlu1 %v513_v19, %s5284_s3  ;;  %v1037_v19 = vld [vmem:[%s6066_s4 + $0x18] sm:$0xff] }
 0x845   :  { %v516_v20 = vpop.permute.xlu1 %515 }
 0x846   :  { %518 = vst.msk [vmem:[#allocation3 + $0x10] sm:$0xff] %vm209_vm2, %v516_v20  ;;  %4416 = vmatmul.mubr.msk.f32.vlgmr.msra.gmra.mrb[4].mxu1 %vm209_vm2, %v516_v20  ;;  %v4849_v20 = vpack.c.bf16 %v1037_v19, %v1036_v18 }
 0x847   :  { %4829 = vmatpush3.bf16.msra.mxu1 %v5377_v5  ;;  %4437 = vmatprep.mubr.msk.f32.mxu1 %vm5281_vm1, %v5282_v4 }
 0x848   :  { %4830 = vmatprep.subr.bf16.mxu1 %v5280_v0 }
 0x84b   :  { %4832 = vmatpush3.bf16.msra.mxu1 %v5394_v10 }
 0x84c   :  { %4839 = vmatprep.subr.bf16.mxu1 %v5280_v0 }
 0x919   :  { %v588_v22 = vpop.f32.mrb[4].mxu1 }
 0x91a   :  { %v592_v23 = vadd.f32 %v588_v22, %v177_v21  ;;  %v4417_v24 = vpop.f32.mrb[5].mxu1  ;;  %v1043_v22 = vld [vmem:[#allocation3] sm:$0xff] }
 0x91b   :  { %v1045_v24 = vld [vmem:[#allocation3 + $0x10] sm:$0xff] }
 0x91c   :  { %5048 = vtanh.f32 %v592_v23  ;;  %v4067_v26 = vmul.f32 -1.442695, %v592_v23  ;;  %v1044_v23 = vld [vmem:[#allocation3 + $0x8] sm:$0xff] }
 0x91e   :  { %5050 = vpow2.f32 %v4067_v26 }
 0x926   :  { %v5049_v25 = vpop.eup %5048 }
 0x927   :  { %602 = vrot.lane.b32.xlu0 %v5049_v25, %s5283_s17 }
 0x928   :  { %v5051_v27 = vpop.eup %5050 }
 0x929   :  { %v596_v28 = vadd.f32 1.0, %v5051_v27 }
 0x92b   :  { %5052 = vrcp.f32 %v596_v28  ;;  %v192_v28 = vadd.f32 %v5414_v12, %v5466_v60 }
 0x935   :  { %v5053_v29 = vpop.eup %5052 }
 0x936   :  { %v600_v32 = vmul.f32 %v5053_v29, %v507_v16 }
 0x999   :  { %v603_v30 = vpop.permute.xlu0 %602 }
 0x99a   :  { %v605_v31 = vmul.f32 %v5053_v29, %v603_v30 }
 0x99c   :  { %607 = vrot.lane.b32.xlu1 %v605_v31, %s5284_s3 }
 0xa0e   :  { %v608_v33 = vpop.permute.xlu1 %607 }
 0xa0f   :  { %v610_v34 = vadd.f32 %v608_v33, %v600_v32 }
 0xa11   :  { %5054 = vtanh.f32 %v610_v34 }
 0xa1b   :  { %v5055_v35 = vpop.eup %5054 }
 0xa1c   :  { %613 = vrot.lane.b32.xlu0 %v5055_v35, %s5283_s17 }
 0xa8e   :  { %v614_v36 = vpop.permute.xlu0 %613 }
 0xa8f   :  { %v616_v37 = vmul.f32 %v5053_v29, %v614_v36 }
 0xa91   :  { %618 = vrot.lane.b32.xlu1 %v616_v37, %s5284_s3 }
 0xb03   :  { %v619_v38 = vpop.permute.xlu1 %618 }
 0xb04   :  { %621 = vst.msk [vmem:[#allocation3 + $0x18] sm:$0xff] %vm209_vm2, %v619_v38  ;;  %4427 = vmatmul.mubr.msk.f32.vlgmr.msra.gmra.mrb[10].mxu0 %vm209_vm2, %v619_v38 }
 0xb05   :  { %4835 = vmatpush3.bf16.msra.mxu0 %v5377_v5  ;;  %4448 = vmatprep.mubr.msk.f32.mxu0 %vm5281_vm1, %v5282_v4 }
 0xb06   :  { %4836 = vmatprep.subr.bf16.mxu0 %v5280_v0 }
 0xb09   :  { %4838 = vmatpush3.bf16.msra.mxu0 %v5394_v10 }
 0xb0a   :  { %4846 = vmatprep.subr.bf16.mxu0 %v4845_v14 }
 0xb0b   :  { %v1046_v25 = vld [vmem:[#allocation3 + $0x18] sm:$0xff] }
 0xbd7   :  { %v691_v40 = vpop.f32.mrb[10].mxu0 }
 0xbd8   :  { %v695_v41 = vadd.f32 %v691_v40, %v182_v39  ;;  %v4428_v42 = vpop.f32.mrb[11].mxu0 }
 0xbda   :  { %5056 = vtanh.f32 %v695_v41  ;;  %v4069_v44 = vmul.f32 -1.442695, %v695_v41 }
 0xbdc   :  { %5058 = vpow2.f32 %v4069_v44 }
 0xbe4   :  { %v5057_v43 = vpop.eup %5056 }
 0xbe5   :  { %705 = vrot.lane.b32.xlu0 %v5057_v43, %s5283_s17 }
 0xbe6   :  { %v5059_v45 = vpop.eup %5058 }
 0xbe7   :  { %v699_v46 = vadd.f32 1.0, %v5059_v45 }
 0xbe9   :  { %5060 = vrcp.f32 %v699_v46 }
 0xbf3   :  { %v5061_v47 = vpop.eup %5060 }
 0xbf4   :  { %v703_v50 = vmul.f32 %v5061_v47, %v610_v34 }
 0xc57   :  { %v706_v48 = vpop.permute.xlu0 %705 }
 0xc58   :  { %v708_v49 = vmul.f32 %v5061_v47, %v706_v48  ;;  %v1038_v48 = vld [vmem:[%s6067_s5] sm:$0xff] }
 0xc5a   :  { %710 = vrot.lane.b32.xlu1 %v708_v49, %s5284_s3  ;;  %v1039_v49 = vld [vmem:[%s6067_s5 + $0x8] sm:$0xff] }
 0xccc   :  { %v711_v51 = vpop.permute.xlu1 %710 }
 0xccd   :  { %v713_v52 = vadd.f32 %v711_v51, %v703_v50  ;;  %v5566_v50 = vpack.c.bf16 %v1039_v49, %v1038_v48  ;;  %v1040_v51 = vld [vmem:[%s6067_s5 + $0x10] sm:$0xff] }
 0xccf   :  { %5062 = vtanh.f32 %v713_v52 }
 0xcd9   :  { %v5063_v53 = vpop.eup %5062 }
 0xcda   :  { %716 = vrot.lane.b32.xlu0 %v5063_v53, %s5283_s17 }
 0xd4c   :  { %v717_v54 = vpop.permute.xlu0 %716 }
 0xd4d   :  { %v719_v55 = vmul.f32 %v5061_v47, %v717_v54 }
 0xd4f   :  { %721 = vrot.lane.b32.xlu1 %v719_v55, %s5284_s3 }
 0xdc1   :  { %v722_v56 = vpop.permute.xlu1 %721 }
 0xdc2   :  { %724 = vst.msk [vmem:[#allocation3 + $0x20] sm:$0xff] %vm209_vm2, %v722_v56  ;;  %4438 = vmatmul.mubr.msk.f32.vlgmr.msra.gmra.mrb[6].mxu1 %vm209_vm2, %v722_v56 }
 0xdc3   :  { %4841 = vmatpush3.bf16.msra.mxu1 %v5377_v5  ;;  %4459 = vmatprep.mubr.msk.f32.mxu1 %vm5281_vm1, %v5282_v4 }
 0xdc4   :  { %4842 = vmatprep.subr.bf16.mxu1 %v5280_v0 }
 0xdc7   :  { %4844 = vmatpush3.bf16.msra.mxu1 %v5394_v10 }
 0xdc8   :  { %4853 = vmatprep.subr.bf16.mxu1 %v5280_v0 }
 0xdc9   :  { %v1047_v26 = vld [vmem:[#allocation3 + $0x20] sm:$0xff] }
 0xe95   :  { %v794_v61 = vpop.f32.mrb[6].mxu1 }
 0xe96   :  { %v798_v62 = vadd.f32 %v794_v61, %v187_v58  ;;  %v4439_v63 = vpop.f32.mrb[7].mxu1  ;;  %v197_v61 = vadd.f32 %v5464_v59, %v5414_v12 }
 0xe98   :  { %5064 = vtanh.f32 %v798_v62  ;;  %v4071_v5 = vmul.f32 -1.442695, %v798_v62 }
 0xe9a   :  { %5066 = vpow2.f32 %v4071_v5  ;;  %v5602_v5 = vld [vmem:[%s6068_s6] ss:$0 sm:$0xff] }
 0xea2   :  { %v5065_v1 = vpop.eup %5064 }
 0xea3   :  { %808 = vrot.lane.b32.xlu0 %v5065_v1, %s5283_s17 }
 0xea4   :  { %v5067_v2 = vpop.eup %5066 }
 0xea5   :  { %v802_v3 = vadd.f32 1.0, %v5067_v2 }
 0xea7   :  { %5068 = vrcp.f32 %v802_v3 }
 0xeb1   :  { %v5069_v6 = vpop.eup %5068 }
 0xeb2   :  { %v806_v8 = vmul.f32 %v5069_v6, %v713_v52  ;;  %v1041_v52 = vld [vmem:[%s6067_s5 + $0x18] sm:$0xff] }
 0xeb3   :  { %v5576_v53 = vpack.c.bf16 %v1041_v52, %v1040_v51 }
 0xf15   :  { %v809_v7 = vpop.permute.xlu0 %808 }
 0xf16   :  { %v811_v10 = vmul.f32 %v5069_v6, %v809_v7 }
 0xf18   :  { %813 = vrot.lane.b32.xlu1 %v811_v10, %s5284_s3 }
 0xf8a   :  { %v814_v9 = vpop.permute.xlu1 %813 }
 0xf8b   :  { %v816_v57 = vadd.f32 %v814_v9, %v806_v8 }
 0xf8d   :  { %5070 = vtanh.f32 %v816_v57 }
 0xf97   :  { %v5071_v15 = vpop.eup %5070 }
 0xf98   :  { %819 = vrot.lane.b32.xlu0 %v5071_v15, %s5283_s17 }
0x100a   :  { %v820_v16 = vpop.permute.xlu0 %819 }
0x100b   :  { %v822_v17 = vmul.f32 %v5069_v6, %v820_v16 }
0x100d   :  { %824 = vrot.lane.b32.xlu1 %v822_v17, %s5284_s3 }
0x107f   :  { %v825_v21 = vpop.permute.xlu1 %824 }
0x1080   :  { %827 = vst.msk [vmem:[#allocation3 + $0x28] sm:$0xff] %vm209_vm2, %v825_v21  ;;  %4449 = vmatmul.mubr.msk.f32.vlgmr.msra.gmra.mrb[12].mxu0 %vm209_vm2, %v825_v21 }
0x1081   :  { %4848 = vmatpush3.bf16.msra.mxu0 %v4845_v14  ;;  %4470 = vmatprep.mubr.msk.f32.mxu0 %vm209_vm2, %v1043_v22 }
0x1082   :  { %4850 = vmatprep.subr.bf16.mxu0 %v4849_v20 }
0x1085   :  { %4852 = vmatpush3.bf16.msra.mxu0 %v4849_v20 }
0x1086   :  { %4865 = vmatprep.subr.bf16.mxu0 %v5280_v0 }
0x1087   :  { %v1048_v27 = vld [vmem:[#allocation3 + $0x28] sm:$0xff] }
0x1088   :  { %4471 = vmatmul.mubr.msk.f32.vlgmr.msra.gmra.mrb[14].mxu0 %vm209_vm2, %v1044_v23 }
0x1089   :  { %4473 = vmatprep.mubr.msk.f32.mxu0 %vm209_vm2, %v1045_v24  ;;  %4867 = vmatpush3.bf16.msra.mxu0 %v5566_v50 }
0x108a   :  { %4868 = vmatprep.subr.bf16.mxu0 %v5280_v0 }
0x108c   :  { %4474 = vmatmul.mubr.msk.f32.gmra.mrb[16].mxu0 %vm209_vm2, %v1046_v25 }
0x108d   :  { %4476 = vmatprep.mubr.msk.f32.mxu0 %vm209_vm2, %v1047_v26  ;;  %4870 = vmatpush3.bf16.msra.mxu0 %v5576_v53 }
0x108e   :  { %4877 = vmatprep.subr.bf16.mxu0 %v5280_v0 }
0x1090   :  { %4477 = vmatmul.mubr.msk.f32.gmra.mrb[18].mxu0 %vm209_vm2, %v1048_v27 }
0x1153   :  { %v897_v29 = vpop.f32.mrb[12].mxu0 }
0x1154   :  { %v901_v30 = vadd.f32 %v897_v29, %v192_v28  ;;  %v4450_v31 = vpop.f32.mrb[13].mxu0 }
0x1156   :  { %5072 = vtanh.f32 %v901_v30  ;;  %v4073_v39 = vmul.f32 -1.442695, %v901_v30 }
0x1158   :  { %5074 = vpow2.f32 %v4073_v39 }
0x115b   :  { %v5544_v32 = vpop.f32.mrb[14].mxu0 }
0x115c   :  { %v1147_v33 = vpop.f32.mrb[15].mxu0 }
0x115d   :  { %v1148_v2 = vadd.f32 %v5602_v5, %v1147_v33 }
0x115f   :  { %v5546_v34 = vpop.f32.mrb[16].mxu0 }
0x1160   :  { %v5073_v35 = vpop.eup %5072  ;;  %v5548_v36 = vpop.f32.mrb[17].mxu0 }
0x1161   :  { %911 = vrot.lane.b32.xlu0 %v5073_v35, %s5283_s17  ;;  %v1153_v35 = vadd.f32 %v5544_v32, %v5602_v5 }
0x1162   :  { %v5075_v60 = vpop.eup %5074 }
0x1163   :  { %v5551_v37 = vpop.f32.mrb[18].mxu0  ;;  %v905_v40 = vadd.f32 1.0, %v5075_v60 }
0x1164   :  { %v5553_v38 = vpop.f32.mrb[19].mxu0 }
0x1165   :  { %5076 = vrcp.f32 %v905_v40 }
0x116f   :  { %v5077_v41 = vpop.eup %5076 }
0x1170   :  { %v909_v44 = vmul.f32 %v5077_v41, %v816_v57 }
0x11d3   :  { %v912_v42 = vpop.permute.xlu0 %911 }
0x11d4   :  { %v914_v43 = vmul.f32 %v5077_v41, %v912_v42 }
0x11d6   :  { %916 = vrot.lane.b32.xlu1 %v914_v43, %s5284_s3 }
0x1248   :  { %v917_v45 = vpop.permute.xlu1 %916 }
0x1249   :  { %v5556_v46 = vadd.f32 %v917_v45, %v909_v44 }
0x124b   :  { %5078 = vtanh.f32 %v5556_v46 }
0x1255   :  { %v5079_v47 = vpop.eup %5078 }
0x1256   :  { %922 = vrot.lane.b32.xlu0 %v5079_v47, %s5283_s17 }
0x12c8   :  { %v923_v54 = vpop.permute.xlu0 %922 }
0x12c9   :  { %v925_v55 = vmul.f32 %v5077_v41, %v923_v54 }
0x12cb   :  { %927 = vrot.lane.b32.xlu1 %v925_v55, %s5284_s3 }
0x133d   :  { %v928_v56 = vpop.permute.xlu1 %927 }
0x133e   :  { %930 = vst.msk [vmem:[#allocation3 + $0x30] sm:$0xff] %vm209_vm2, %v928_v56  ;;  %4460 = vmatmul.mubr.msk.f32.vlgmr.msra.gmra.mrb[8].mxu1 %vm209_vm2, %v928_v56 }
0x133f   :  { %4855 = vmatpush3.bf16.msra.mxu1 %v5566_v50  ;;  %4490 = vmatprep.mubr.msk.f32.mxu1 %vm5281_vm1, %v5282_v4 }
0x1340   :  { %4856 = vmatprep.subr.bf16.mxu1 %v5280_v0 }
0x1343   :  { %4858 = vmatpush3.bf16.msra.mxu1 %v5576_v53 }
0x1344   :  { %4859 = vmatprep.subr.bf16.mxu1 %v5280_v0 }
0x1345   :  { %v1049_v58 = vld [vmem:[#allocation3 + $0x30] sm:$0xff] }
0x1346   :  { %4491 = vmatmul.mubr.f32.vlgmr.msra.gmra.mrb[10].mxu1 %v5282_v4  ;;  %4479 = vmatprep.mubr.msk.f32.mxu0 %vm209_vm2, %v1049_v58 }
0x1347   :  { %4861 = vmatpush3.bf16.msra.mxu1 %v5566_v50  ;;  %4501 = vmatprep.mubr.msk.f32.mxu1 %vm5281_vm1, %v5282_v4 }
0x1348   :  { %4862 = vmatprep.subr.bf16.mxu1 %v5280_v0 }
0x134b   :  { %4864 = vmatpush3.bf16.msra.mxu1 %v5576_v53 }
0x134c   :  { %4871 = vmatprep.subr.bf16.mxu1 %v5280_v0 }
0x1411   :  { %v1000_v62 = vpop.f32.mrb[8].mxu1 }
0x1412   :  { %v1004_v63 = vadd.f32 %v1000_v62, %v197_v61  ;;  %v4461_v1 = vpop.f32.mrb[9].mxu1 }
0x1414   :  { %v4075_v18 = vmul.f32 -1.442695, %v1004_v63 }
0x1419   :  { %v1261_v3 = vpop.f32.mrb[10].mxu1 }
0x141a   :  { %v1265_v6 = vadd.f32 %v1261_v3, %v1148_v2  ;;  %v4492_v7 = vpop.f32.mrb[11].mxu1 }
0x141c   :  { %5080 = vtanh.f32 %v1265_v6  ;;  %v4085_v8 = vmul.f32 -1.442695, %v1265_v6 }
0x141e   :  { %5082 = vpow2.f32 %v4085_v8 }
0x1426   :  { %v5081_v10 = vpop.eup %5080 }
0x1427   :  { %1275 = vrot.lane.b32.xlu0 %v5081_v10, %s5283_s17 }
0x1428   :  { %v5083_v12 = vpop.eup %5082 }
0x1429   :  { %v1269_v59 = vadd.f32 1.0, %v5083_v12 }
0x142b   :  { %5084 = vrcp.f32 %v1269_v59 }
0x1435   :  { %v5085_v9 = vpop.eup %5084 }
0x1436   :  { %v1273_v13 = vmul.f32 0.0, %v5085_v9 }
0x1499   :  { %v1276_v57 = vpop.permute.xlu0 %1275 }
0x149a   :  { %v1278_v11 = vmul.f32 %v5085_v9, %v1276_v57 }
0x149c   :  { %1280 = vrot.lane.b32.xlu1 %v1278_v11, %s5284_s3 }
0x150e   :  { %v1281_v14 = vpop.permute.xlu1 %1280 }
0x150f   :  { %v1283_v15 = vadd.f32 %v1281_v14, %v1273_v13 }
0x1511   :  { %5086 = vtanh.f32 %v1283_v15 }
0x1512   :  { %5088 = vtanh.f32 %v1004_v63  ;;  %v1158_v63 = vadd.f32 %v5602_v5, %v5548_v36 }
0x1513   :  { %5090 = vpow2.f32 %v4075_v18 }
0x151b   :  { %v5087_v16 = vpop.eup %5086 }
0x151c   :  { %1286 = vrot.lane.b32.xlu0 %v5087_v16, %s5283_s17  ;;  %v5089_v17 = vpop.eup %5088 }
0x151d   :  { %v5091_v19 = vpop.eup %5090 }
0x151e   :  { %v1008_v20 = vadd.f32 1.0, %v5091_v19 }
0x1520   :  { %1014 = vrot.lane.b32.xlu0 %v5089_v17, %s5283_s17  ;;  %5092 = vrcp.f32 %v1008_v20  ;;  %v1163_v17 = vadd.f32 %v5546_v34, %v5602_v5 }
0x152a   :  { %v5093_v23 = vpop.eup %5092 }
0x152b   :  { %v1012_v27 = vmul.f32 %v5093_v23, %v5556_v46 }
0x158e   :  { %v1287_v21 = vpop.permute.xlu0 %1286 }
0x158f   :  { %v1289_v22 = vmul.f32 %v5085_v9, %v1287_v21 }
0x1591   :  { %1291 = vrot.lane.b32.xlu1 %v1289_v22, %s5284_s3 }
0x1592   :  { %v1015_v24 = vpop.permute.xlu0 %1014 }
0x1593   :  { %v1017_v25 = vmul.f32 %v5093_v23, %v1015_v24 }
0x1595   :  { %1019 = vrot.lane.b32.xlu0 %v1017_v25, %s5284_s3 }
0x1603   :  { %v1292_v26 = vpop.permute.xlu1 %1291 }
0x1604   :  { %1294 = vst.msk [vmem:[#allocation3] sm:$0xff] %vm209_vm2, %v1292_v26  ;;  %4502 = vmatmul.mubr.msk.f32.vlgmr.msra.gmra.mrb[12].mxu1 %vm209_vm2, %v1292_v26 }
0x1605   :  { %4873 = vmatpush3.bf16.msra.mxu1 %v5566_v50  ;;  %4523 = vmatprep.mubr.msk.f32.mxu1 %vm5281_vm1, %v5282_v4 }
0x1606   :  { %4874 = vmatprep.subr.bf16.mxu1 %v5280_v0 }
0x1607   :  { %v1020_v28 = vpop.permute.xlu0 %1019 }
0x1608   :  { %v1022_v29 = vadd.f32 %v1020_v28, %v1012_v27 }
0x1609   :  { %4876 = vmatpush3.bf16.msra.mxu1 %v5576_v53 }
0x160a   :  { %5094 = vtanh.f32 %v1022_v29  ;;  %4883 = vmatprep.subr.bf16.mxu1 %v5280_v0 }
0x1614   :  { %v5095_v30 = vpop.eup %5094 }
0x1615   :  { %1025 = vrot.lane.b32.xlu0 %v5095_v30, %s5283_s17 }
0x1687   :  { %v1026_v31 = vpop.permute.xlu0 %1025 }
0x1688   :  { %v1028_v33 = vmul.f32 %v5093_v23, %v1026_v31 }
0x168a   :  { %1030 = vrot.lane.b32.xlu0 %v1028_v33, %s5284_s3 }
0x16d7   :  { %v1364_v39 = vpop.f32.mrb[12].mxu1 }
0x16d8   :  { %v1368_v60 = vadd.f32 %v1364_v39, %v1153_v35  ;;  %v4503_v40 = vpop.f32.mrb[13].mxu1  ;;  %v1168_v39 = vadd.f32 %v5602_v5, %v5553_v38 }
0x16da   :  { %5096 = vtanh.f32 %v1368_v60  ;;  %v4087_v44 = vmul.f32 -1.442695, %v1368_v60 }
0x16dc   :  { %5098 = vpow2.f32 %v4087_v44 }
0x16e4   :  { %v5097_v41 = vpop.eup %5096 }
0x16e5   :  { %1378 = vrot.lane.b32.xlu1 %v5097_v41, %s5283_s17 }
0x16e6   :  { %v5099_v45 = vpop.eup %5098 }
0x16e7   :  { %v1372_v32 = vadd.f32 1.0, %v5099_v45 }
0x16e9   :  { %5100 = vrcp.f32 %v1372_v32 }
0x16f3   :  { %v5101_v46 = vpop.eup %5100 }
0x16f4   :  { %v1376_v49 = vmul.f32 %v5101_v46, %v1283_v15 }
0x16fc   :  { %v1031_v42 = vpop.permute.xlu0 %1030 }
0x16fd   :  { %1033 = vst.msk [vmem:[#allocation3 + $0x38] sm:$0xff] %vm209_vm2, %v1031_v42 }
0x1704   :  { %v1050_v43 = vld [vmem:[#allocation3 + $0x38] sm:$0xff] }
0x1705   :  { %4480 = vmatmul.mubr.msk.f32.gmra.mrb[20].mxu0 %vm209_vm2, %v1050_v43 }
0x1706   :  { %4512 = vmatprep.mubr.msk.f32.mxu0 %vm5281_vm1, %v5282_v4 }
0x1757   :  { %v1379_v47 = vpop.permute.xlu1 %1378 }
0x1758   :  { %v1381_v48 = vmul.f32 %v5101_v46, %v1379_v47 }
0x175a   :  { %1383 = vrot.lane.b32.xlu1 %v1381_v48, %s5284_s3 }
0x17cc   :  { %v1384_v51 = vpop.permute.xlu1 %1383 }
0x17cd   :  { %v1386_v52 = vadd.f32 %v1384_v51, %v1376_v49 }
0x17cf   :  { %5102 = vtanh.f32 %v1386_v52 }
0x17d8   :  { %v5630_v54 = vpop.f32.mrb[20].mxu0 }
0x17d9   :  { %v5103_v55 = vpop.eup %5102  ;;  %v5632_v56 = vpop.f32.mrb[21].mxu0 }
0x17da   :  { %1389 = vrot.lane.b32.xlu1 %v5103_v55, %s5283_s17 }
0x184c   :  { %v1390_v58 = vpop.permute.xlu1 %1389 }
0x184d   :  { %v1392_v61 = vmul.f32 %v5101_v46, %v1390_v58 }
0x184f   :  { %1394 = vrot.lane.b32.xlu1 %v1392_v61, %s5284_s3  ;;  %v1173_v61 = vadd.f32 %v5551_v37, %v5602_v5 }
0x18c1   :  { %v1395_v62 = vpop.permute.xlu1 %1394 }
0x18c2   :  { %1397 = vst.msk [vmem:[#allocation3 + $0x8] sm:$0xff] %vm209_vm2, %v1395_v62  ;;  %4513 = vmatmul.mubr.msk.f32.vlgmr.msra.gmra.mrb[22].mxu0 %vm209_vm2, %v1395_v62 }
0x18c3   :  { %4879 = vmatpush3.bf16.msra.mxu0 %v5566_v50  ;;  %4534 = vmatprep.mubr.msk.f32.mxu0 %vm5281_vm1, %v5282_v4 }
0x18c4   :  { %4880 = vmatprep.subr.bf16.mxu0 %v5280_v0 }
0x18c7   :  { %4882 = vmatpush3.bf16.msra.mxu0 %v5576_v53 }
0x18c8   :  { %4889 = vmatprep.subr.bf16.mxu0 %v5280_v0 }
0x1995   :  { %v1467_v1 = vpop.f32.mrb[22].mxu0 }
0x1996   :  { %v1471_v2 = vadd.f32 %v1467_v1, %v1158_v63  ;;  %v4514_v3 = vpop.f32.mrb[23].mxu0 }
0x1998   :  { %5104 = vtanh.f32 %v1471_v2  ;;  %v4089_v7 = vmul.f32 -1.442695, %v1471_v2 }
0x199a   :  { %5106 = vpow2.f32 %v4089_v7 }
0x19a2   :  { %v5105_v6 = vpop.eup %5104 }
0x19a3   :  { %1481 = vrot.lane.b32.xlu0 %v5105_v6, %s5283_s17 }
0x19a4   :  { %v5107_v10 = vpop.eup %5106 }
0x19a5   :  { %v1475_v8 = vadd.f32 1.0, %v5107_v10 }
0x19a7   :  { %5108 = vrcp.f32 %v1475_v8 }
0x19b1   :  { %v5109_v12 = vpop.eup %5108 }
0x19b2   :  { %v1479_v57 = vmul.f32 %v5109_v12, %v1386_v52 }
0x1a15   :  { %v1482_v59 = vpop.permute.xlu0 %1481 }
0x1a16   :  { %v1484_v9 = vmul.f32 %v5109_v12, %v1482_v59  ;;  %v2016_v59 = vld [vmem:[%s6069_s7] sm:$0xff] }
0x1a18   :  { %1486 = vrot.lane.b32.xlu1 %v1484_v9, %s5284_s3  ;;  %v2017_v9 = vld [vmem:[%s6069_s7 + $0x8] sm:$0xff] }
0x1a8a   :  { %v1487_v11 = vpop.permute.xlu1 %1486 }
0x1a8b   :  { %v1489_v36 = vadd.f32 %v1487_v11, %v1479_v57  ;;  %v4901_v57 = vpack.c.bf16 %v2017_v9, %v2016_v59 }
0x1a8d   :  { %5110 = vtanh.f32 %v1489_v36 }
0x1a97   :  { %v5111_v13 = vpop.eup %5110 }
0x1a98   :  { %1492 = vrot.lane.b32.xlu0 %v5111_v13, %s5283_s17 }
0x1b0a   :  { %v1493_v14 = vpop.permute.xlu0 %1492 }
0x1b0b   :  { %v1495_v15 = vmul.f32 %v5109_v12, %v1493_v14  ;;  %v2018_v14 = vld [vmem:[%s6069_s7 + $0x10] sm:$0xff] }
0x1b0d   :  { %1497 = vrot.lane.b32.xlu1 %v1495_v15, %s5284_s3  ;;  %v2019_v15 = vld [vmem:[%s6069_s7 + $0x18] sm:$0xff] }
0x1b7f   :  { %v1498_v16 = vpop.permute.xlu1 %1497 }
0x1b80   :  { %1500 = vst.msk [vmem:[#allocation3 + $0x10] sm:$0xff] %vm209_vm2, %v1498_v16  ;;  %4524 = vmatmul.mubr.msk.f32.vlgmr.msra.gmra.mrb[14].mxu1 %vm209_vm2, %v1498_v16  ;;  %v4905_v16 = vpack.c.bf16 %v2019_v15, %v2018_v14 }
0x1b81   :  { %4885 = vmatpush3.bf16.msra.mxu1 %v5566_v50  ;;  %4545 = vmatprep.mubr.msk.f32.mxu1 %vm5281_vm1, %v5282_v4 }
0x1b82   :  { %4886 = vmatprep.subr.bf16.mxu1 %v5280_v0 }
0x1b85   :  { %4888 = vmatpush3.bf16.msra.mxu1 %v5576_v53 }
0x1b86   :  { %4895 = vmatprep.subr.bf16.mxu1 %v5280_v0 }
0x1c53   :  { %v1570_v18 = vpop.f32.mrb[14].mxu1 }
0x1c54   :  { %v1574_v19 = vadd.f32 %v1570_v18, %v1163_v17  ;;  %v4525_v20 = vpop.f32.mrb[15].mxu1  ;;  %v2025_v18 = vld [vmem:[#allocation3] sm:$0xff] }
0x1c55   :  { %v2027_v20 = vld [vmem:[#allocation3 + $0x10] sm:$0xff] }
0x1c56   :  { %5112 = vtanh.f32 %v1574_v19  ;;  %v4091_v22 = vmul.f32 -1.442695, %v1574_v19  ;;  %v2026_v19 = vld [vmem:[#allocation3 + $0x8] sm:$0xff] }
0x1c58   :  { %5114 = vpow2.f32 %v4091_v22 }
0x1c60   :  { %v5113_v21 = vpop.eup %5112 }
0x1c61   :  { %1584 = vrot.lane.b32.xlu0 %v5113_v21, %s5283_s17 }
0x1c62   :  { %v5115_v23 = vpop.eup %5114 }
0x1c63   :  { %v1578_v24 = vadd.f32 1.0, %v5115_v23 }
0x1c65   :  { %5116 = vrcp.f32 %v1578_v24  ;;  %v1178_v24 = vadd.f32 %v5602_v5, %v5632_v56 }
0x1c6f   :  { %v5117_v25 = vpop.eup %5116 }
0x1c70   :  { %v1582_v28 = vmul.f32 %v5117_v25, %v1489_v36 }
0x1cd3   :  { %v1585_v26 = vpop.permute.xlu0 %1584 }
0x1cd4   :  { %v1587_v27 = vmul.f32 %v5117_v25, %v1585_v26 }
0x1cd6   :  { %1589 = vrot.lane.b32.xlu1 %v1587_v27, %s5284_s3 }
0x1d48   :  { %v1590_v29 = vpop.permute.xlu1 %1589 }
0x1d49   :  { %v1592_v34 = vadd.f32 %v1590_v29, %v1582_v28 }
0x1d4b   :  { %5118 = vtanh.f32 %v1592_v34 }
0x1d55   :  { %v5119_v30 = vpop.eup %5118 }
0x1d56   :  { %1595 = vrot.lane.b32.xlu0 %v5119_v30, %s5283_s17 }
0x1dc8   :  { %v1596_v31 = vpop.permute.xlu0 %1595 }
0x1dc9   :  { %v1598_v33 = vmul.f32 %v5117_v25, %v1596_v31 }
0x1dcb   :  { %1600 = vrot.lane.b32.xlu1 %v1598_v33, %s5284_s3 }
0x1e3d   :  { %v1601_v35 = vpop.permute.xlu1 %1600 }
0x1e3e   :  { %1603 = vst.msk [vmem:[#allocation3 + $0x18] sm:$0xff] %vm209_vm2, %v1601_v35  ;;  %4535 = vmatmul.mubr.msk.f32.vlgmr.msra.gmra.mrb[24].mxu0 %vm209_vm2, %v1601_v35 }
0x1e3f   :  { %4891 = vmatpush3.bf16.msra.mxu0 %v5566_v50  ;;  %4556 = vmatprep.mubr.msk.f32.mxu0 %vm5281_vm1, %v5282_v4 }
0x1e40   :  { %4892 = vmatprep.subr.bf16.mxu0 %v5280_v0 }
0x1e43   :  { %4894 = vmatpush3.bf16.msra.mxu0 %v5576_v53 }
0x1e44   :  { %4902 = vmatprep.subr.bf16.mxu0 %v4901_v57 }
0x1e45   :  { %v2028_v21 = vld [vmem:[#allocation3 + $0x18] sm:$0xff] }
0x1f11   :  { %v1673_v60 = vpop.f32.mrb[24].mxu0 }
0x1f12   :  { %v1677_v40 = vadd.f32 %v1673_v60, %v1168_v39  ;;  %v4536_v41 = vpop.f32.mrb[25].mxu0 }
0x1f14   :  { %5120 = vtanh.f32 %v1677_v40  ;;  %v4093_v43 = vmul.f32 -1.442695, %v1677_v40 }
0x1f16   :  { %5122 = vpow2.f32 %v4093_v43 }
0x1f1e   :  { %v5121_v42 = vpop.eup %5120 }
0x1f1f   :  { %1687 = vrot.lane.b32.xlu0 %v5121_v42, %s5283_s17 }
0x1f20   :  { %v5123_v44 = vpop.eup %5122 }
0x1f21   :  { %v1681_v45 = vadd.f32 1.0, %v5123_v44 }
0x1f23   :  { %5124 = vrcp.f32 %v1681_v45 }
0x1f2d   :  { %v5125_v32 = vpop.eup %5124 }
0x1f2e   :  { %v1685_v48 = vmul.f32 %v5125_v32, %v1592_v34 }
0x1f91   :  { %v1688_v46 = vpop.permute.xlu0 %1687 }
0x1f92   :  { %v1690_v47 = vmul.f32 %v5125_v32, %v1688_v46  ;;  %v2020_v46 = vld [vmem:[%s6070_s8] sm:$0xff] }
0x1f94   :  { %1692 = vrot.lane.b32.xlu1 %v1690_v47, %s5284_s3  ;;  %v2021_v47 = vld [vmem:[%s6070_s8 + $0x8] sm:$0xff] }
0x2006   :  { %v1693_v49 = vpop.permute.xlu1 %1692 }
0x2007   :  { %v1695_v38 = vadd.f32 %v1693_v49, %v1685_v48  ;;  %v5736_v48 = vpack.c.bf16 %v2021_v47, %v2020_v46  ;;  %v2022_v49 = vld [vmem:[%s6070_s8 + $0x10] sm:$0xff] }
0x2009   :  { %5126 = vtanh.f32 %v1695_v38 }
0x2013   :  { %v5127_v51 = vpop.eup %5126 }
0x2014   :  { %1698 = vrot.lane.b32.xlu0 %v5127_v51, %s5283_s17 }
0x2086   :  { %v1699_v52 = vpop.permute.xlu0 %1698 }
0x2087   :  { %v1701_v55 = vmul.f32 %v5125_v32, %v1699_v52 }
0x2089   :  { %1703 = vrot.lane.b32.xlu1 %v1701_v55, %s5284_s3 }
0x20fb   :  { %v1704_v58 = vpop.permute.xlu1 %1703 }
0x20fc   :  { %1706 = vst.msk [vmem:[#allocation3 + $0x20] sm:$0xff] %vm209_vm2, %v1704_v58  ;;  %4546 = vmatmul.mubr.msk.f32.vlgmr.msra.gmra.mrb[16].mxu1 %vm209_vm2, %v1704_v58 }
0x20fd   :  { %4897 = vmatpush3.bf16.msra.mxu1 %v5566_v50  ;;  %4567 = vmatprep.mubr.msk.f32.mxu1 %vm5281_vm1, %v5282_v4 }
0x20fe   :  { %4898 = vmatprep.subr.bf16.mxu1 %v5280_v0 }
0x2101   :  { %4900 = vmatpush3.bf16.msra.mxu1 %v5576_v53 }
0x2102   :  { %4909 = vmatprep.subr.bf16.mxu1 %v5280_v0 }
0x2103   :  { %v2029_v22 = vld [vmem:[#allocation3 + $0x20] sm:$0xff] }
0x21cf   :  { %v1776_v62 = vpop.f32.mrb[16].mxu1 }
0x21d0   :  { %v1780_v63 = vadd.f32 %v1776_v62, %v1173_v61  ;;  %v4547_v1 = vpop.f32.mrb[17].mxu1  ;;  %v1183_v62 = vadd.f32 %v5630_v54, %v5602_v5 }
0x21d2   :  { %5128 = vtanh.f32 %v1780_v63  ;;  %v4095_v50 = vmul.f32 -1.442695, %v1780_v63 }
0x21d4   :  { %5130 = vpow2.f32 %v4095_v50  ;;  %v5772_v50 = vld [vmem:[%s6071_s9] ss:$0 sm:$0xff] }
0x21dc   :  { %v5129_v2 = vpop.eup %5128 }
0x21dd   :  { %1790 = vrot.lane.b32.xlu0 %v5129_v2, %s5283_s17 }
0x21de   :  { %v5131_v3 = vpop.eup %5130 }
0x21df   :  { %v1784_v6 = vadd.f32 1.0, %v5131_v3 }
0x21e1   :  { %5132 = vrcp.f32 %v1784_v6 }
0x21eb   :  { %v5133_v7 = vpop.eup %5132 }
0x21ec   :  { %v1788_v8 = vmul.f32 %v5133_v7, %v1695_v38  ;;  %v2023_v38 = vld [vmem:[%s6070_s8 + $0x18] sm:$0xff] }
0x21ed   :  { %v5746_v51 = vpack.c.bf16 %v2023_v38, %v2022_v49 }
0x224f   :  { %v1791_v10 = vpop.permute.xlu0 %1790 }
0x2250   :  { %v1793_v53 = vmul.f32 %v5133_v7, %v1791_v10 }
0x2252   :  { %1795 = vrot.lane.b32.xlu1 %v1793_v53, %s5284_s3 }
0x22c4   :  { %v1796_v12 = vpop.permute.xlu1 %1795 }
0x22c5   :  { %v1798_v37 = vadd.f32 %v1796_v12, %v1788_v8 }
0x22c7   :  { %5134 = vtanh.f32 %v1798_v37 }
0x22d1   :  { %v5135_v11 = vpop.eup %5134 }
0x22d2   :  { %1801 = vrot.lane.b32.xlu0 %v5135_v11, %s5283_s17 }
0x2344   :  { %v1802_v36 = vpop.permute.xlu0 %1801 }
0x2345   :  { %v1804_v13 = vmul.f32 %v5133_v7, %v1802_v36 }
0x2347   :  { %1806 = vrot.lane.b32.xlu1 %v1804_v13, %s5284_s3 }
0x23b9   :  { %v1807_v17 = vpop.permute.xlu1 %1806 }
0x23ba   :  { %1809 = vst.msk [vmem:[#allocation3 + $0x28] sm:$0xff] %vm209_vm2, %v1807_v17  ;;  %4557 = vmatmul.mubr.msk.f32.vlgmr.msra.gmra.mrb[26].mxu0 %vm209_vm2, %v1807_v17 }
0x23bb   :  { %4904 = vmatpush3.bf16.msra.mxu0 %v4901_v57  ;;  %4578 = vmatprep.mubr.msk.f32.mxu0 %vm209_vm2, %v2025_v18 }
0x23bc   :  { %4906 = vmatprep.subr.bf16.mxu0 %v4905_v16 }
0x23bf   :  { %4908 = vmatpush3.bf16.msra.mxu0 %v4905_v16 }
0x23c0   :  { %4921 = vmatprep.subr.bf16.mxu0 %v5280_v0 }
0x23c1   :  { %v2030_v23 = vld [vmem:[#allocation3 + $0x28] sm:$0xff] }
0x23c2   :  { %4579 = vmatmul.mubr.msk.f32.vlgmr.msra.gmra.mrb[28].mxu0 %vm209_vm2, %v2026_v19 }
0x23c3   :  { %4581 = vmatprep.mubr.msk.f32.mxu0 %vm209_vm2, %v2027_v20  ;;  %4923 = vmatpush3.bf16.msra.mxu0 %v5736_v48 }
0x23c4   :  { %4924 = vmatprep.subr.bf16.mxu0 %v5280_v0 }
0x23c6   :  { %4582 = vmatmul.mubr.msk.f32.gmra.mrb[30].mxu0 %vm209_vm2, %v2028_v21 }
0x23c7   :  { %4584 = vmatprep.mubr.msk.f32.mxu0 %vm209_vm2, %v2029_v22  ;;  %4926 = vmatpush3.bf16.msra.mxu0 %v5746_v51 }
0x23c8   :  { %4933 = vmatprep.subr.bf16.mxu0 %v5280_v0 }
0x23ca   :  { %4585 = vmatmul.mubr.msk.f32.gmra.mrb[32].mxu0 %vm209_vm2, %v2030_v23 }
0x248d   :  { %v1879_v25 = vpop.f32.mrb[26].mxu0 }
0x248e   :  { %v1883_v26 = vadd.f32 %v1879_v25, %v1178_v24  ;;  %v4558_v27 = vpop.f32.mrb[27].mxu0 }
0x2490   :  { %5136 = vtanh.f32 %v1883_v26  ;;  %v4097_v39 = vmul.f32 -1.442695, %v1883_v26 }
0x2492   :  { %5138 = vpow2.f32 %v4097_v39 }
0x2495   :  { %v5714_v28 = vpop.f32.mrb[28].mxu0 }
0x2496   :  { %v2129_v29 = vpop.f32.mrb[29].mxu0 }
0x2497   :  { %v2130_v3 = vadd.f32 %v5772_v50, %v2129_v29 }
0x2499   :  { %v5716_v34 = vpop.f32.mrb[30].mxu0 }
0x249a   :  { %v5137_v30 = vpop.eup %5136  ;;  %v5718_v31 = vpop.f32.mrb[31].mxu0 }
0x249b   :  { %1893 = vrot.lane.b32.xlu0 %v5137_v30, %s5283_s17  ;;  %v2135_v30 = vadd.f32 %v5714_v28, %v5772_v50 }
0x249c   :  { %v5139_v56 = vpop.eup %5138 }
0x249d   :  { %v5721_v33 = vpop.f32.mrb[32].mxu0  ;;  %v1887_v60 = vadd.f32 1.0, %v5139_v56 }
0x249e   :  { %v5723_v35 = vpop.f32.mrb[33].mxu0 }
0x249f   :  { %5140 = vrcp.f32 %v1887_v60 }
0x24a9   :  { %v5141_v40 = vpop.eup %5140 }
0x24aa   :  { %v1891_v43 = vmul.f32 %v5141_v40, %v1798_v37 }
0x250d   :  { %v1894_v41 = vpop.permute.xlu0 %1893 }
0x250e   :  { %v1896_v42 = vmul.f32 %v5141_v40, %v1894_v41 }
0x2510   :  { %1898 = vrot.lane.b32.xlu1 %v1896_v42, %s5284_s3 }
0x2582   :  { %v1899_v44 = vpop.permute.xlu1 %1898 }
0x2583   :  { %v5726_v45 = vadd.f32 %v1899_v44, %v1891_v43 }
0x2585   :  { %5142 = vtanh.f32 %v5726_v45 }
0x258f   :  { %v5143_v32 = vpop.eup %5142 }
0x2590   :  { %1904 = vrot.lane.b32.xlu0 %v5143_v32, %s5283_s17 }
0x2602   :  { %v1905_v52 = vpop.permute.xlu0 %1904 }
0x2603   :  { %v1907_v55 = vmul.f32 %v5141_v40, %v1905_v52 }
0x2605   :  { %1909 = vrot.lane.b32.xlu1 %v1907_v55, %s5284_s3 }
0x2677   :  { %v1910_v58 = vpop.permute.xlu1 %1909 }
0x2678   :  { %1912 = vst.msk [vmem:[#allocation3 + $0x30] sm:$0xff] %vm209_vm2, %v1910_v58  ;;  %4568 = vmatmul.mubr.msk.f32.vlgmr.msra.gmra.mrb[18].mxu1 %vm209_vm2, %v1910_v58 }
0x2679   :  { %4911 = vmatpush3.bf16.msra.mxu1 %v5736_v48  ;;  %4598 = vmatprep.mubr.msk.f32.mxu1 %vm5281_vm1, %v5282_v4 }
0x267a   :  { %4912 = vmatprep.subr.bf16.mxu1 %v5280_v0 }
0x267d   :  { %4914 = vmatpush3.bf16.msra.mxu1 %v5746_v51 }
0x267e   :  { %4915 = vmatprep.subr.bf16.mxu1 %v5280_v0 }
0x267f   :  { %v2031_v61 = vld [vmem:[#allocation3 + $0x30] sm:$0xff] }
0x2680   :  { %4599 = vmatmul.mubr.f32.vlgmr.msra.gmra.mrb[20].mxu1 %v5282_v4  ;;  %4587 = vmatprep.mubr.msk.f32.mxu0 %vm209_vm2, %v2031_v61 }
0x2681   :  { %4917 = vmatpush3.bf16.msra.mxu1 %v5736_v48  ;;  %4609 = vmatprep.mubr.msk.f32.mxu1 %vm5281_vm1, %v5282_v4 }
0x2682   :  { %4918 = vmatprep.subr.bf16.mxu1 %v5280_v0 }
0x2685   :  { %4920 = vmatpush3.bf16.msra.mxu1 %v5746_v51 }
0x2686   :  { %4927 = vmatprep.subr.bf16.mxu1 %v5280_v0 }
0x274b   :  { %v1982_v63 = vpop.f32.mrb[18].mxu1 }
0x274c   :  { %v1986_v1 = vadd.f32 %v1982_v63, %v1183_v62  ;;  %v4569_v2 = vpop.f32.mrb[19].mxu1 }
0x274e   :  { %v4099_v14 = vmul.f32 -1.442695, %v1986_v1 }
0x2753   :  { %v2243_v6 = vpop.f32.mrb[20].mxu1 }
0x2754   :  { %v2247_v7 = vadd.f32 %v2243_v6, %v2130_v3  ;;  %v4600_v10 = vpop.f32.mrb[21].mxu1 }
0x2756   :  { %5144 = vtanh.f32 %v2247_v7  ;;  %v4109_v8 = vmul.f32 -1.442695, %v2247_v7 }
0x2758   :  { %5146 = vpow2.f32 %v4109_v8 }
0x2760   :  { %v5145_v53 = vpop.eup %5144 }
0x2761   :  { %2257 = vrot.lane.b32.xlu0 %v5145_v53, %s5283_s17 }
0x2762   :  { %v5147_v5 = vpop.eup %5146 }
0x2763   :  { %v2251_v54 = vadd.f32 1.0, %v5147_v5 }
0x2765   :  { %5148 = vrcp.f32 %v2251_v54 }
0x276f   :  { %v5149_v12 = vpop.eup %5148 }
0x2770   :  { %v2255_v9 = vmul.f32 0.0, %v5149_v12 }
0x27d3   :  { %v2258_v37 = vpop.permute.xlu0 %2257 }
0x27d4   :  { %v2260_v59 = vmul.f32 %v5149_v12, %v2258_v37 }
0x27d6   :  { %2262 = vrot.lane.b32.xlu1 %v2260_v59, %s5284_s3 }
0x2848   :  { %v2263_v57 = vpop.permute.xlu1 %2262 }
0x2849   :  { %v2265_v11 = vadd.f32 %v2263_v57, %v2255_v9 }
0x284b   :  { %5150 = vtanh.f32 %v2265_v11 }
0x284c   :  { %5152 = vtanh.f32 %v1986_v1  ;;  %v2140_v1 = vadd.f32 %v5772_v50, %v5718_v31 }
0x284d   :  { %5154 = vpow2.f32 %v4099_v14 }
0x2855   :  { %v5151_v36 = vpop.eup %5150 }
0x2856   :  { %2268 = vrot.lane.b32.xlu0 %v5151_v36, %s5283_s17  ;;  %v5153_v13 = vpop.eup %5152 }
0x2857   :  { %v5155_v15 = vpop.eup %5154 }
0x2858   :  { %v1990_v16 = vadd.f32 1.0, %v5155_v15 }
0x285a   :  { %1996 = vrot.lane.b32.xlu0 %v5153_v13, %s5283_s17  ;;  %5156 = vrcp.f32 %v1990_v16  ;;  %v2145_v13 = vadd.f32 %v5716_v34, %v5772_v50 }
0x2864   :  { %v5157_v19 = vpop.eup %5156 }
0x2865   :  { %v1994_v23 = vmul.f32 %v5157_v19, %v5726_v45 }
0x28c8   :  { %v2269_v17 = vpop.permute.xlu0 %2268 }
0x28c9   :  { %v2271_v18 = vmul.f32 %v5149_v12, %v2269_v17 }
0x28cb   :  { %2273 = vrot.lane.b32.xlu1 %v2271_v18, %s5284_s3 }
0x28cc   :  { %v1997_v20 = vpop.permute.xlu0 %1996 }
0x28cd   :  { %v1999_v21 = vmul.f32 %v5157_v19, %v1997_v20 }
0x28cf   :  { %2001 = vrot.lane.b32.xlu0 %v1999_v21, %s5284_s3 }
0x293d   :  { %v2274_v22 = vpop.permute.xlu1 %2273 }
0x293e   :  { %2276 = vst.msk [vmem:[#allocation3] sm:$0xff] %vm209_vm2, %v2274_v22  ;;  %4610 = vmatmul.mubr.msk.f32.vlgmr.msra.gmra.mrb[22].mxu1 %vm209_vm2, %v2274_v22 }
0x293f   :  { %4929 = vmatpush3.bf16.msra.mxu1 %v5736_v48  ;;  %4631 = vmatprep.mubr.msk.f32.mxu1 %vm5281_vm1, %v5282_v4 }
0x2940   :  { %4930 = vmatprep.subr.bf16.mxu1 %v5280_v0 }
0x2941   :  { %v2002_v24 = vpop.permute.xlu0 %2001 }
0x2942   :  { %v2004_v25 = vadd.f32 %v2002_v24, %v1994_v23 }
0x2943   :  { %4932 = vmatpush3.bf16.msra.mxu1 %v5746_v51 }
0x2944   :  { %5158 = vtanh.f32 %v2004_v25  ;;  %4939 = vmatprep.subr.bf16.mxu1 %v5280_v0 }
0x294e   :  { %v5159_v26 = vpop.eup %5158 }
0x294f   :  { %2007 = vrot.lane.b32.xlu0 %v5159_v26, %s5283_s17 }
0x29c1   :  { %v2008_v27 = vpop.permute.xlu0 %2007 }
0x29c2   :  { %v2010_v29 = vmul.f32 %v5157_v19, %v2008_v27 }
0x29c4   :  { %2012 = vrot.lane.b32.xlu0 %v2010_v29, %s5284_s3 }
0x2a11   :  { %v2346_v39 = vpop.f32.mrb[22].mxu1 }
0x2a12   :  { %v2350_v56 = vadd.f32 %v2346_v39, %v2135_v30  ;;  %v4611_v60 = vpop.f32.mrb[23].mxu1  ;;  %v2150_v39 = vadd.f32 %v5772_v50, %v5723_v35 }
0x2a14   :  { %5160 = vtanh.f32 %v2350_v56  ;;  %v4111_v43 = vmul.f32 -1.442695, %v2350_v56 }
0x2a16   :  { %5162 = vpow2.f32 %v4111_v43 }
0x2a1e   :  { %v5161_v40 = vpop.eup %5160 }
0x2a1f   :  { %2360 = vrot.lane.b32.xlu1 %v5161_v40, %s5283_s17 }
0x2a20   :  { %v5163_v44 = vpop.eup %5162 }
0x2a21   :  { %v2354_v28 = vadd.f32 1.0, %v5163_v44 }
0x2a23   :  { %5164 = vrcp.f32 %v2354_v28 }
0x2a2d   :  { %v5165_v45 = vpop.eup %5164 }
0x2a2e   :  { %v2358_v47 = vmul.f32 %v5165_v45, %v2265_v11 }
0x2a36   :  { %v2013_v41 = vpop.permute.xlu0 %2012 }
0x2a37   :  { %2015 = vst.msk [vmem:[#allocation3 + $0x38] sm:$0xff] %vm209_vm2, %v2013_v41 }
0x2a3e   :  { %v2032_v42 = vld [vmem:[#allocation3 + $0x38] sm:$0xff] }
0x2a3f   :  { %4588 = vmatmul.mubr.msk.f32.gmra.mrb[34].mxu0 %vm209_vm2, %v2032_v42 }
0x2a40   :  { %4620 = vmatprep.mubr.msk.f32.mxu0 %vm5281_vm1, %v5282_v4 }
0x2a91   :  { %v2361_v32 = vpop.permute.xlu1 %2360 }
0x2a92   :  { %v2363_v46 = vmul.f32 %v5165_v45, %v2361_v32 }
0x2a94   :  { %2365 = vrot.lane.b32.xlu1 %v2363_v46, %s5284_s3 }
0x2b06   :  { %v2366_v49 = vpop.permute.xlu1 %2365 }
0x2b07   :  { %v2368_v38 = vadd.f32 %v2366_v49, %v2358_v47 }
0x2b09   :  { %5166 = vtanh.f32 %v2368_v38 }
0x2b12   :  { %v5800_v52 = vpop.f32.mrb[34].mxu0 }
0x2b13   :  { %v5167_v55 = vpop.eup %5166  ;;  %v5802_v58 = vpop.f32.mrb[35].mxu0 }
0x2b14   :  { %2371 = vrot.lane.b32.xlu1 %v5167_v55, %s5283_s17 }
0x2b86   :  { %v2372_v61 = vpop.permute.xlu1 %2371 }
0x2b87   :  { %v2374_v62 = vmul.f32 %v5165_v45, %v2372_v61 }
0x2b89   :  { %2376 = vrot.lane.b32.xlu1 %v2374_v62, %s5284_s3  ;;  %v2155_v62 = vadd.f32 %v5721_v33, %v5772_v50 }
0x2bfb   :  { %v2377_v63 = vpop.permute.xlu1 %2376 }
0x2bfc   :  { %2379 = vst.msk [vmem:[#allocation3 + $0x8] sm:$0xff] %vm209_vm2, %v2377_v63  ;;  %4621 = vmatmul.mubr.msk.f32.vlgmr.msra.gmra.mrb[36].mxu0 %vm209_vm2, %v2377_v63 }
0x2bfd   :  { %4935 = vmatpush3.bf16.msra.mxu0 %v5736_v48  ;;  %4642 = vmatprep.mubr.msk.f32.mxu0 %vm5281_vm1, %v5282_v4 }
0x2bfe   :  { %4936 = vmatprep.subr.bf16.mxu0 %v5280_v0 }
0x2c01   :  { %4938 = vmatpush3.bf16.msra.mxu0 %v5746_v51 }
0x2c02   :  { %4945 = vmatprep.subr.bf16.mxu0 %v5280_v0 }
0x2ccf   :  { %v2449_v2 = vpop.f32.mrb[36].mxu0 }
0x2cd0   :  { %v2453_v3 = vadd.f32 %v2449_v2, %v2140_v1  ;;  %v4622_v6 = vpop.f32.mrb[37].mxu0 }
0x2cd2   :  { %5168 = vtanh.f32 %v2453_v3  ;;  %v4113_v10 = vmul.f32 -1.442695, %v2453_v3 }
0x2cd4   :  { %5170 = vpow2.f32 %v4113_v10 }
0x2cdc   :  { %v5169_v7 = vpop.eup %5168 }
0x2cdd   :  { %2463 = vrot.lane.b32.xlu0 %v5169_v7, %s5283_s17 }
0x2cde   :  { %v5171_v53 = vpop.eup %5170 }
0x2cdf   :  { %v2457_v8 = vadd.f32 1.0, %v5171_v53 }
0x2ce1   :  { %5172 = vrcp.f32 %v2457_v8 }
0x2ceb   :  { %v5173_v5 = vpop.eup %5172 }
0x2cec   :  { %v2461_v37 = vmul.f32 %v5173_v5, %v2368_v38 }
0x2d4f   :  { %v2464_v54 = vpop.permute.xlu0 %2463 }
0x2d50   :  { %v2466_v12 = vmul.f32 %v5173_v5, %v2464_v54  ;;  %v2998_v54 = vld [vmem:[%s6072_s10] sm:$0xff] }
0x2d52   :  { %2468 = vrot.lane.b32.xlu1 %v2466_v12, %s5284_s3  ;;  %v2999_v12 = vld [vmem:[%s6072_s10 + $0x8] sm:$0xff] }
0x2dc4   :  { %v2469_v59 = vpop.permute.xlu1 %2468 }
0x2dc5   :  { %v2471_v31 = vadd.f32 %v2469_v59, %v2461_v37  ;;  %v4957_v37 = vpack.c.bf16 %v2999_v12, %v2998_v54 }
0x2dc7   :  { %5174 = vtanh.f32 %v2471_v31 }
0x2dd1   :  { %v5175_v9 = vpop.eup %5174 }
0x2dd2   :  { %2474 = vrot.lane.b32.xlu0 %v5175_v9, %s5283_s17 }
0x2e44   :  { %v2475_v57 = vpop.permute.xlu0 %2474 }
0x2e45   :  { %v2477_v11 = vmul.f32 %v5173_v5, %v2475_v57  ;;  %v3000_v57 = vld [vmem:[%s6072_s10 + $0x10] sm:$0xff] }
0x2e47   :  { %2479 = vrot.lane.b32.xlu1 %v2477_v11, %s5284_s3  ;;  %v3001_v11 = vld [vmem:[%s6072_s10 + $0x18] sm:$0xff] }
0x2eb9   :  { %v2480_v36 = vpop.permute.xlu1 %2479 }
0x2eba   :  { %2482 = vst.msk [vmem:[#allocation3 + $0x10] sm:$0xff] %vm209_vm2, %v2480_v36  ;;  %4632 = vmatmul.mubr.msk.f32.vlgmr.msra.gmra.mrb[24].mxu1 %vm209_vm2, %v2480_v36  ;;  %v4961_v36 = vpack.c.bf16 %v3001_v11, %v3000_v57 }
0x2ebb   :  { %4941 = vmatpush3.bf16.msra.mxu1 %v5736_v48  ;;  %4653 = vmatprep.mubr.msk.f32.mxu1 %vm5281_vm1, %v5282_v4 }
0x2ebc   :  { %4942 = vmatprep.subr.bf16.mxu1 %v5280_v0 }
0x2ebf   :  { %4944 = vmatpush3.bf16.msra.mxu1 %v5746_v51 }
0x2ec0   :  { %4951 = vmatprep.subr.bf16.mxu1 %v5280_v0 }
0x2f8d   :  { %v2552_v14 = vpop.f32.mrb[24].mxu1 }
0x2f8e   :  { %v2556_v15 = vadd.f32 %v2552_v14, %v2145_v13  ;;  %v4633_v16 = vpop.f32.mrb[25].mxu1  ;;  %v3007_v14 = vld [vmem:[#allocation3] sm:$0xff] }
0x2f8f   :  { %v3009_v16 = vld [vmem:[#allocation3 + $0x10] sm:$0xff] }
0x2f90   :  { %5176 = vtanh.f32 %v2556_v15  ;;  %v4115_v18 = vmul.f32 -1.442695, %v2556_v15  ;;  %v3008_v15 = vld [vmem:[#allocation3 + $0x8] sm:$0xff] }
0x2f92   :  { %5178 = vpow2.f32 %v4115_v18 }
0x2f9a   :  { %v5177_v17 = vpop.eup %5176 }
0x2f9b   :  { %2566 = vrot.lane.b32.xlu0 %v5177_v17, %s5283_s17 }
0x2f9c   :  { %v5179_v19 = vpop.eup %5178 }
0x2f9d   :  { %v2560_v20 = vadd.f32 1.0, %v5179_v19 }
0x2f9f   :  { %5180 = vrcp.f32 %v2560_v20  ;;  %v2160_v20 = vadd.f32 %v5772_v50, %v5802_v58 }
0x2fa9   :  { %v5181_v21 = vpop.eup %5180 }
0x2faa   :  { %v2564_v24 = vmul.f32 %v5181_v21, %v2471_v31 }
0x300d   :  { %v2567_v22 = vpop.permute.xlu0 %2566 }
0x300e   :  { %v2569_v23 = vmul.f32 %v5181_v21, %v2567_v22 }
0x3010   :  { %2571 = vrot.lane.b32.xlu1 %v2569_v23, %s5284_s3 }
0x3082   :  { %v2572_v25 = vpop.permute.xlu1 %2571 }
0x3083   :  { %v2574_v34 = vadd.f32 %v2572_v25, %v2564_v24 }
0x3085   :  { %5182 = vtanh.f32 %v2574_v34 }
0x308f   :  { %v5183_v26 = vpop.eup %5182 }
0x3090   :  { %2577 = vrot.lane.b32.xlu0 %v5183_v26, %s5283_s17 }
0x3102   :  { %v2578_v27 = vpop.permute.xlu0 %2577 }
0x3103   :  { %v2580_v29 = vmul.f32 %v5181_v21, %v2578_v27 }
0x3105   :  { %2582 = vrot.lane.b32.xlu1 %v2580_v29, %s5284_s3 }
0x3177   :  { %v2583_v30 = vpop.permute.xlu1 %2582 }
0x3178   :  { %2585 = vst.msk [vmem:[#allocation3 + $0x18] sm:$0xff] %vm209_vm2, %v2583_v30  ;;  %4643 = vmatmul.mubr.msk.f32.vlgmr.msra.gmra.mrb[38].mxu0 %vm209_vm2, %v2583_v30 }
0x3179   :  { %4947 = vmatpush3.bf16.msra.mxu0 %v5736_v48  ;;  %4664 = vmatprep.mubr.msk.f32.mxu0 %vm5281_vm1, %v5282_v4 }
0x317a   :  { %4948 = vmatprep.subr.bf16.mxu0 %v5280_v0 }
0x317d   :  { %4950 = vmatpush3.bf16.msra.mxu0 %v5746_v51 }
0x317e   :  { %4958 = vmatprep.subr.bf16.mxu0 %v4957_v37 }
0x317f   :  { %v3010_v17 = vld [vmem:[#allocation3 + $0x18] sm:$0xff] }
0x324b   :  { %v2655_v56 = vpop.f32.mrb[38].mxu0 }
0x324c   :  { %v2659_v60 = vadd.f32 %v2655_v56, %v2150_v39  ;;  %v4644_v40 = vpop.f32.mrb[39].mxu0 }
0x324e   :  { %5184 = vtanh.f32 %v2659_v60  ;;  %v4117_v42 = vmul.f32 -1.442695, %v2659_v60 }
0x3250   :  { %5186 = vpow2.f32 %v4117_v42 }
0x3258   :  { %v5185_v41 = vpop.eup %5184 }
0x3259   :  { %2669 = vrot.lane.b32.xlu0 %v5185_v41, %s5283_s17 }
0x325a   :  { %v5187_v43 = vpop.eup %5186 }
0x325b   :  { %v2663_v44 = vadd.f32 1.0, %v5187_v43 }
0x325d   :  { %5188 = vrcp.f32 %v2663_v44 }
0x3267   :  { %v5189_v28 = vpop.eup %5188 }
0x3268   :  { %v2667_v46 = vmul.f32 %v5189_v28, %v2574_v34 }
0x32cb   :  { %v2670_v45 = vpop.permute.xlu0 %2669 }
0x32cc   :  { %v2672_v32 = vmul.f32 %v5189_v28, %v2670_v45  ;;  %v3002_v45 = vld [vmem:[%s6073_s11] sm:$0xff] }
0x32ce   :  { %2674 = vrot.lane.b32.xlu1 %v2672_v32, %s5284_s3  ;;  %v3003_v32 = vld [vmem:[%s6073_s11 + $0x8] sm:$0xff] }
0x3340   :  { %v2675_v47 = vpop.permute.xlu1 %2674 }
0x3341   :  { %v2677_v35 = vadd.f32 %v2675_v47, %v2667_v46  ;;  %v5906_v46 = vpack.c.bf16 %v3003_v32, %v3002_v45  ;;  %v3004_v47 = vld [vmem:[%s6073_s11 + $0x10] sm:$0xff] }
0x3343   :  { %5190 = vtanh.f32 %v2677_v35 }
0x334d   :  { %v5191_v49 = vpop.eup %5190 }
0x334e   :  { %2680 = vrot.lane.b32.xlu0 %v5191_v49, %s5283_s17 }
0x33c0   :  { %v2681_v38 = vpop.permute.xlu0 %2680 }
0x33c1   :  { %v2683_v55 = vmul.f32 %v5189_v28, %v2681_v38 }
0x33c3   :  { %2685 = vrot.lane.b32.xlu1 %v2683_v55, %s5284_s3 }
0x3435   :  { %v2686_v61 = vpop.permute.xlu1 %2685 }
0x3436   :  { %2688 = vst.msk [vmem:[#allocation3 + $0x20] sm:$0xff] %vm209_vm2, %v2686_v61  ;;  %4654 = vmatmul.mubr.msk.f32.vlgmr.msra.gmra.mrb[26].mxu1 %vm209_vm2, %v2686_v61 }
0x3437   :  { %4953 = vmatpush3.bf16.msra.mxu1 %v5736_v48  ;;  %4675 = vmatprep.mubr.msk.f32.mxu1 %vm5281_vm1, %v5282_v4 }
0x3438   :  { %4954 = vmatprep.subr.bf16.mxu1 %v5280_v0 }
0x343b   :  { %4956 = vmatpush3.bf16.msra.mxu1 %v5746_v51 }
0x343c   :  { %4965 = vmatprep.subr.bf16.mxu1 %v5280_v0 }
0x343d   :  { %v3011_v18 = vld [vmem:[#allocation3 + $0x20] sm:$0xff] }
0x3509   :  { %v2758_v63 = vpop.f32.mrb[26].mxu1 }
0x350a   :  { %v2762_v1 = vadd.f32 %v2758_v63, %v2155_v62  ;;  %v4655_v2 = vpop.f32.mrb[27].mxu1  ;;  %v2165_v63 = vadd.f32 %v5800_v52, %v5772_v50 }
0x350c   :  { %5192 = vtanh.f32 %v2762_v1  ;;  %v4119_v48 = vmul.f32 -1.442695, %v2762_v1 }
0x350e   :  { %5194 = vpow2.f32 %v4119_v48  ;;  %v5942_v48 = vld [vmem:[%s6074_s12] ss:$0 sm:$0xff] }
0x3516   :  { %v5193_v3 = vpop.eup %5192 }
0x3517   :  { %2772 = vrot.lane.b32.xlu0 %v5193_v3, %s5283_s17 }
0x3518   :  { %v5195_v6 = vpop.eup %5194 }
0x3519   :  { %v2766_v7 = vadd.f32 1.0, %v5195_v6 }
0x351b   :  { %5196 = vrcp.f32 %v2766_v7 }
0x3525   :  { %v5197_v10 = vpop.eup %5196 }
0x3526   :  { %v2770_v8 = vmul.f32 %v5197_v10, %v2677_v35  ;;  %v3005_v35 = vld [vmem:[%s6073_s11 + $0x18] sm:$0xff] }
0x3527   :  { %v5916_v49 = vpack.c.bf16 %v3005_v35, %v3004_v47 }
0x3589   :  { %v2773_v53 = vpop.permute.xlu0 %2772 }
0x358a   :  { %v2775_v51 = vmul.f32 %v5197_v10, %v2773_v53 }
0x358c   :  { %2777 = vrot.lane.b32.xlu1 %v2775_v51, %s5284_s3 }
0x35fe   :  { %v2778_v5 = vpop.permute.xlu1 %2777 }
0x35ff   :  { %v2780_v33 = vadd.f32 %v2778_v5, %v2770_v8 }
0x3601   :  { %5198 = vtanh.f32 %v2780_v33 }
0x360b   :  { %v5199_v59 = vpop.eup %5198 }
0x360c   :  { %2783 = vrot.lane.b32.xlu0 %v5199_v59, %s5283_s17 }
0x367e   :  { %v2784_v31 = vpop.permute.xlu0 %2783 }
0x367f   :  { %v2786_v9 = vmul.f32 %v5197_v10, %v2784_v31 }
0x3681   :  { %2788 = vrot.lane.b32.xlu1 %v2786_v9, %s5284_s3 }
0x36f3   :  { %v2789_v13 = vpop.permute.xlu1 %2788 }
0x36f4   :  { %2791 = vst.msk [vmem:[#allocation3 + $0x28] sm:$0xff] %vm209_vm2, %v2789_v13  ;;  %4665 = vmatmul.mubr.msk.f32.vlgmr.msra.gmra.mrb[40].mxu0 %vm209_vm2, %v2789_v13 }
0x36f5   :  { %4960 = vmatpush3.bf16.msra.mxu0 %v4957_v37  ;;  %4686 = vmatprep.mubr.msk.f32.mxu0 %vm209_vm2, %v3007_v14 }
0x36f6   :  { %4962 = vmatprep.subr.bf16.mxu0 %v4961_v36 }
0x36f9   :  { %4964 = vmatpush3.bf16.msra.mxu0 %v4961_v36 }
0x36fa   :  { %4977 = vmatprep.subr.bf16.mxu0 %v5280_v0 }
0x36fb   :  { %v3012_v19 = vld [vmem:[#allocation3 + $0x28] sm:$0xff] }
0x36fc   :  { %4687 = vmatmul.mubr.msk.f32.vlgmr.msra.gmra.mrb[42].mxu0 %vm209_vm2, %v3008_v15 }
0x36fd   :  { %4689 = vmatprep.mubr.msk.f32.mxu0 %vm209_vm2, %v3009_v16  ;;  %4979 = vmatpush3.bf16.msra.mxu0 %v5906_v46 }
0x36fe   :  { %4980 = vmatprep.subr.bf16.mxu0 %v5280_v0 }
0x3700   :  { %4690 = vmatmul.mubr.msk.f32.gmra.mrb[44].mxu0 %vm209_vm2, %v3010_v17 }
0x3701   :  { %4692 = vmatprep.mubr.msk.f32.mxu0 %vm209_vm2, %v3011_v18  ;;  %4982 = vmatpush3.bf16.msra.mxu0 %v5916_v49 }
0x3702   :  { %4989 = vmatprep.subr.bf16.mxu0 %v5280_v0 }
0x3704   :  { %4693 = vmatmul.mubr.msk.f32.gmra.mrb[46].mxu0 %vm209_vm2, %v3012_v19 }
0x37c7   :  { %v2861_v21 = vpop.f32.mrb[40].mxu0 }
0x37c8   :  { %v2865_v22 = vadd.f32 %v2861_v21, %v2160_v20  ;;  %v4666_v23 = vpop.f32.mrb[41].mxu0 }
0x37ca   :  { %5200 = vtanh.f32 %v2865_v22  ;;  %v4121_v39 = vmul.f32 -1.442695, %v2865_v22 }
0x37cc   :  { %5202 = vpow2.f32 %v4121_v39 }
0x37cf   :  { %v5884_v24 = vpop.f32.mrb[42].mxu0 }
0x37d0   :  { %v3111_v25 = vpop.f32.mrb[43].mxu0 }
0x37d1   :  { %v3112_v6 = vadd.f32 %v5942_v48, %v3111_v25 }
0x37d3   :  { %v5886_v34 = vpop.f32.mrb[44].mxu0 }
0x37d4   :  { %v5201_v26 = vpop.eup %5200  ;;  %v5888_v27 = vpop.f32.mrb[45].mxu0 }
0x37d5   :  { %2875 = vrot.lane.b32.xlu0 %v5201_v26, %s5283_s17  ;;  %v3117_v26 = vadd.f32 %v5884_v24, %v5942_v48 }
0x37d6   :  { %v5203_v58 = vpop.eup %5202 }
0x37d7   :  { %v5891_v29 = vpop.f32.mrb[46].mxu0  ;;  %v2869_v56 = vadd.f32 1.0, %v5203_v58 }
0x37d8   :  { %v5893_v30 = vpop.f32.mrb[47].mxu0 }
0x37d9   :  { %5204 = vrcp.f32 %v2869_v56 }
0x37e3   :  { %v5205_v60 = vpop.eup %5204 }
0x37e4   :  { %v2873_v42 = vmul.f32 %v5205_v60, %v2780_v33 }
0x3847   :  { %v2876_v40 = vpop.permute.xlu0 %2875 }
0x3848   :  { %v2878_v41 = vmul.f32 %v5205_v60, %v2876_v40 }
0x384a   :  { %2880 = vrot.lane.b32.xlu1 %v2878_v41, %s5284_s3 }
0x38bc   :  { %v2881_v43 = vpop.permute.xlu1 %2880 }
0x38bd   :  { %v5896_v44 = vadd.f32 %v2881_v43, %v2873_v42 }
0x38bf   :  { %5206 = vtanh.f32 %v5896_v44 }
0x38c9   :  { %v5207_v28 = vpop.eup %5206 }
0x38ca   :  { %2886 = vrot.lane.b32.xlu0 %v5207_v28, %s5283_s17 }
0x393c   :  { %v2887_v38 = vpop.permute.xlu0 %2886 }
0x393d   :  { %v2889_v55 = vmul.f32 %v5205_v60, %v2887_v38 }
0x393f   :  { %2891 = vrot.lane.b32.xlu1 %v2889_v55, %s5284_s3 }
0x39b1   :  { %v2892_v61 = vpop.permute.xlu1 %2891 }
0x39b2   :  { %2894 = vst.msk [vmem:[#allocation3 + $0x30] sm:$0xff] %vm209_vm2, %v2892_v61  ;;  %4676 = vmatmul.mubr.msk.f32.vlgmr.msra.gmra.mrb[28].mxu1 %vm209_vm2, %v2892_v61 }
0x39b3   :  { %4967 = vmatpush3.bf16.msra.mxu1 %v5906_v46  ;;  %4706 = vmatprep.mubr.msk.f32.mxu1 %vm5281_vm1, %v5282_v4 }
0x39b4   :  { %4968 = vmatprep.subr.bf16.mxu1 %v5280_v0 }
0x39b7   :  { %4970 = vmatpush3.bf16.msra.mxu1 %v5916_v49 }
0x39b8   :  { %4971 = vmatprep.subr.bf16.mxu1 %v5280_v0 }
0x39b9   :  { %v3013_v62 = vld [vmem:[#allocation3 + $0x30] sm:$0xff] }
0x39ba   :  { %4707 = vmatmul.mubr.f32.vlgmr.msra.gmra.mrb[30].mxu1 %v5282_v4  ;;  %4695 = vmatprep.mubr.msk.f32.mxu0 %vm209_vm2, %v3013_v62 }
0x39bb   :  { %4973 = vmatpush3.bf16.msra.mxu1 %v5906_v46  ;;  %4717 = vmatprep.mubr.msk.f32.mxu1 %vm5281_vm1, %v5282_v4 }
0x39bc   :  { %4974 = vmatprep.subr.bf16.mxu1 %v5280_v0 }
0x39bf   :  { %4976 = vmatpush3.bf16.msra.mxu1 %v5916_v49 }
0x39c0   :  { %4983 = vmatprep.subr.bf16.mxu1 %v5280_v0 }
0x3a85   :  { %v2964_v1 = vpop.f32.mrb[28].mxu1 }
0x3a86   :  { %v2968_v2 = vadd.f32 %v2964_v1, %v2165_v63  ;;  %v4677_v3 = vpop.f32.mrb[29].mxu1 }
0x3a88   :  { %v4123_v57 = vmul.f32 -1.442695, %v2968_v2 }
0x3a8d   :  { %v3225_v7 = vpop.f32.mrb[30].mxu1 }
0x3a8e   :  { %v3229_v10 = vadd.f32 %v3225_v7, %v3112_v6  ;;  %v4708_v53 = vpop.f32.mrb[31].mxu1 }
0x3a90   :  { %5208 = vtanh.f32 %v3229_v10  ;;  %v4133_v8 = vmul.f32 -1.442695, %v3229_v10 }
0x3a92   :  { %5210 = vpow2.f32 %v4133_v8 }
0x3a9a   :  { %v5209_v51 = vpop.eup %5208 }
0x3a9b   :  { %3239 = vrot.lane.b32.xlu0 %v5209_v51, %s5283_s17 }
0x3a9c   :  { %v5211_v50 = vpop.eup %5210 }
0x3a9d   :  { %v3233_v52 = vadd.f32 1.0, %v5211_v50 }
0x3a9f   :  { %5212 = vrcp.f32 %v3233_v52 }
0x3aa9   :  { %v5213_v5 = vpop.eup %5212 }
0x3aaa   :  { %v3237_v12 = vmul.f32 0.0, %v5213_v5 }
0x3b0d   :  { %v3240_v33 = vpop.permute.xlu0 %3239 }
0x3b0e   :  { %v3242_v54 = vmul.f32 %v5213_v5, %v3240_v33 }
0x3b10   :  { %3244 = vrot.lane.b32.xlu1 %v3242_v54, %s5284_s3 }
0x3b82   :  { %v3245_v37 = vpop.permute.xlu1 %3244 }
0x3b83   :  { %v3247_v59 = vadd.f32 %v3245_v37, %v3237_v12 }
0x3b85   :  { %5214 = vtanh.f32 %v3247_v59 }
0x3b86   :  { %5216 = vtanh.f32 %v2968_v2  ;;  %v3122_v2 = vadd.f32 %v5942_v48, %v5888_v27 }
0x3b87   :  { %5218 = vpow2.f32 %v4123_v57 }
0x3b8f   :  { %v5215_v31 = vpop.eup %5214 }
0x3b90   :  { %3250 = vrot.lane.b32.xlu0 %v5215_v31, %s5283_s17  ;;  %v5217_v9 = vpop.eup %5216 }
0x3b91   :  { %v5219_v11 = vpop.eup %5218 }
0x3b92   :  { %v2972_v36 = vadd.f32 1.0, %v5219_v11 }
0x3b94   :  { %2978 = vrot.lane.b32.xlu0 %v5217_v9, %s5283_s17  ;;  %5220 = vrcp.f32 %v2972_v36  ;;  %v3127_v9 = vadd.f32 %v5886_v34, %v5942_v48 }
0x3b9e   :  { %v5221_v15 = vpop.eup %5220 }
0x3b9f   :  { %v2976_v19 = vmul.f32 %v5221_v15, %v5896_v44 }
0x3c02   :  { %v3251_v13 = vpop.permute.xlu0 %3250 }
0x3c03   :  { %v3253_v14 = vmul.f32 %v5213_v5, %v3251_v13 }
0x3c05   :  { %3256 = vrot.lane.b32.xlu1 %v3253_v14, %s5284_s3 }
0x3c06   :  { %v2979_v16 = vpop.permute.xlu0 %2978 }
0x3c07   :  { %v2981_v17 = vmul.f32 %v5221_v15, %v2979_v16 }
0x3c09   :  { %2983 = vrot.lane.b32.xlu0 %v2981_v17, %s5284_s3 }
0x3c77   :  { %v3257_v18 = vpop.permute.xlu1 %3256 }
0x3c78   :  { %4718 = vmatmul.mubr.msk.f32.vlgmr.msra.gmra.mrb[32].mxu1 %vm209_vm2, %v3257_v18 }
0x3c79   :  { %4985 = vmatpush3.bf16.msra.mxu1 %v5906_v46  ;;  %4739 = vmatprep.mubr.msk.f32.mxu1 %vm5281_vm1, %v5282_v4 }
0x3c7a   :  { %4986 = vmatprep.subr.bf16.mxu1 %v5280_v0 }
0x3c7b   :  { %v2984_v20 = vpop.permute.xlu0 %2983 }
0x3c7c   :  { %v2986_v21 = vadd.f32 %v2984_v20, %v2976_v19 }
0x3c7d   :  { %4988 = vmatpush3.bf16.msra.mxu1 %v5916_v49 }
0x3c7e   :  { %5222 = vtanh.f32 %v2986_v21  ;;  %4995 = vmatprep.subr.bf16.mxu1 %v5280_v0 }
0x3c88   :  { %v5223_v22 = vpop.eup %5222 }
0x3c89   :  { %2989 = vrot.lane.b32.xlu0 %v5223_v22, %s5283_s17 }
0x3cfb   :  { %v2990_v23 = vpop.permute.xlu0 %2989 }
0x3cfc   :  { %v2992_v25 = vmul.f32 %v5221_v15, %v2990_v23 }
0x3cfe   :  { %2994 = vrot.lane.b32.xlu0 %v2992_v25, %s5284_s3 }
0x3d4b   :  { %v3326_v39 = vpop.f32.mrb[32].mxu1 }
0x3d4c   :  { %v3330_v58 = vadd.f32 %v3326_v39, %v3117_v26  ;;  %v4719_v56 = vpop.f32.mrb[33].mxu1  ;;  %v3132_v39 = vadd.f32 %v5942_v48, %v5893_v30 }
0x3d4e   :  { %5224 = vtanh.f32 %v3330_v58  ;;  %v4135_v42 = vmul.f32 -1.442695, %v3330_v58 }
0x3d50   :  { %5226 = vpow2.f32 %v4135_v42 }
0x3d58   :  { %v5225_v60 = vpop.eup %5224 }
0x3d59   :  { %3340 = vrot.lane.b32.xlu1 %v5225_v60, %s5283_s17 }
0x3d5a   :  { %v5227_v43 = vpop.eup %5226 }
0x3d5b   :  { %v3334_v24 = vadd.f32 1.0, %v5227_v43 }
0x3d5d   :  { %5228 = vrcp.f32 %v3334_v24 }
0x3d67   :  { %v5229_v44 = vpop.eup %5228 }
0x3d68   :  { %v3338_v32 = vmul.f32 %v5229_v44, %v3247_v59 }
0x3d70   :  { %v2995_v40 = vpop.permute.xlu0 %2994 }
0x3d71   :  { %2997 = vst.msk [vmem:[#allocation3 + $0x38] sm:$0xff] %vm209_vm2, %v2995_v40 }
0x3d78   :  { %v3014_v41 = vld [vmem:[#allocation3 + $0x38] sm:$0xff] }
0x3d79   :  { %4696 = vmatmul.mubr.msk.f32.gmra.mrb[48].mxu0 %vm209_vm2, %v3014_v41 }
0x3d7a   :  { %4728 = vmatprep.mubr.msk.f32.mxu0 %vm5281_vm1, %v5282_v4 }
0x3dcb   :  { %v3341_v28 = vpop.permute.xlu1 %3340 }
0x3dcc   :  { %v3343_v45 = vmul.f32 %v5229_v44, %v3341_v28 }
0x3dce   :  { %3345 = vrot.lane.b32.xlu1 %v3343_v45, %s5284_s3 }
0x3e40   :  { %v3346_v47 = vpop.permute.xlu1 %3345 }
0x3e41   :  { %v3348_v35 = vadd.f32 %v3346_v47, %v3338_v32 }
0x3e43   :  { %5230 = vtanh.f32 %v3348_v35 }
0x3e4c   :  { %v5969_v38 = vpop.f32.mrb[48].mxu0 }
0x3e4d   :  { %v5231_v55 = vpop.eup %5230  ;;  %v5971_v61 = vpop.f32.mrb[49].mxu0 }
0x3e4e   :  { %3351 = vrot.lane.b32.xlu1 %v5231_v55, %s5283_s17 }
0x3ec0   :  { %v3352_v62 = vpop.permute.xlu1 %3351 }
0x3ec1   :  { %v3354_v63 = vmul.f32 %v5229_v44, %v3352_v62 }
0x3ec3   :  { %3357 = vrot.lane.b32.xlu1 %v3354_v63, %s5284_s3  ;;  %v3137_v63 = vadd.f32 %v5891_v29, %v5942_v48 }
0x3f35   :  { %v3358_v1 = vpop.permute.xlu1 %3357 }
0x3f36   :  { %4729 = vmatmul.mubr.msk.f32.vlgmr.msra.gmra.mrb[50].mxu0 %vm209_vm2, %v3358_v1 }
0x3f37   :  { %4991 = vmatpush3.bf16.msra.mxu0 %v5906_v46  ;;  %4750 = vmatprep.mubr.msk.f32.mxu0 %vm5281_vm1, %v5282_v4 }
0x3f38   :  { %4992 = vmatprep.subr.bf16.mxu0 %v5280_v0 }
0x3f3b   :  { %4994 = vmatpush3.bf16.msra.mxu0 %v5916_v49 }
0x3f3c   :  { %5001 = vmatprep.subr.bf16.mxu0 %v5280_v0 }
0x4009   :  { %v3427_v3 = vpop.f32.mrb[50].mxu0 }
0x400a   :  { %v3431_v6 = vadd.f32 %v3427_v3, %v3122_v2  ;;  %v4730_v7 = vpop.f32.mrb[51].mxu0 }
0x400c   :  { %5232 = vtanh.f32 %v3431_v6  ;;  %v4137_v53 = vmul.f32 -1.442695, %v3431_v6 }
0x400e   :  { %5234 = vpow2.f32 %v4137_v53 }
0x4016   :  { %v5233_v10 = vpop.eup %5232 }
0x4017   :  { %3441 = vrot.lane.b32.xlu0 %v5233_v10, %s5283_s17 }
0x4018   :  { %v5235_v51 = vpop.eup %5234 }
0x4019   :  { %v3435_v8 = vadd.f32 1.0, %v5235_v51 }
0x401b   :  { %5236 = vrcp.f32 %v3435_v8 }
0x4025   :  { %v5237_v50 = vpop.eup %5236 }
0x4026   :  { %v3439_v33 = vmul.f32 %v5237_v50, %v3348_v35 }
0x4089   :  { %v3442_v52 = vpop.permute.xlu0 %3441 }
0x408a   :  { %v3444_v5 = vmul.f32 %v5237_v50, %v3442_v52 }
0x408c   :  { %3446 = vrot.lane.b32.xlu1 %v3444_v5, %s5284_s3 }
0x40fe   :  { %v3447_v54 = vpop.permute.xlu1 %3446 }
0x40ff   :  { %v3449_v27 = vadd.f32 %v3447_v54, %v3439_v33 }
0x4101   :  { %5238 = vtanh.f32 %v3449_v27 }
0x410b   :  { %v5239_v12 = vpop.eup %5238 }
0x410c   :  { %3452 = vrot.lane.b32.xlu0 %v5239_v12, %s5283_s17 }
0x417e   :  { %v3453_v37 = vpop.permute.xlu0 %3452 }
0x417f   :  { %v3455_v59 = vmul.f32 %v5237_v50, %v3453_v37 }
0x4181   :  { %3458 = vrot.lane.b32.xlu1 %v3455_v59, %s5284_s3 }
0x41f3   :  { %v3459_v31 = vpop.permute.xlu1 %3458 }
0x41f4   :  { %4740 = vmatmul.mubr.msk.f32.vlgmr.msra.gmra.mrb[34].mxu1 %vm209_vm2, %v3459_v31 }
0x41f5   :  { %4997 = vmatpush3.bf16.msra.mxu1 %v5906_v46  ;;  %4761 = vmatprep.mubr.msk.f32.mxu1 %vm5281_vm1, %v5282_v4 }
0x41f6   :  { %4998 = vmatprep.subr.bf16.mxu1 %v5280_v0 }
0x41f9   :  { %5000 = vmatpush3.bf16.msra.mxu1 %v5916_v49 }
0x41fa   :  { %5007 = vmatprep.subr.bf16.mxu1 %v5280_v0 }
0x42c7   :  { %v3528_v57 = vpop.f32.mrb[34].mxu1 }
0x42c8   :  { %v3532_v11 = vadd.f32 %v3528_v57, %v3127_v9  ;;  %v4741_v36 = vpop.f32.mrb[35].mxu1 }
0x42ca   :  { %5240 = vtanh.f32 %v3532_v11  ;;  %v4139_v14 = vmul.f32 -1.442695, %v3532_v11 }
0x42cc   :  { %5242 = vpow2.f32 %v4139_v14 }
0x42d4   :  { %v5241_v13 = vpop.eup %5240 }
0x42d5   :  { %3542 = vrot.lane.b32.xlu0 %v5241_v13, %s5283_s17 }
0x42d6   :  { %v5243_v15 = vpop.eup %5242 }
0x42d7   :  { %v3536_v16 = vadd.f32 1.0, %v5243_v15 }
0x42d9   :  { %5244 = vrcp.f32 %v3536_v16 }
0x42e3   :  { %v5245_v17 = vpop.eup %5244 }
0x42e4   :  { %v3540_v20 = vmul.f32 %v5245_v17, %v3449_v27  ;;  %v3142_v27 = vadd.f32 %v5942_v48, %v5971_v61 }
0x4347   :  { %v3543_v18 = vpop.permute.xlu0 %3542 }
0x4348   :  { %v3545_v19 = vmul.f32 %v5245_v17, %v3543_v18 }
0x434a   :  { %3547 = vrot.lane.b32.xlu1 %v3545_v19, %s5284_s3 }
0x43bc   :  { %v3548_v21 = vpop.permute.xlu1 %3547 }
0x43bd   :  { %v3550_v34 = vadd.f32 %v3548_v21, %v3540_v20  ;;  %v3147_v20 = vadd.f32 %v5969_v38, %v5942_v48  ;;  %v3961_v38 = vld [vmem:[%s6075_s13] sm:$0xff] }
0x43bf   :  { %5246 = vtanh.f32 %v3550_v34 }
0x43c9   :  { %v5247_v22 = vpop.eup %5246 }
0x43ca   :  { %3553 = vrot.lane.b32.xlu0 %v5247_v22, %s5283_s17 }
0x443c   :  { %v3554_v23 = vpop.permute.xlu0 %3553 }
0x443d   :  { %v3556_v25 = vmul.f32 %v5245_v17, %v3554_v23 }
0x443f   :  { %3559 = vrot.lane.b32.xlu1 %v3556_v25, %s5284_s3 }
0x44b1   :  { %v3560_v26 = vpop.permute.xlu1 %3559 }
0x44b2   :  { %4751 = vmatmul.mubr.msk.f32.vlgmr.msra.gmra.mrb[52].mxu0 %vm209_vm2, %v3560_v26 }
0x44b3   :  { %5003 = vmatpush3.bf16.msra.mxu0 %v5906_v46  ;;  %4772 = vmatprep.mubr.msk.f32.mxu0 %vm5281_vm1, %v5282_v4 }
0x44b4   :  { %5004 = vmatprep.subr.bf16.mxu0 %v5280_v0 }
0x44b7   :  { %5006 = vmatpush3.bf16.msra.mxu0 %v5916_v49 }
0x44b8   :  { %5013 = vmatprep.subr.bf16.mxu0 %v5280_v0 }
0x4585   :  { %v3629_v58 = vpop.f32.mrb[52].mxu0 }
0x4586   :  { %v3633_v56 = vadd.f32 %v3629_v58, %v3132_v39  ;;  %v4752_v60 = vpop.f32.mrb[53].mxu0 }
0x4588   :  { %5248 = vtanh.f32 %v3633_v56  ;;  %v4141_v41 = vmul.f32 -1.442695, %v3633_v56 }
0x458a   :  { %5250 = vpow2.f32 %v4141_v41 }
0x4592   :  { %v5249_v40 = vpop.eup %5248 }
0x4593   :  { %3643 = vrot.lane.b32.xlu0 %v5249_v40, %s5283_s17 }
0x4594   :  { %v5251_v42 = vpop.eup %5250 }
0x4595   :  { %v3637_v43 = vadd.f32 1.0, %v5251_v42  ;;  %v3962_v42 = vld [vmem:[%s6075_s13 + $0x8] sm:$0xff] }
0x4597   :  { %5252 = vrcp.f32 %v3637_v43  ;;  %v3963_v43 = vld [vmem:[%s6075_s13 + $0x10] sm:$0xff] }
0x45a1   :  { %v5253_v24 = vpop.eup %5252 }
0x45a2   :  { %v3641_v45 = vmul.f32 %v5253_v24, %v3550_v34 }
0x4605   :  { %v3644_v44 = vpop.permute.xlu0 %3643 }
0x4606   :  { %v3646_v28 = vmul.f32 %v5253_v24, %v3644_v44  ;;  %v3964_v44 = vld [vmem:[%s6075_s13 + $0x18] sm:$0xff] }
0x4608   :  { %3648 = vrot.lane.b32.xlu1 %v3646_v28, %s5284_s3  ;;  %v5017_v28 = vpack.c.bf16 %v3964_v44, %v3963_v43 }
0x467a   :  { %v3649_v32 = vpop.permute.xlu1 %3648 }
0x467b   :  { %v3651_v30 = vadd.f32 %v3649_v32, %v3641_v45 }
0x467d   :  { %5254 = vtanh.f32 %v3651_v30 }
0x4687   :  { %v5255_v47 = vpop.eup %5254 }
0x4688   :  { %3654 = vrot.lane.b32.xlu0 %v5255_v47, %s5283_s17 }
0x46fa   :  { %v3655_v35 = vpop.permute.xlu0 %3654 }
0x46fb   :  { %v3657_v55 = vmul.f32 %v5253_v24, %v3655_v35  ;;  %v5014_v24 = vpack.c.bf16 %v3962_v42, %v3961_v38  ;;  %v4148_v35 = vld [vmem:[%s6076_s14] ss:$0 sm:$0xff] }
0x46fd   :  { %3660 = vrot.lane.b32.xlu1 %v3657_v55, %s5284_s3 }
0x476f   :  { %v3661_v62 = vpop.permute.xlu1 %3660 }
0x4770   :  { %4762 = vmatmul.mubr.msk.f32.vlgmr.msra.gmra.mrb[36].mxu1 %vm209_vm2, %v3661_v62 }
0x4771   :  { %5009 = vmatpush3.bf16.msra.mxu1 %v5906_v46  ;;  %4783 = vmatprep.mubr.msk.f32.mxu1 %vm5281_vm1, %v5282_v4 }
0x4772   :  { %5010 = vmatprep.subr.bf16.mxu1 %v5280_v0 }
0x4775   :  { %5012 = vmatpush3.bf16.msra.mxu1 %v5916_v49 }
0x4843   :  { %v3730_v1 = vpop.f32.mrb[36].mxu1 }
0x4844   :  { %v3734_v2 = vadd.f32 %v3730_v1, %v3137_v63  ;;  %v4763_v3 = vpop.f32.mrb[37].mxu1 }
0x4846   :  { %5256 = vtanh.f32 %v3734_v2  ;;  %v4143_v7 = vmul.f32 -1.442695, %v3734_v2 }
0x4848   :  { %5258 = vpow2.f32 %v4143_v7 }
0x4850   :  { %v5257_v6 = vpop.eup %5256 }
0x4851   :  { %3744 = vrot.lane.b32.xlu0 %v5257_v6, %s5283_s17 }
0x4852   :  { %v5259_v46 = vpop.eup %5258 }
0x4853   :  { %v3738_v10 = vadd.f32 1.0, %v5259_v46 }
0x4855   :  { %5260 = vrcp.f32 %v3738_v10 }
0x485f   :  { %v5261_v53 = vpop.eup %5260 }
0x4860   :  { %v3742_v49 = vmul.f32 %v5261_v53, %v3651_v30 }
0x48c3   :  { %v3745_v51 = vpop.permute.xlu0 %3744 }
0x48c4   :  { %v3747_v8 = vmul.f32 %v5261_v53, %v3745_v51 }
0x48c6   :  { %3749 = vrot.lane.b32.xlu1 %v3747_v8, %s5284_s3 }
0x4938   :  { %v3750_v50 = vpop.permute.xlu1 %3749 }
0x4939   :  { %v3752_v29 = vadd.f32 %v3750_v50, %v3742_v49 }
0x493b   :  { %5262 = vtanh.f32 %v3752_v29 }
0x4945   :  { %v5263_v52 = vpop.eup %5262 }
0x4946   :  { %3755 = vrot.lane.b32.xlu0 %v5263_v52, %s5283_s17 }
0x49b8   :  { %v3756_v5 = vpop.permute.xlu0 %3755 }
0x49b9   :  { %v3758_v33 = vmul.f32 %v5261_v53, %v3756_v5 }
0x49bb   :  { %3761 = vrot.lane.b32.xlu1 %v3758_v33, %s5284_s3 }
0x4a2d   :  { %v3762_v54 = vpop.permute.xlu1 %3761 }
0x4a2e   :  { %4773 = vmatmul.mubr.msk.f32.vlgmr.msra.gmra.mrb[54].mxu0 %vm209_vm2, %v3762_v54 }
0x4a2f   :  { %4794 = vmatprep.mubr.msk.f32.mxu0 %vm5281_vm1, %v5282_v4  ;;  %5015 = vmatpush3.bf16.msra.mxu0 %v5014_v24 }
0x4a30   :  { %5016 = vmatprep.subr.bf16.mxu0 %v5280_v0 }
0x4a33   :  { %5018 = vmatpush3.bf16.msra.mxu0 %v5017_v28 }
0x4b01   :  { %v3831_v12 = vpop.f32.mrb[54].mxu0 }
0x4b02   :  { %v3835_v37 = vadd.f32 %v3831_v12, %v3142_v27  ;;  %v4774_v59 = vpop.f32.mrb[55].mxu0 }
0x4b04   :  { %5264 = vtanh.f32 %v3835_v37  ;;  %v4145_v9 = vmul.f32 -1.442695, %v3835_v37 }
0x4b06   :  { %5266 = vpow2.f32 %v4145_v9 }
0x4b0e   :  { %v5265_v31 = vpop.eup %5264 }
0x4b0f   :  { %3845 = vrot.lane.b32.xlu0 %v5265_v31, %s5283_s17 }
0x4b10   :  { %v5267_v57 = vpop.eup %5266 }
0x4b11   :  { %v3839_v11 = vadd.f32 1.0, %v5267_v57 }
0x4b13   :  { %5268 = vrcp.f32 %v3839_v11 }
0x4b1d   :  { %v5269_v36 = vpop.eup %5268 }
0x4b1e   :  { %v3843_v4 = vmul.f32 %v5269_v36, %v3752_v29 }
0x4b81   :  { %v3846_v13 = vpop.permute.xlu0 %3845 }
0x4b82   :  { %v3848_v14 = vmul.f32 %v5269_v36, %v3846_v13 }
0x4b84   :  { %3850 = vrot.lane.b32.xlu1 %v3848_v14, %s5284_s3 }
0x4bf6   :  { %v3851_v15 = vpop.permute.xlu1 %3850 }
0x4bf7   :  { %v3853_v61 = vadd.f32 %v3851_v15, %v3843_v4 }
0x4bf9   :  { %5270 = vtanh.f32 %v3853_v61 }
0x4c03   :  { %v5271_v16 = vpop.eup %5270 }
0x4c04   :  { %3856 = vrot.lane.b32.xlu0 %v5271_v16, %s5283_s17 }
0x4c76   :  { %v3857_v17 = vpop.permute.xlu0 %3856 }
0x4c77   :  { %v3859_v18 = vmul.f32 %v5269_v36, %v3857_v17 }
0x4c79   :  { %3862 = vrot.lane.b32.xlu1 %v3859_v18, %s5284_s3 }
0x4ceb   :  { %v3863_v19 = vpop.permute.xlu1 %3862 }
0x4cec   :  { %4784 = vmatmul.mubr.msk.f32.vlgmr.msra.gmra.mrb[38].mxu1 %vm209_vm2, %v3863_v19 }
0x4dbf   :  { %v3932_v21 = vpop.f32.mrb[38].mxu1 }
0x4dc0   :  { %v3936_v34 = vadd.f32 %v3932_v21, %v3147_v20  ;;  %v4785_v22 = vpop.f32.mrb[39].mxu1 }
0x4dc2   :  { %5272 = vtanh.f32 %v3936_v34  ;;  %v4147_v25 = vmul.f32 -1.442695, %v3936_v34 }
0x4dc4   :  { %5274 = vpow2.f32 %v4147_v25 }
0x4dcc   :  { %v5273_v23 = vpop.eup %5272 }
0x4dcd   :  { %3946 = vrot.lane.b32.xlu0 %v5273_v23, %s5283_s17 }
0x4dce   :  { %v5275_v26 = vpop.eup %5274 }
0x4dcf   :  { %v3940_v39 = vadd.f32 1.0, %v5275_v26 }
0x4dd1   :  { %5276 = vrcp.f32 %v3940_v39 }
0x4ddb   :  { %v5277_v58 = vpop.eup %5276 }
0x4ddc   :  { %v3944_v40 = vmul.f32 %v5277_v58, %v3853_v61 }
0x4e3f   :  { %v3947_v56 = vpop.permute.xlu0 %3946 }
0x4e40   :  { %v3949_v60 = vmul.f32 %v5277_v58, %v3947_v56 }
0x4e42   :  { %3951 = vrot.lane.b32.xlu1 %v3949_v60, %s5284_s3 }
0x4eb4   :  { %v3952_v41 = vpop.permute.xlu1 %3951 }
0x4eb5   :  { %v3954_v48 = vadd.f32 %v3952_v41, %v3944_v40 }
0x4eb7   :  { %5278 = vtanh.f32 %v3954_v48 }
0x4ec1   :  { %v5279_v45 = vpop.eup %5278 }
0x4ec2   :  { %3957 = vrot.lane.b32.xlu0 %v5279_v45, %s5283_s17 }
0x4f34   :  { %v3958_v32 = vpop.permute.xlu0 %3957 }
0x4f35   :  { %v3960_v30 = vmul.f32 %v5277_v58, %v3958_v32 }
0x4f37   :  { %3973 = vrot.lane.b32.xlu1 %v3960_v30, %s5284_s3 }
0x4fa9   :  { %v3974_v47 = vpop.permute.xlu1 %3973 }
0x4faa   :  { %4795 = vmatmul.mubr.msk.f32.vlgmr.msra.gmra.mrb[56].mxu0 %vm209_vm2, %v3974_v47 }
0x507d   :  { %v4043_v55 = vpop.f32.mrb[56].mxu0 }
0x507e   :  { %v4044_v62 = vadd.f32 %v4148_v35, %v4043_v55  ;;  %v4796_v63 = vpop.f32.mrb[57].mxu0 }
0x5080   :  { %4047 = vst [vmem:[%s6077_s15] sm:$0xff] %v4044_v62 }

</bundles_post_ra>
